<compile_context>
chip_gen: v6e
topology: v6e:2x2x1
jax: 0.10.0
libtpu: 0.0.40
codegen_flags: <defaults>
</compile_context>

<pallas_src>
import math
import jax
import jax.numpy as jnp
from jax.experimental import pallas as pl
from jax.experimental.pallas import tpu as pltpu

_F32 = jnp.float32
_HEADS = 8


def _leaky(x, slope):
    return jnp.where(x > 0, x, slope * x)


# --------------------------- fused forward kernel ---------------------------
def _make_forward_kernel(heads, ff_acts=("leaky_relu", "relu", "relu"),
                         gat_slope=0.2, mlp_slope=0.01, bn_eps=1e-5):
    inv_heads = 1.0 / float(heads)

    def dense_gat_mean(x, w, asrc_blk, adst, bias):
        """Dense multi-head GATConv, concat=False (mean over heads) + bias.

        x        [N, E]     node features
        w        [E, H*O]   all-head projection weights (single lane-dense matmul)
        asrc_blk [H, H*O]   att_src block-diag-expanded: one matmul -> all heads'
                            source alphas
        adst     [H, O]     att_dst (per-head dest alphas via lane reduction)
        bias     [1, O]
        """
        n = x.shape[0]
        o = adst.shape[1]
        xp_all = jnp.dot(x, w, preferred_element_type=_F32)            # [N, H*O]
        a_src_all = jax.lax.dot_general(                                # [H, N]
            asrc_blk, xp_all, (((1,), (1,)), ((), ())),
            preferred_element_type=_F32)
        acc = jnp.zeros((n, o), _F32)
        for h in range(heads):                                          # static unroll
            xp_h = xp_all[:, h * o:(h + 1) * o]                         # [N, O]
            # destination alpha: cheap VPU/XLU reduction (no M=1 matmul)
            a_dst = jnp.sum(xp_h * adst[h:h + 1, :], axis=-1, keepdims=True)
            e = _leaky(a_dst + a_src_all[h:h + 1, :], gat_slope)        # [N, N]
            e = e - jnp.max(e, axis=-1, keepdims=True)
            p = jnp.exp(e)
            # EUP approximate reciprocal; fold the 1/heads averaging in here and
            # apply as a per-row scale AFTER aggregation (no [N,N] divide).
            inv = pl.reciprocal(jnp.sum(p, axis=-1, keepdims=True),
                                approx=True) * inv_heads
            acc = acc + jnp.dot(p, xp_h, preferred_element_type=_F32) * inv
        return acc + bias

    def ff_residual_bn(g, r, w, b, gamma, beta, act):
        """BatchNorm(act((g + r) @ W + b) + r), training-mode batch stats."""
        h = jnp.dot(g + r, w, preferred_element_type=_F32) + b
        h = _leaky(h, mlp_slope) if act == "leaky_relu" else jnp.maximum(h, 0.0)
        t = h + r
        mean = jnp.mean(t, axis=0, keepdims=True)
        var = jnp.mean((t - mean) ** 2, axis=0, keepdims=True)
        # TODO(synk): inference parity with a trained torch model needs
        # running_mean / running_var instead of per-call batch statistics.
        return gamma * (t - mean) * jax.lax.rsqrt(var + bn_eps) + beta

    def kernel(x_ref, emb_w_ref, emb_b_ref,
               enc_w_ref, enc_asrc_ref, enc_adst_ref, enc_b_ref,
               ff_w_ref, ff_b_ref, bn_g_ref, bn_b_ref,
               dec_w_ref, dec_asrc_ref, dec_adst_ref, dec_b_ref,
               val_w1_ref, val_b1_ref, val_w2_ref, val_b2_ref,
               logits_ref, value_ref):
        x = x_ref[...]                                                  # [N, F]
        f = x.shape[1]

        # ---- embedding: Lin(F, E) + LeakyReLU.  F is tiny -> a K=F MXU matmul
        # wastes the systolic array, so do F broadcast-multiply-adds on the VPU.
        emb_w = emb_w_ref[...]
        if f <= 8:
            acc = x[:, 0:1] * emb_w[0:1, :]
            for k in range(1, f):
                acc = acc + x[:, k:k + 1] * emb_w[k:k + 1, :]
        else:
            acc = jnp.dot(x, emb_w, preferred_element_type=_F32)
        x_emb = _leaky(acc + emb_b_ref[...], mlp_slope)                 # [N, E]

        def enc(i, z):
            return dense_gat_mean(z, enc_w_ref[i], enc_asrc_ref[i],
                                  enc_adst_ref[i], enc_b_ref[i])

        # The reference applies encoder1 (same weights) twice -- kept on purpose.
        x_out = enc(0, x_emb)
        h = x_out
        g = enc(0, h)
        h = ff_residual_bn(g, h, ff_w_ref[0], ff_b_ref[0],
                           bn_g_ref[0], bn_b_ref[0], ff_acts[0])
        g = enc(1, h)
        h = ff_residual_bn(g, h, ff_w_ref[1], ff_b_ref[1],
                           bn_g_ref[1], bn_b_ref[1], ff_acts[1])
        g = enc(2, h)
        h = ff_residual_bn(g, h, ff_w_ref[2], ff_b_ref[2],
                           bn_g_ref[2], bn_b_ref[2], ff_acts[2])        # x_out

        # ---- decoder: GATConv(E, 1, heads=1, concat=True) -> [N, 1] logits.
        # Output width 1 -> keep the aggregation on the VPU/XLU (weighted row
        # sum) instead of an [N,N] x [N,1] MXU matmul.
        dec_w = dec_w_ref[...]                                          # [1, E]
        xp_col = jnp.sum(h * dec_w, axis=-1, keepdims=True)             # [N, 1]
        xp_row = jax.lax.dot_general(dec_w, h, (((1,), (1,)), ((), ())),
                                     preferred_element_type=_F32)       # [1, N]
        e = _leaky(xp_col * dec_adst_ref[...] + xp_row * dec_asrc_ref[...],
                   gat_slope)                                           # [N, N]
        e = e - jnp.max(e, axis=-1, keepdims=True)
        p = jnp.exp(e)
        inv = pl.reciprocal(jnp.sum(p, axis=-1, keepdims=True), approx=True)
        logits_ref[...] = (jnp.sum(p * xp_row, axis=-1, keepdims=True) * inv
                           + dec_b_ref[...])

        # ---- value critic: scatter_mean over nodes (single graph) -> MLP.
        m = jnp.mean(h, axis=0, keepdims=True)                          # [1, E]
        v = jnp.maximum(jnp.dot(m, val_w1_ref[...],
                                preferred_element_type=_F32) + val_b1_ref[...],
                        0.0)
        value_ref[...] = (jnp.dot(v, val_w2_ref[...],
                                  preferred_element_type=_F32) + val_b2_ref[...])
        # TODO(synk): step()'s tanh/logit_normalizer masking + Categorical
        # sampling is action-selection logic outside forward(); not implemented.

    return kernel


# ----------------------------- wrapper ---------------------------------------
def policy_forward(params, x):
    n = x.shape[0]
    vmem = pl.BlockSpec(memory_space=pltpu.MemorySpace.VMEM)
    logits, value = pl.pallas_call(
        _make_forward_kernel(_HEADS),
        out_shape=(jax.ShapeDtypeStruct((n, 1), _F32),
                   jax.ShapeDtypeStruct((1, 1), _F32)),
        in_specs=[vmem] * 19,
        out_specs=(vmem, vmem),
    )(x,
      params["emb_w"], params["emb_b"],
      params["enc_w"], params["enc_asrc_blk"], params["enc_adst"], params["enc_b"],
      params["ff_w"], params["ff_b"], params["bn_g"], params["bn_b"],
      params["dec_w"], params["dec_asrc"], params["dec_adst"], params["dec_b"],
      params["val_w1"], params["val_b1"], params["val_w2"], params["val_b2"])
    return logits, value


# ----------------------------- parameters -----------------------------------
def _uniform(key, shape, fan):
    bound = 1.0 / math.sqrt(float(fan))
    return jax.random.uniform(key, shape, _F32, -bound, bound)


def _block_diag_att(att):
    """[H, O] per-head att_src vectors -> [H, H*O] block-diagonal rows so a
    single matmul against the concatenated projection gives every head's
    source-alpha row.  Pure parameter re-layout (done once at init)."""
    h, o = att.shape
    eye = jnp.eye(h, dtype=att.dtype)
    return (eye[:, :, None] * att[:, None, :]).reshape(h, h * o)


def init_params(key, cfg):
    f = cfg["num_features"]
    e = cfg["embedding_dim"]
    v = cfg["value_embedding_dim"]
    h = _HEADS
    ks = iter(jax.random.split(key, 64))
    p = {}
    # embedding Lin(F, E)
    p["emb_w"] = _uniform(next(ks), (f, e), f)
    p["emb_b"] = _uniform(next(ks), (1, e), e)
    # three GAT encoders (heads=8, concat=False) + ff + BN, stacked on a layer axis
    enc_w, enc_asrc, enc_adst, enc_b = [], [], [], []
    ff_w, ff_b, bn_g, bn_b = [], [], [], []
    for _ in range(3):
        enc_w.append(_uniform(next(ks), (e, h * e), e))
        enc_asrc.append(_block_diag_att(_uniform(next(ks), (h, e), e)))
        enc_adst.append(_uniform(next(ks), (h, e), e))
        enc_b.append(_uniform(next(ks), (1, e), e))
        ff_w.append(_uniform(next(ks), (e, e), e))
        ff_b.append(_uniform(next(ks), (1, e), e))
        bn_g.append(_uniform(next(ks), (1, e), e))
        bn_b.append(_uniform(next(ks), (1, e), e))
    p["enc_w"] = jnp.stack(enc_w)          # [3, E, H*E]
    p["enc_asrc_blk"] = jnp.stack(enc_asrc)  # [3, H, H*E]
    p["enc_adst"] = jnp.stack(enc_adst)    # [3, H, E]
    p["enc_b"] = jnp.stack(enc_b)          # [3, 1, E]
    p["ff_w"] = jnp.stack(ff_w)            # [3, E, E]
    p["ff_b"] = jnp.stack(ff_b)            # [3, 1, E]
    p["bn_g"] = jnp.stack(bn_g)            # [3, 1, E]
    p["bn_b"] = jnp.stack(bn_b)            # [3, 1, E]
    # decoder GATConv(E, 1, heads=1, concat=True); weight stored as [1, E]
    p["dec_w"] = _uniform(next(ks), (1, e), e)
    p["dec_asrc"] = _uniform(next(ks), (1, 1), 1)
    p["dec_adst"] = _uniform(next(ks), (1, 1), 1)
    p["dec_b"] = _uniform(next(ks), (1, 1), 1)
    # value model: Lin(E, 2*V) -> ReLU -> Lin(2*V, 1)
    p["val_w1"] = _uniform(next(ks), (e, 2 * v), e)
    p["val_b1"] = _uniform(next(ks), (1, 2 * v), 2 * v)
    p["val_w2"] = _uniform(next(ks), (2 * v, 1), 2 * v)
    p["val_b2"] = _uniform(next(ks), (1, 1), 1)
    return p


if __name__ == "__main__":
    cfg = dict(num_features=4, embedding_dim=32, value_embedding_dim=16,
               use_value_critic=True, logit_normalizer=10.0)
    N = 8  # nodes in the (fully connected, single-graph) batch

    key = jax.random.PRNGKey(0)
    k_params, k_x = jax.random.split(key)
    params = init_params(k_params, cfg)
    x = jax.random.normal(k_x, (N, cfg["num_features"]), _F32)

    logits, value = policy_forward(params, x)
    logits = jax.block_until_ready(logits)
    value = jax.block_until_ready(value)

    assert logits.shape == (N, 1) and value.shape == (1, 1)
    assert bool(jnp.all(jnp.isfinite(logits))) and bool(jnp.all(jnp.isfinite(value)))
    print("KERNEL_OK")
</pallas_src>

<mosaic_0001>
module attributes {stable_mosaic.version = 11 : i64} {
  func.func @kernel(%arg0: memref<8x4xf32, #tpu.memory_space<vmem>>, %arg1: memref<4x32xf32, #tpu.memory_space<vmem>>, %arg2: memref<1x32xf32, #tpu.memory_space<vmem>>, %arg3: memref<3x32x256xf32, #tpu.memory_space<vmem>>, %arg4: memref<3x8x256xf32, #tpu.memory_space<vmem>>, %arg5: memref<3x8x32xf32, #tpu.memory_space<vmem>>, %arg6: memref<3x1x32xf32, #tpu.memory_space<vmem>>, %arg7: memref<3x32x32xf32, #tpu.memory_space<vmem>>, %arg8: memref<3x1x32xf32, #tpu.memory_space<vmem>>, %arg9: memref<3x1x32xf32, #tpu.memory_space<vmem>>, %arg10: memref<3x1x32xf32, #tpu.memory_space<vmem>>, %arg11: memref<1x32xf32, #tpu.memory_space<vmem>>, %arg12: memref<1x1xf32, #tpu.memory_space<vmem>>, %arg13: memref<1x1xf32, #tpu.memory_space<vmem>>, %arg14: memref<1x1xf32, #tpu.memory_space<vmem>>, %arg15: memref<32x32xf32, #tpu.memory_space<vmem>>, %arg16: memref<1x32xf32, #tpu.memory_space<vmem>>, %arg17: memref<32x1xf32, #tpu.memory_space<vmem>>, %arg18: memref<1x1xf32, #tpu.memory_space<vmem>>, %arg19: memref<8x1xf32, #tpu.memory_space<vmem>>, %arg20: memref<1x1xf32, #tpu.memory_space<vmem>>) attributes {dimension_semantics = [], scalar_prefetch = 0 : i64, scratch_operands = 0 : i64, tpu.core_type = #tpu.core_type<tc>} {
    %c0 = arith.constant 0 : index
    %c0_0 = arith.constant 0 : index
    %0 = vector.load %arg0[%c0, %c0_0] : memref<8x4xf32, #tpu.memory_space<vmem>>, vector<8x4xf32>
    %c0_1 = arith.constant 0 : index
    %c0_2 = arith.constant 0 : index
    %1 = vector.load %arg1[%c0_1, %c0_2] : memref<4x32xf32, #tpu.memory_space<vmem>>, vector<4x32xf32>
    %2 = vector.extract_strided_slice %0 {offsets = [0, 0], sizes = [8, 1], strides = [1, 1]} : vector<8x4xf32> to vector<8x1xf32>
    %3 = vector.extract_strided_slice %1 {offsets = [0, 0], sizes = [1, 32], strides = [1, 1]} : vector<4x32xf32> to vector<1x32xf32>
    %4 = vector.broadcast %2 : vector<8x1xf32> to vector<8x32xf32>
    %5 = vector.broadcast %3 : vector<1x32xf32> to vector<8x32xf32>
    %6 = arith.mulf %4, %5 : vector<8x32xf32>
    %7 = vector.extract_strided_slice %0 {offsets = [0, 1], sizes = [8, 1], strides = [1, 1]} : vector<8x4xf32> to vector<8x1xf32>
    %8 = vector.extract_strided_slice %1 {offsets = [1, 0], sizes = [1, 32], strides = [1, 1]} : vector<4x32xf32> to vector<1x32xf32>
    %9 = vector.broadcast %7 : vector<8x1xf32> to vector<8x32xf32>
    %10 = vector.broadcast %8 : vector<1x32xf32> to vector<8x32xf32>
    %11 = arith.mulf %9, %10 : vector<8x32xf32>
    %12 = arith.addf %6, %11 : vector<8x32xf32>
    %13 = vector.extract_strided_slice %0 {offsets = [0, 2], sizes = [8, 1], strides = [1, 1]} : vector<8x4xf32> to vector<8x1xf32>
    %14 = vector.extract_strided_slice %1 {offsets = [2, 0], sizes = [1, 32], strides = [1, 1]} : vector<4x32xf32> to vector<1x32xf32>
    %15 = vector.broadcast %13 : vector<8x1xf32> to vector<8x32xf32>
    %16 = vector.broadcast %14 : vector<1x32xf32> to vector<8x32xf32>
    %17 = arith.mulf %15, %16 : vector<8x32xf32>
    %18 = arith.addf %12, %17 : vector<8x32xf32>
    %19 = vector.extract_strided_slice %0 {offsets = [0, 3], sizes = [8, 1], strides = [1, 1]} : vector<8x4xf32> to vector<8x1xf32>
    %20 = vector.extract_strided_slice %1 {offsets = [3, 0], sizes = [1, 32], strides = [1, 1]} : vector<4x32xf32> to vector<1x32xf32>
    %21 = vector.broadcast %19 : vector<8x1xf32> to vector<8x32xf32>
    %22 = vector.broadcast %20 : vector<1x32xf32> to vector<8x32xf32>
    %23 = arith.mulf %21, %22 : vector<8x32xf32>
    %24 = arith.addf %18, %23 : vector<8x32xf32>
    %c0_3 = arith.constant 0 : index
    %c0_4 = arith.constant 0 : index
    %25 = vector.load %arg2[%c0_3, %c0_4] : memref<1x32xf32, #tpu.memory_space<vmem>>, vector<1x32xf32>
    %26 = vector.broadcast %25 : vector<1x32xf32> to vector<8x32xf32>
    %27 = arith.addf %24, %26 : vector<8x32xf32>
    %cst = arith.constant 0.000000e+00 : f32
    %28 = vector.broadcast %cst : f32 to vector<8x32xf32>
    %29 = arith.cmpf ogt, %27, %28 : vector<8x32xf32>
    %cst_5 = arith.constant 0.00999999977 : f32
    %30 = vector.broadcast %cst_5 : f32 to vector<8x32xf32>
    %31 = arith.mulf %30, %27 : vector<8x32xf32>
    %32 = arith.select %29, %27, %31 : vector<8x32xi1>, vector<8x32xf32>
    %c0_6 = arith.constant 0 : index
    %c0_7 = arith.constant 0 : index
    %c0_8 = arith.constant 0 : index
    %33 = vector.load %arg3[%c0_6, %c0_7, %c0_8] : memref<3x32x256xf32, #tpu.memory_space<vmem>>, vector<1x32x256xf32>
    %34 = vector.shape_cast %33 : vector<1x32x256xf32> to vector<32x256xf32>
    %c0_9 = arith.constant 0 : index
    %c0_10 = arith.constant 0 : index
    %c0_11 = arith.constant 0 : index
    %35 = vector.load %arg4[%c0_9, %c0_10, %c0_11] : memref<3x8x256xf32, #tpu.memory_space<vmem>>, vector<1x8x256xf32>
    %36 = vector.shape_cast %35 : vector<1x8x256xf32> to vector<8x256xf32>
    %c0_12 = arith.constant 0 : index
    %c0_13 = arith.constant 0 : index
    %c0_14 = arith.constant 0 : index
    %37 = vector.load %arg5[%c0_12, %c0_13, %c0_14] : memref<3x8x32xf32, #tpu.memory_space<vmem>>, vector<1x8x32xf32>
    %38 = vector.shape_cast %37 : vector<1x8x32xf32> to vector<8x32xf32>
    %c0_15 = arith.constant 0 : index
    %c0_16 = arith.constant 0 : index
    %c0_17 = arith.constant 0 : index
    %39 = vector.load %arg6[%c0_15, %c0_16, %c0_17] : memref<3x1x32xf32, #tpu.memory_space<vmem>>, vector<1x1x32xf32>
    %40 = vector.shape_cast %39 : vector<1x1x32xf32> to vector<1x32xf32>
    %cst_18 = arith.constant dense<0.000000e+00> : vector<8x256xf32>
    %41 = tpu.matmul %32, %34, %cst_18 {dimension_numbers = #tpu.dot_dimension_numbers<[1], [0], [0], [1], [0, 0, 1, 1], [], []>} : vector<8x32xf32>, vector<32x256xf32>, vector<8x256xf32> -> vector<8x256xf32>
    %cst_19 = arith.constant dense<0.000000e+00> : vector<8x8xf32>
    %42 = tpu.matmul %36, %41, %cst_19 {dimension_numbers = #tpu.dot_dimension_numbers<[1], [1], [0], [0], [0, 0, 1, 0], [], []>} : vector<8x256xf32>, vector<8x256xf32>, vector<8x8xf32> -> vector<8x8xf32>
    %cst_20 = arith.constant 0.000000e+00 : f32
    %43 = vector.broadcast %cst_20 : f32 to vector<8x32xf32>
    %44 = vector.extract_strided_slice %41 {offsets = [0, 0], sizes = [8, 32], strides = [1, 1]} : vector<8x256xf32> to vector<8x32xf32>
    %45 = vector.extract_strided_slice %38 {offsets = [0, 0], sizes = [1, 32], strides = [1, 1]} : vector<8x32xf32> to vector<1x32xf32>
    %46 = vector.broadcast %45 : vector<1x32xf32> to vector<8x32xf32>
    %47 = arith.mulf %44, %46 : vector<8x32xf32>
    %cst_21 = arith.constant dense<0.000000e+00> : vector<8xf32>
    %48 = vector.multi_reduction <add>, %47, %cst_21 [1] : vector<8x32xf32> to vector<8xf32>
    %49 = vector.shape_cast %48 : vector<8xf32> to vector<8x1xf32>
    %50 = vector.extract_strided_slice %42 {offsets = [0, 0], sizes = [1, 8], strides = [1, 1]} : vector<8x8xf32> to vector<1x8xf32>
    %51 = vector.broadcast %49 : vector<8x1xf32> to vector<8x8xf32>
    %52 = vector.broadcast %50 : vector<1x8xf32> to vector<8x8xf32>
    %53 = arith.addf %51, %52 : vector<8x8xf32>
    %cst_22 = arith.constant 0.000000e+00 : f32
    %54 = vector.broadcast %cst_22 : f32 to vector<8x8xf32>
    %55 = arith.cmpf ogt, %53, %54 : vector<8x8xf32>
    %cst_23 = arith.constant 2.000000e-01 : f32
    %56 = vector.broadcast %cst_23 : f32 to vector<8x8xf32>
    %57 = arith.mulf %56, %53 : vector<8x8xf32>
    %58 = arith.select %55, %53, %57 : vector<8x8xi1>, vector<8x8xf32>
    %cst_24 = arith.constant dense<0xFF800000> : vector<8xf32>
    %59 = vector.multi_reduction <maximumf>, %58, %cst_24 [1] : vector<8x8xf32> to vector<8xf32>
    %60 = vector.shape_cast %59 : vector<8xf32> to vector<8x1xf32>
    %61 = vector.broadcast %60 : vector<8x1xf32> to vector<8x8xf32>
    %62 = arith.subf %58, %61 : vector<8x8xf32>
    %63 = math.exp %62 : vector<8x8xf32>
    %cst_25 = arith.constant dense<0.000000e+00> : vector<8xf32>
    %64 = vector.multi_reduction <add>, %63, %cst_25 [1] : vector<8x8xf32> to vector<8xf32>
    %65 = vector.shape_cast %64 : vector<8xf32> to vector<8x1xf32>
    %66 = tpu.reciprocal %65 {approx = true} : vector<8x1xf32> -> vector<8x1xf32>
    %cst_26 = arith.constant 1.250000e-01 : f32
    %67 = vector.broadcast %cst_26 : f32 to vector<8x1xf32>
    %68 = arith.mulf %66, %67 : vector<8x1xf32>
    %cst_27 = arith.constant dense<0.000000e+00> : vector<8x32xf32>
    %69 = tpu.matmul %63, %44, %cst_27 {dimension_numbers = #tpu.dot_dimension_numbers<[1], [0], [0], [1], [0, 0, 1, 1], [], []>} : vector<8x8xf32>, vector<8x32xf32>, vector<8x32xf32> -> vector<8x32xf32>
    %70 = vector.broadcast %68 : vector<8x1xf32> to vector<8x32xf32>
    %71 = arith.mulf %69, %70 : vector<8x32xf32>
    %72 = arith.addf %43, %71 : vector<8x32xf32>
    %73 = vector.extract_strided_slice %41 {offsets = [0, 32], sizes = [8, 32], strides = [1, 1]} : vector<8x256xf32> to vector<8x32xf32>
    %74 = vector.extract_strided_slice %38 {offsets = [1, 0], sizes = [1, 32], strides = [1, 1]} : vector<8x32xf32> to vector<1x32xf32>
    %75 = vector.broadcast %74 : vector<1x32xf32> to vector<8x32xf32>
    %76 = arith.mulf %73, %75 : vector<8x32xf32>
    %cst_28 = arith.constant dense<0.000000e+00> : vector<8xf32>
    %77 = vector.multi_reduction <add>, %76, %cst_28 [1] : vector<8x32xf32> to vector<8xf32>
    %78 = vector.shape_cast %77 : vector<8xf32> to vector<8x1xf32>
    %79 = vector.extract_strided_slice %42 {offsets = [1, 0], sizes = [1, 8], strides = [1, 1]} : vector<8x8xf32> to vector<1x8xf32>
    %80 = vector.broadcast %78 : vector<8x1xf32> to vector<8x8xf32>
    %81 = vector.broadcast %79 : vector<1x8xf32> to vector<8x8xf32>
    %82 = arith.addf %80, %81 : vector<8x8xf32>
    %cst_29 = arith.constant 0.000000e+00 : f32
    %83 = vector.broadcast %cst_29 : f32 to vector<8x8xf32>
    %84 = arith.cmpf ogt, %82, %83 : vector<8x8xf32>
    %cst_30 = arith.constant 2.000000e-01 : f32
    %85 = vector.broadcast %cst_30 : f32 to vector<8x8xf32>
    %86 = arith.mulf %85, %82 : vector<8x8xf32>
    %87 = arith.select %84, %82, %86 : vector<8x8xi1>, vector<8x8xf32>
    %cst_31 = arith.constant dense<0xFF800000> : vector<8xf32>
    %88 = vector.multi_reduction <maximumf>, %87, %cst_31 [1] : vector<8x8xf32> to vector<8xf32>
    %89 = vector.shape_cast %88 : vector<8xf32> to vector<8x1xf32>
    %90 = vector.broadcast %89 : vector<8x1xf32> to vector<8x8xf32>
    %91 = arith.subf %87, %90 : vector<8x8xf32>
    %92 = math.exp %91 : vector<8x8xf32>
    %cst_32 = arith.constant dense<0.000000e+00> : vector<8xf32>
    %93 = vector.multi_reduction <add>, %92, %cst_32 [1] : vector<8x8xf32> to vector<8xf32>
    %94 = vector.shape_cast %93 : vector<8xf32> to vector<8x1xf32>
    %95 = tpu.reciprocal %94 {approx = true} : vector<8x1xf32> -> vector<8x1xf32>
    %cst_33 = arith.constant 1.250000e-01 : f32
    %96 = vector.broadcast %cst_33 : f32 to vector<8x1xf32>
    %97 = arith.mulf %95, %96 : vector<8x1xf32>
    %cst_34 = arith.constant dense<0.000000e+00> : vector<8x32xf32>
    %98 = tpu.matmul %92, %73, %cst_34 {dimension_numbers = #tpu.dot_dimension_numbers<[1], [0], [0], [1], [0, 0, 1, 1], [], []>} : vector<8x8xf32>, vector<8x32xf32>, vector<8x32xf32> -> vector<8x32xf32>
    %99 = vector.broadcast %97 : vector<8x1xf32> to vector<8x32xf32>
    %100 = arith.mulf %98, %99 : vector<8x32xf32>
    %101 = arith.addf %72, %100 : vector<8x32xf32>
    %102 = vector.extract_strided_slice %41 {offsets = [0, 64], sizes = [8, 32], strides = [1, 1]} : vector<8x256xf32> to vector<8x32xf32>
    %103 = vector.extract_strided_slice %38 {offsets = [2, 0], sizes = [1, 32], strides = [1, 1]} : vector<8x32xf32> to vector<1x32xf32>
    %104 = vector.broadcast %103 : vector<1x32xf32> to vector<8x32xf32>
    %105 = arith.mulf %102, %104 : vector<8x32xf32>
    %cst_35 = arith.constant dense<0.000000e+00> : vector<8xf32>
    %106 = vector.multi_reduction <add>, %105, %cst_35 [1] : vector<8x32xf32> to vector<8xf32>
    %107 = vector.shape_cast %106 : vector<8xf32> to vector<8x1xf32>
    %108 = vector.extract_strided_slice %42 {offsets = [2, 0], sizes = [1, 8], strides = [1, 1]} : vector<8x8xf32> to vector<1x8xf32>
    %109 = vector.broadcast %107 : vector<8x1xf32> to vector<8x8xf32>
    %110 = vector.broadcast %108 : vector<1x8xf32> to vector<8x8xf32>
    %111 = arith.addf %109, %110 : vector<8x8xf32>
    %cst_36 = arith.constant 0.000000e+00 : f32
    %112 = vector.broadcast %cst_36 : f32 to vector<8x8xf32>
    %113 = arith.cmpf ogt, %111, %112 : vector<8x8xf32>
    %cst_37 = arith.constant 2.000000e-01 : f32
    %114 = vector.broadcast %cst_37 : f32 to vector<8x8xf32>
    %115 = arith.mulf %114, %111 : vector<8x8xf32>
    %116 = arith.select %113, %111, %115 : vector<8x8xi1>, vector<8x8xf32>
    %cst_38 = arith.constant dense<0xFF800000> : vector<8xf32>
    %117 = vector.multi_reduction <maximumf>, %116, %cst_38 [1] : vector<8x8xf32> to vector<8xf32>
    %118 = vector.shape_cast %117 : vector<8xf32> to vector<8x1xf32>
    %119 = vector.broadcast %118 : vector<8x1xf32> to vector<8x8xf32>
    %120 = arith.subf %116, %119 : vector<8x8xf32>
    %121 = math.exp %120 : vector<8x8xf32>
    %cst_39 = arith.constant dense<0.000000e+00> : vector<8xf32>
    %122 = vector.multi_reduction <add>, %121, %cst_39 [1] : vector<8x8xf32> to vector<8xf32>
    %123 = vector.shape_cast %122 : vector<8xf32> to vector<8x1xf32>
    %124 = tpu.reciprocal %123 {approx = true} : vector<8x1xf32> -> vector<8x1xf32>
    %cst_40 = arith.constant 1.250000e-01 : f32
    %125 = vector.broadcast %cst_40 : f32 to vector<8x1xf32>
    %126 = arith.mulf %124, %125 : vector<8x1xf32>
    %cst_41 = arith.constant dense<0.000000e+00> : vector<8x32xf32>
    %127 = tpu.matmul %121, %102, %cst_41 {dimension_numbers = #tpu.dot_dimension_numbers<[1], [0], [0], [1], [0, 0, 1, 1], [], []>} : vector<8x8xf32>, vector<8x32xf32>, vector<8x32xf32> -> vector<8x32xf32>
    %128 = vector.broadcast %126 : vector<8x1xf32> to vector<8x32xf32>
    %129 = arith.mulf %127, %128 : vector<8x32xf32>
    %130 = arith.addf %101, %129 : vector<8x32xf32>
    %131 = vector.extract_strided_slice %41 {offsets = [0, 96], sizes = [8, 32], strides = [1, 1]} : vector<8x256xf32> to vector<8x32xf32>
    %132 = vector.extract_strided_slice %38 {offsets = [3, 0], sizes = [1, 32], strides = [1, 1]} : vector<8x32xf32> to vector<1x32xf32>
    %133 = vector.broadcast %132 : vector<1x32xf32> to vector<8x32xf32>
    %134 = arith.mulf %131, %133 : vector<8x32xf32>
    %cst_42 = arith.constant dense<0.000000e+00> : vector<8xf32>
    %135 = vector.multi_reduction <add>, %134, %cst_42 [1] : vector<8x32xf32> to vector<8xf32>
    %136 = vector.shape_cast %135 : vector<8xf32> to vector<8x1xf32>
    %137 = vector.extract_strided_slice %42 {offsets = [3, 0], sizes = [1, 8], strides = [1, 1]} : vector<8x8xf32> to vector<1x8xf32>
    %138 = vector.broadcast %136 : vector<8x1xf32> to vector<8x8xf32>
    %139 = vector.broadcast %137 : vector<1x8xf32> to vector<8x8xf32>
    %140 = arith.addf %138, %139 : vector<8x8xf32>
    %cst_43 = arith.constant 0.000000e+00 : f32
    %141 = vector.broadcast %cst_43 : f32 to vector<8x8xf32>
    %142 = arith.cmpf ogt, %140, %141 : vector<8x8xf32>
    %cst_44 = arith.constant 2.000000e-01 : f32
    %143 = vector.broadcast %cst_44 : f32 to vector<8x8xf32>
    %144 = arith.mulf %143, %140 : vector<8x8xf32>
    %145 = arith.select %142, %140, %144 : vector<8x8xi1>, vector<8x8xf32>
    %cst_45 = arith.constant dense<0xFF800000> : vector<8xf32>
    %146 = vector.multi_reduction <maximumf>, %145, %cst_45 [1] : vector<8x8xf32> to vector<8xf32>
    %147 = vector.shape_cast %146 : vector<8xf32> to vector<8x1xf32>
    %148 = vector.broadcast %147 : vector<8x1xf32> to vector<8x8xf32>
    %149 = arith.subf %145, %148 : vector<8x8xf32>
    %150 = math.exp %149 : vector<8x8xf32>
    %cst_46 = arith.constant dense<0.000000e+00> : vector<8xf32>
    %151 = vector.multi_reduction <add>, %150, %cst_46 [1] : vector<8x8xf32> to vector<8xf32>
    %152 = vector.shape_cast %151 : vector<8xf32> to vector<8x1xf32>
    %153 = tpu.reciprocal %152 {approx = true} : vector<8x1xf32> -> vector<8x1xf32>
    %cst_47 = arith.constant 1.250000e-01 : f32
    %154 = vector.broadcast %cst_47 : f32 to vector<8x1xf32>
    %155 = arith.mulf %153, %154 : vector<8x1xf32>
    %cst_48 = arith.constant dense<0.000000e+00> : vector<8x32xf32>
    %156 = tpu.matmul %150, %131, %cst_48 {dimension_numbers = #tpu.dot_dimension_numbers<[1], [0], [0], [1], [0, 0, 1, 1], [], []>} : vector<8x8xf32>, vector<8x32xf32>, vector<8x32xf32> -> vector<8x32xf32>
    %157 = vector.broadcast %155 : vector<8x1xf32> to vector<8x32xf32>
    %158 = arith.mulf %156, %157 : vector<8x32xf32>
    %159 = arith.addf %130, %158 : vector<8x32xf32>
    %160 = vector.extract_strided_slice %41 {offsets = [0, 128], sizes = [8, 32], strides = [1, 1]} : vector<8x256xf32> to vector<8x32xf32>
    %161 = vector.extract_strided_slice %38 {offsets = [4, 0], sizes = [1, 32], strides = [1, 1]} : vector<8x32xf32> to vector<1x32xf32>
    %162 = vector.broadcast %161 : vector<1x32xf32> to vector<8x32xf32>
    %163 = arith.mulf %160, %162 : vector<8x32xf32>
    %cst_49 = arith.constant dense<0.000000e+00> : vector<8xf32>
    %164 = vector.multi_reduction <add>, %163, %cst_49 [1] : vector<8x32xf32> to vector<8xf32>
    %165 = vector.shape_cast %164 : vector<8xf32> to vector<8x1xf32>
    %166 = vector.extract_strided_slice %42 {offsets = [4, 0], sizes = [1, 8], strides = [1, 1]} : vector<8x8xf32> to vector<1x8xf32>
    %167 = vector.broadcast %165 : vector<8x1xf32> to vector<8x8xf32>
    %168 = vector.broadcast %166 : vector<1x8xf32> to vector<8x8xf32>
    %169 = arith.addf %167, %168 : vector<8x8xf32>
    %cst_50 = arith.constant 0.000000e+00 : f32
    %170 = vector.broadcast %cst_50 : f32 to vector<8x8xf32>
    %171 = arith.cmpf ogt, %169, %170 : vector<8x8xf32>
    %cst_51 = arith.constant 2.000000e-01 : f32
    %172 = vector.broadcast %cst_51 : f32 to vector<8x8xf32>
    %173 = arith.mulf %172, %169 : vector<8x8xf32>
    %174 = arith.select %171, %169, %173 : vector<8x8xi1>, vector<8x8xf32>
    %cst_52 = arith.constant dense<0xFF800000> : vector<8xf32>
    %175 = vector.multi_reduction <maximumf>, %174, %cst_52 [1] : vector<8x8xf32> to vector<8xf32>
    %176 = vector.shape_cast %175 : vector<8xf32> to vector<8x1xf32>
    %177 = vector.broadcast %176 : vector<8x1xf32> to vector<8x8xf32>
    %178 = arith.subf %174, %177 : vector<8x8xf32>
    %179 = math.exp %178 : vector<8x8xf32>
    %cst_53 = arith.constant dense<0.000000e+00> : vector<8xf32>
    %180 = vector.multi_reduction <add>, %179, %cst_53 [1] : vector<8x8xf32> to vector<8xf32>
    %181 = vector.shape_cast %180 : vector<8xf32> to vector<8x1xf32>
    %182 = tpu.reciprocal %181 {approx = true} : vector<8x1xf32> -> vector<8x1xf32>
    %cst_54 = arith.constant 1.250000e-01 : f32
    %183 = vector.broadcast %cst_54 : f32 to vector<8x1xf32>
    %184 = arith.mulf %182, %183 : vector<8x1xf32>
    %cst_55 = arith.constant dense<0.000000e+00> : vector<8x32xf32>
    %185 = tpu.matmul %179, %160, %cst_55 {dimension_numbers = #tpu.dot_dimension_numbers<[1], [0], [0], [1], [0, 0, 1, 1], [], []>} : vector<8x8xf32>, vector<8x32xf32>, vector<8x32xf32> -> vector<8x32xf32>
    %186 = vector.broadcast %184 : vector<8x1xf32> to vector<8x32xf32>
    %187 = arith.mulf %185, %186 : vector<8x32xf32>
    %188 = arith.addf %159, %187 : vector<8x32xf32>
    %189 = vector.extract_strided_slice %41 {offsets = [0, 160], sizes = [8, 32], strides = [1, 1]} : vector<8x256xf32> to vector<8x32xf32>
    %190 = vector.extract_strided_slice %38 {offsets = [5, 0], sizes = [1, 32], strides = [1, 1]} : vector<8x32xf32> to vector<1x32xf32>
    %191 = vector.broadcast %190 : vector<1x32xf32> to vector<8x32xf32>
    %192 = arith.mulf %189, %191 : vector<8x32xf32>
    %cst_56 = arith.constant dense<0.000000e+00> : vector<8xf32>
    %193 = vector.multi_reduction <add>, %192, %cst_56 [1] : vector<8x32xf32> to vector<8xf32>
    %194 = vector.shape_cast %193 : vector<8xf32> to vector<8x1xf32>
    %195 = vector.extract_strided_slice %42 {offsets = [5, 0], sizes = [1, 8], strides = [1, 1]} : vector<8x8xf32> to vector<1x8xf32>
    %196 = vector.broadcast %194 : vector<8x1xf32> to vector<8x8xf32>
    %197 = vector.broadcast %195 : vector<1x8xf32> to vector<8x8xf32>
    %198 = arith.addf %196, %197 : vector<8x8xf32>
    %cst_57 = arith.constant 0.000000e+00 : f32
    %199 = vector.broadcast %cst_57 : f32 to vector<8x8xf32>
    %200 = arith.cmpf ogt, %198, %199 : vector<8x8xf32>
    %cst_58 = arith.constant 2.000000e-01 : f32
    %201 = vector.broadcast %cst_58 : f32 to vector<8x8xf32>
    %202 = arith.mulf %201, %198 : vector<8x8xf32>
    %203 = arith.select %200, %198, %202 : vector<8x8xi1>, vector<8x8xf32>
    %cst_59 = arith.constant dense<0xFF800000> : vector<8xf32>
    %204 = vector.multi_reduction <maximumf>, %203, %cst_59 [1] : vector<8x8xf32> to vector<8xf32>
    %205 = vector.shape_cast %204 : vector<8xf32> to vector<8x1xf32>
    %206 = vector.broadcast %205 : vector<8x1xf32> to vector<8x8xf32>
    %207 = arith.subf %203, %206 : vector<8x8xf32>
    %208 = math.exp %207 : vector<8x8xf32>
    %cst_60 = arith.constant dense<0.000000e+00> : vector<8xf32>
    %209 = vector.multi_reduction <add>, %208, %cst_60 [1] : vector<8x8xf32> to vector<8xf32>
    %210 = vector.shape_cast %209 : vector<8xf32> to vector<8x1xf32>
    %211 = tpu.reciprocal %210 {approx = true} : vector<8x1xf32> -> vector<8x1xf32>
    %cst_61 = arith.constant 1.250000e-01 : f32
    %212 = vector.broadcast %cst_61 : f32 to vector<8x1xf32>
    %213 = arith.mulf %211, %212 : vector<8x1xf32>
    %cst_62 = arith.constant dense<0.000000e+00> : vector<8x32xf32>
    %214 = tpu.matmul %208, %189, %cst_62 {dimension_numbers = #tpu.dot_dimension_numbers<[1], [0], [0], [1], [0, 0, 1, 1], [], []>} : vector<8x8xf32>, vector<8x32xf32>, vector<8x32xf32> -> vector<8x32xf32>
    %215 = vector.broadcast %213 : vector<8x1xf32> to vector<8x32xf32>
    %216 = arith.mulf %214, %215 : vector<8x32xf32>
    %217 = arith.addf %188, %216 : vector<8x32xf32>
    %218 = vector.extract_strided_slice %41 {offsets = [0, 192], sizes = [8, 32], strides = [1, 1]} : vector<8x256xf32> to vector<8x32xf32>
    %219 = vector.extract_strided_slice %38 {offsets = [6, 0], sizes = [1, 32], strides = [1, 1]} : vector<8x32xf32> to vector<1x32xf32>
    %220 = vector.broadcast %219 : vector<1x32xf32> to vector<8x32xf32>
    %221 = arith.mulf %218, %220 : vector<8x32xf32>
    %cst_63 = arith.constant dense<0.000000e+00> : vector<8xf32>
    %222 = vector.multi_reduction <add>, %221, %cst_63 [1] : vector<8x32xf32> to vector<8xf32>
    %223 = vector.shape_cast %222 : vector<8xf32> to vector<8x1xf32>
    %224 = vector.extract_strided_slice %42 {offsets = [6, 0], sizes = [1, 8], strides = [1, 1]} : vector<8x8xf32> to vector<1x8xf32>
    %225 = vector.broadcast %223 : vector<8x1xf32> to vector<8x8xf32>
    %226 = vector.broadcast %224 : vector<1x8xf32> to vector<8x8xf32>
    %227 = arith.addf %225, %226 : vector<8x8xf32>
    %cst_64 = arith.constant 0.000000e+00 : f32
    %228 = vector.broadcast %cst_64 : f32 to vector<8x8xf32>
    %229 = arith.cmpf ogt, %227, %228 : vector<8x8xf32>
    %cst_65 = arith.constant 2.000000e-01 : f32
    %230 = vector.broadcast %cst_65 : f32 to vector<8x8xf32>
    %231 = arith.mulf %230, %227 : vector<8x8xf32>
    %232 = arith.select %229, %227, %231 : vector<8x8xi1>, vector<8x8xf32>
    %cst_66 = arith.constant dense<0xFF800000> : vector<8xf32>
    %233 = vector.multi_reduction <maximumf>, %232, %cst_66 [1] : vector<8x8xf32> to vector<8xf32>
    %234 = vector.shape_cast %233 : vector<8xf32> to vector<8x1xf32>
    %235 = vector.broadcast %234 : vector<8x1xf32> to vector<8x8xf32>
    %236 = arith.subf %232, %235 : vector<8x8xf32>
    %237 = math.exp %236 : vector<8x8xf32>
    %cst_67 = arith.constant dense<0.000000e+00> : vector<8xf32>
    %238 = vector.multi_reduction <add>, %237, %cst_67 [1] : vector<8x8xf32> to vector<8xf32>
    %239 = vector.shape_cast %238 : vector<8xf32> to vector<8x1xf32>
    %240 = tpu.reciprocal %239 {approx = true} : vector<8x1xf32> -> vector<8x1xf32>
    %cst_68 = arith.constant 1.250000e-01 : f32
    %241 = vector.broadcast %cst_68 : f32 to vector<8x1xf32>
    %242 = arith.mulf %240, %241 : vector<8x1xf32>
    %cst_69 = arith.constant dense<0.000000e+00> : vector<8x32xf32>
    %243 = tpu.matmul %237, %218, %cst_69 {dimension_numbers = #tpu.dot_dimension_numbers<[1], [0], [0], [1], [0, 0, 1, 1], [], []>} : vector<8x8xf32>, vector<8x32xf32>, vector<8x32xf32> -> vector<8x32xf32>
    %244 = vector.broadcast %242 : vector<8x1xf32> to vector<8x32xf32>
    %245 = arith.mulf %243, %244 : vector<8x32xf32>
    %246 = arith.addf %217, %245 : vector<8x32xf32>
    %247 = vector.extract_strided_slice %41 {offsets = [0, 224], sizes = [8, 32], strides = [1, 1]} : vector<8x256xf32> to vector<8x32xf32>
    %248 = vector.extract_strided_slice %38 {offsets = [7, 0], sizes = [1, 32], strides = [1, 1]} : vector<8x32xf32> to vector<1x32xf32>
    %249 = vector.broadcast %248 : vector<1x32xf32> to vector<8x32xf32>
    %250 = arith.mulf %247, %249 : vector<8x32xf32>
    %cst_70 = arith.constant dense<0.000000e+00> : vector<8xf32>
    %251 = vector.multi_reduction <add>, %250, %cst_70 [1] : vector<8x32xf32> to vector<8xf32>
    %252 = vector.shape_cast %251 : vector<8xf32> to vector<8x1xf32>
    %253 = vector.extract_strided_slice %42 {offsets = [7, 0], sizes = [1, 8], strides = [1, 1]} : vector<8x8xf32> to vector<1x8xf32>
    %254 = vector.broadcast %252 : vector<8x1xf32> to vector<8x8xf32>
    %255 = vector.broadcast %253 : vector<1x8xf32> to vector<8x8xf32>
    %256 = arith.addf %254, %255 : vector<8x8xf32>
    %cst_71 = arith.constant 0.000000e+00 : f32
    %257 = vector.broadcast %cst_71 : f32 to vector<8x8xf32>
    %258 = arith.cmpf ogt, %256, %257 : vector<8x8xf32>
    %cst_72 = arith.constant 2.000000e-01 : f32
    %259 = vector.broadcast %cst_72 : f32 to vector<8x8xf32>
    %260 = arith.mulf %259, %256 : vector<8x8xf32>
    %261 = arith.select %258, %256, %260 : vector<8x8xi1>, vector<8x8xf32>
    %cst_73 = arith.constant dense<0xFF800000> : vector<8xf32>
    %262 = vector.multi_reduction <maximumf>, %261, %cst_73 [1] : vector<8x8xf32> to vector<8xf32>
    %263 = vector.shape_cast %262 : vector<8xf32> to vector<8x1xf32>
    %264 = vector.broadcast %263 : vector<8x1xf32> to vector<8x8xf32>
    %265 = arith.subf %261, %264 : vector<8x8xf32>
    %266 = math.exp %265 : vector<8x8xf32>
    %cst_74 = arith.constant dense<0.000000e+00> : vector<8xf32>
    %267 = vector.multi_reduction <add>, %266, %cst_74 [1] : vector<8x8xf32> to vector<8xf32>
    %268 = vector.shape_cast %267 : vector<8xf32> to vector<8x1xf32>
    %269 = tpu.reciprocal %268 {approx = true} : vector<8x1xf32> -> vector<8x1xf32>
    %cst_75 = arith.constant 1.250000e-01 : f32
    %270 = vector.broadcast %cst_75 : f32 to vector<8x1xf32>
    %271 = arith.mulf %269, %270 : vector<8x1xf32>
    %cst_76 = arith.constant dense<0.000000e+00> : vector<8x32xf32>
    %272 = tpu.matmul %266, %247, %cst_76 {dimension_numbers = #tpu.dot_dimension_numbers<[1], [0], [0], [1], [0, 0, 1, 1], [], []>} : vector<8x8xf32>, vector<8x32xf32>, vector<8x32xf32> -> vector<8x32xf32>
    %273 = vector.broadcast %271 : vector<8x1xf32> to vector<8x32xf32>
    %274 = arith.mulf %272, %273 : vector<8x32xf32>
    %275 = arith.addf %246, %274 : vector<8x32xf32>
    %276 = vector.broadcast %40 : vector<1x32xf32> to vector<8x32xf32>
    %277 = arith.addf %275, %276 : vector<8x32xf32>
    %c0_77 = arith.constant 0 : index
    %c0_78 = arith.constant 0 : index
    %c0_79 = arith.constant 0 : index
    %278 = vector.load %arg3[%c0_77, %c0_78, %c0_79] : memref<3x32x256xf32, #tpu.memory_space<vmem>>, vector<1x32x256xf32>
    %279 = vector.shape_cast %278 : vector<1x32x256xf32> to vector<32x256xf32>
    %c0_80 = arith.constant 0 : index
    %c0_81 = arith.constant 0 : index
    %c0_82 = arith.constant 0 : index
    %280 = vector.load %arg4[%c0_80, %c0_81, %c0_82] : memref<3x8x256xf32, #tpu.memory_space<vmem>>, vector<1x8x256xf32>
    %281 = vector.shape_cast %280 : vector<1x8x256xf32> to vector<8x256xf32>
    %c0_83 = arith.constant 0 : index
    %c0_84 = arith.constant 0 : index
    %c0_85 = arith.constant 0 : index
    %282 = vector.load %arg5[%c0_83, %c0_84, %c0_85] : memref<3x8x32xf32, #tpu.memory_space<vmem>>, vector<1x8x32xf32>
    %283 = vector.shape_cast %282 : vector<1x8x32xf32> to vector<8x32xf32>
    %c0_86 = arith.constant 0 : index
    %c0_87 = arith.constant 0 : index
    %c0_88 = arith.constant 0 : index
    %284 = vector.load %arg6[%c0_86, %c0_87, %c0_88] : memref<3x1x32xf32, #tpu.memory_space<vmem>>, vector<1x1x32xf32>
    %285 = vector.shape_cast %284 : vector<1x1x32xf32> to vector<1x32xf32>
    %cst_89 = arith.constant dense<0.000000e+00> : vector<8x256xf32>
    %286 = tpu.matmul %277, %279, %cst_89 {dimension_numbers = #tpu.dot_dimension_numbers<[1], [0], [0], [1], [0, 0, 1, 1], [], []>} : vector<8x32xf32>, vector<32x256xf32>, vector<8x256xf32> -> vector<8x256xf32>
    %cst_90 = arith.constant dense<0.000000e+00> : vector<8x8xf32>
    %287 = tpu.matmul %281, %286, %cst_90 {dimension_numbers = #tpu.dot_dimension_numbers<[1], [1], [0], [0], [0, 0, 1, 0], [], []>} : vector<8x256xf32>, vector<8x256xf32>, vector<8x8xf32> -> vector<8x8xf32>
    %cst_91 = arith.constant 0.000000e+00 : f32
    %288 = vector.broadcast %cst_91 : f32 to vector<8x32xf32>
    %289 = vector.extract_strided_slice %286 {offsets = [0, 0], sizes = [8, 32], strides = [1, 1]} : vector<8x256xf32> to vector<8x32xf32>
    %290 = vector.extract_strided_slice %283 {offsets = [0, 0], sizes = [1, 32], strides = [1, 1]} : vector<8x32xf32> to vector<1x32xf32>
    %291 = vector.broadcast %290 : vector<1x32xf32> to vector<8x32xf32>
    %292 = arith.mulf %289, %291 : vector<8x32xf32>
    %cst_92 = arith.constant dense<0.000000e+00> : vector<8xf32>
    %293 = vector.multi_reduction <add>, %292, %cst_92 [1] : vector<8x32xf32> to vector<8xf32>
    %294 = vector.shape_cast %293 : vector<8xf32> to vector<8x1xf32>
    %295 = vector.extract_strided_slice %287 {offsets = [0, 0], sizes = [1, 8], strides = [1, 1]} : vector<8x8xf32> to vector<1x8xf32>
    %296 = vector.broadcast %294 : vector<8x1xf32> to vector<8x8xf32>
    %297 = vector.broadcast %295 : vector<1x8xf32> to vector<8x8xf32>
    %298 = arith.addf %296, %297 : vector<8x8xf32>
    %cst_93 = arith.constant 0.000000e+00 : f32
    %299 = vector.broadcast %cst_93 : f32 to vector<8x8xf32>
    %300 = arith.cmpf ogt, %298, %299 : vector<8x8xf32>
    %cst_94 = arith.constant 2.000000e-01 : f32
    %301 = vector.broadcast %cst_94 : f32 to vector<8x8xf32>
    %302 = arith.mulf %301, %298 : vector<8x8xf32>
    %303 = arith.select %300, %298, %302 : vector<8x8xi1>, vector<8x8xf32>
    %cst_95 = arith.constant dense<0xFF800000> : vector<8xf32>
    %304 = vector.multi_reduction <maximumf>, %303, %cst_95 [1] : vector<8x8xf32> to vector<8xf32>
    %305 = vector.shape_cast %304 : vector<8xf32> to vector<8x1xf32>
    %306 = vector.broadcast %305 : vector<8x1xf32> to vector<8x8xf32>
    %307 = arith.subf %303, %306 : vector<8x8xf32>
    %308 = math.exp %307 : vector<8x8xf32>
    %cst_96 = arith.constant dense<0.000000e+00> : vector<8xf32>
    %309 = vector.multi_reduction <add>, %308, %cst_96 [1] : vector<8x8xf32> to vector<8xf32>
    %310 = vector.shape_cast %309 : vector<8xf32> to vector<8x1xf32>
    %311 = tpu.reciprocal %310 {approx = true} : vector<8x1xf32> -> vector<8x1xf32>
    %cst_97 = arith.constant 1.250000e-01 : f32
    %312 = vector.broadcast %cst_97 : f32 to vector<8x1xf32>
    %313 = arith.mulf %311, %312 : vector<8x1xf32>
    %cst_98 = arith.constant dense<0.000000e+00> : vector<8x32xf32>
    %314 = tpu.matmul %308, %289, %cst_98 {dimension_numbers = #tpu.dot_dimension_numbers<[1], [0], [0], [1], [0, 0, 1, 1], [], []>} : vector<8x8xf32>, vector<8x32xf32>, vector<8x32xf32> -> vector<8x32xf32>
    %315 = vector.broadcast %313 : vector<8x1xf32> to vector<8x32xf32>
    %316 = arith.mulf %314, %315 : vector<8x32xf32>
    %317 = arith.addf %288, %316 : vector<8x32xf32>
    %318 = vector.extract_strided_slice %286 {offsets = [0, 32], sizes = [8, 32], strides = [1, 1]} : vector<8x256xf32> to vector<8x32xf32>
    %319 = vector.extract_strided_slice %283 {offsets = [1, 0], sizes = [1, 32], strides = [1, 1]} : vector<8x32xf32> to vector<1x32xf32>
    %320 = vector.broadcast %319 : vector<1x32xf32> to vector<8x32xf32>
    %321 = arith.mulf %318, %320 : vector<8x32xf32>
    %cst_99 = arith.constant dense<0.000000e+00> : vector<8xf32>
    %322 = vector.multi_reduction <add>, %321, %cst_99 [1] : vector<8x32xf32> to vector<8xf32>
    %323 = vector.shape_cast %322 : vector<8xf32> to vector<8x1xf32>
    %324 = vector.extract_strided_slice %287 {offsets = [1, 0], sizes = [1, 8], strides = [1, 1]} : vector<8x8xf32> to vector<1x8xf32>
    %325 = vector.broadcast %323 : vector<8x1xf32> to vector<8x8xf32>
    %326 = vector.broadcast %324 : vector<1x8xf32> to vector<8x8xf32>
    %327 = arith.addf %325, %326 : vector<8x8xf32>
    %cst_100 = arith.constant 0.000000e+00 : f32
    %328 = vector.broadcast %cst_100 : f32 to vector<8x8xf32>
    %329 = arith.cmpf ogt, %327, %328 : vector<8x8xf32>
    %cst_101 = arith.constant 2.000000e-01 : f32
    %330 = vector.broadcast %cst_101 : f32 to vector<8x8xf32>
    %331 = arith.mulf %330, %327 : vector<8x8xf32>
    %332 = arith.select %329, %327, %331 : vector<8x8xi1>, vector<8x8xf32>
    %cst_102 = arith.constant dense<0xFF800000> : vector<8xf32>
    %333 = vector.multi_reduction <maximumf>, %332, %cst_102 [1] : vector<8x8xf32> to vector<8xf32>
    %334 = vector.shape_cast %333 : vector<8xf32> to vector<8x1xf32>
    %335 = vector.broadcast %334 : vector<8x1xf32> to vector<8x8xf32>
    %336 = arith.subf %332, %335 : vector<8x8xf32>
    %337 = math.exp %336 : vector<8x8xf32>
    %cst_103 = arith.constant dense<0.000000e+00> : vector<8xf32>
    %338 = vector.multi_reduction <add>, %337, %cst_103 [1] : vector<8x8xf32> to vector<8xf32>
    %339 = vector.shape_cast %338 : vector<8xf32> to vector<8x1xf32>
    %340 = tpu.reciprocal %339 {approx = true} : vector<8x1xf32> -> vector<8x1xf32>
    %cst_104 = arith.constant 1.250000e-01 : f32
    %341 = vector.broadcast %cst_104 : f32 to vector<8x1xf32>
    %342 = arith.mulf %340, %341 : vector<8x1xf32>
    %cst_105 = arith.constant dense<0.000000e+00> : vector<8x32xf32>
    %343 = tpu.matmul %337, %318, %cst_105 {dimension_numbers = #tpu.dot_dimension_numbers<[1], [0], [0], [1], [0, 0, 1, 1], [], []>} : vector<8x8xf32>, vector<8x32xf32>, vector<8x32xf32> -> vector<8x32xf32>
    %344 = vector.broadcast %342 : vector<8x1xf32> to vector<8x32xf32>
    %345 = arith.mulf %343, %344 : vector<8x32xf32>
    %346 = arith.addf %317, %345 : vector<8x32xf32>
    %347 = vector.extract_strided_slice %286 {offsets = [0, 64], sizes = [8, 32], strides = [1, 1]} : vector<8x256xf32> to vector<8x32xf32>
    %348 = vector.extract_strided_slice %283 {offsets = [2, 0], sizes = [1, 32], strides = [1, 1]} : vector<8x32xf32> to vector<1x32xf32>
    %349 = vector.broadcast %348 : vector<1x32xf32> to vector<8x32xf32>
    %350 = arith.mulf %347, %349 : vector<8x32xf32>
    %cst_106 = arith.constant dense<0.000000e+00> : vector<8xf32>
    %351 = vector.multi_reduction <add>, %350, %cst_106 [1] : vector<8x32xf32> to vector<8xf32>
    %352 = vector.shape_cast %351 : vector<8xf32> to vector<8x1xf32>
    %353 = vector.extract_strided_slice %287 {offsets = [2, 0], sizes = [1, 8], strides = [1, 1]} : vector<8x8xf32> to vector<1x8xf32>
    %354 = vector.broadcast %352 : vector<8x1xf32> to vector<8x8xf32>
    %355 = vector.broadcast %353 : vector<1x8xf32> to vector<8x8xf32>
    %356 = arith.addf %354, %355 : vector<8x8xf32>
    %cst_107 = arith.constant 0.000000e+00 : f32
    %357 = vector.broadcast %cst_107 : f32 to vector<8x8xf32>
    %358 = arith.cmpf ogt, %356, %357 : vector<8x8xf32>
    %cst_108 = arith.constant 2.000000e-01 : f32
    %359 = vector.broadcast %cst_108 : f32 to vector<8x8xf32>
    %360 = arith.mulf %359, %356 : vector<8x8xf32>
    %361 = arith.select %358, %356, %360 : vector<8x8xi1>, vector<8x8xf32>
    %cst_109 = arith.constant dense<0xFF800000> : vector<8xf32>
    %362 = vector.multi_reduction <maximumf>, %361, %cst_109 [1] : vector<8x8xf32> to vector<8xf32>
    %363 = vector.shape_cast %362 : vector<8xf32> to vector<8x1xf32>
    %364 = vector.broadcast %363 : vector<8x1xf32> to vector<8x8xf32>
    %365 = arith.subf %361, %364 : vector<8x8xf32>
    %366 = math.exp %365 : vector<8x8xf32>
    %cst_110 = arith.constant dense<0.000000e+00> : vector<8xf32>
    %367 = vector.multi_reduction <add>, %366, %cst_110 [1] : vector<8x8xf32> to vector<8xf32>
    %368 = vector.shape_cast %367 : vector<8xf32> to vector<8x1xf32>
    %369 = tpu.reciprocal %368 {approx = true} : vector<8x1xf32> -> vector<8x1xf32>
    %cst_111 = arith.constant 1.250000e-01 : f32
    %370 = vector.broadcast %cst_111 : f32 to vector<8x1xf32>
    %371 = arith.mulf %369, %370 : vector<8x1xf32>
    %cst_112 = arith.constant dense<0.000000e+00> : vector<8x32xf32>
    %372 = tpu.matmul %366, %347, %cst_112 {dimension_numbers = #tpu.dot_dimension_numbers<[1], [0], [0], [1], [0, 0, 1, 1], [], []>} : vector<8x8xf32>, vector<8x32xf32>, vector<8x32xf32> -> vector<8x32xf32>
    %373 = vector.broadcast %371 : vector<8x1xf32> to vector<8x32xf32>
    %374 = arith.mulf %372, %373 : vector<8x32xf32>
    %375 = arith.addf %346, %374 : vector<8x32xf32>
    %376 = vector.extract_strided_slice %286 {offsets = [0, 96], sizes = [8, 32], strides = [1, 1]} : vector<8x256xf32> to vector<8x32xf32>
    %377 = vector.extract_strided_slice %283 {offsets = [3, 0], sizes = [1, 32], strides = [1, 1]} : vector<8x32xf32> to vector<1x32xf32>
    %378 = vector.broadcast %377 : vector<1x32xf32> to vector<8x32xf32>
    %379 = arith.mulf %376, %378 : vector<8x32xf32>
    %cst_113 = arith.constant dense<0.000000e+00> : vector<8xf32>
    %380 = vector.multi_reduction <add>, %379, %cst_113 [1] : vector<8x32xf32> to vector<8xf32>
    %381 = vector.shape_cast %380 : vector<8xf32> to vector<8x1xf32>
    %382 = vector.extract_strided_slice %287 {offsets = [3, 0], sizes = [1, 8], strides = [1, 1]} : vector<8x8xf32> to vector<1x8xf32>
    %383 = vector.broadcast %381 : vector<8x1xf32> to vector<8x8xf32>
    %384 = vector.broadcast %382 : vector<1x8xf32> to vector<8x8xf32>
    %385 = arith.addf %383, %384 : vector<8x8xf32>
    %cst_114 = arith.constant 0.000000e+00 : f32
    %386 = vector.broadcast %cst_114 : f32 to vector<8x8xf32>
    %387 = arith.cmpf ogt, %385, %386 : vector<8x8xf32>
    %cst_115 = arith.constant 2.000000e-01 : f32
    %388 = vector.broadcast %cst_115 : f32 to vector<8x8xf32>
    %389 = arith.mulf %388, %385 : vector<8x8xf32>
    %390 = arith.select %387, %385, %389 : vector<8x8xi1>, vector<8x8xf32>
    %cst_116 = arith.constant dense<0xFF800000> : vector<8xf32>
    %391 = vector.multi_reduction <maximumf>, %390, %cst_116 [1] : vector<8x8xf32> to vector<8xf32>
    %392 = vector.shape_cast %391 : vector<8xf32> to vector<8x1xf32>
    %393 = vector.broadcast %392 : vector<8x1xf32> to vector<8x8xf32>
    %394 = arith.subf %390, %393 : vector<8x8xf32>
    %395 = math.exp %394 : vector<8x8xf32>
    %cst_117 = arith.constant dense<0.000000e+00> : vector<8xf32>
    %396 = vector.multi_reduction <add>, %395, %cst_117 [1] : vector<8x8xf32> to vector<8xf32>
    %397 = vector.shape_cast %396 : vector<8xf32> to vector<8x1xf32>
    %398 = tpu.reciprocal %397 {approx = true} : vector<8x1xf32> -> vector<8x1xf32>
    %cst_118 = arith.constant 1.250000e-01 : f32
    %399 = vector.broadcast %cst_118 : f32 to vector<8x1xf32>
    %400 = arith.mulf %398, %399 : vector<8x1xf32>
    %cst_119 = arith.constant dense<0.000000e+00> : vector<8x32xf32>
    %401 = tpu.matmul %395, %376, %cst_119 {dimension_numbers = #tpu.dot_dimension_numbers<[1], [0], [0], [1], [0, 0, 1, 1], [], []>} : vector<8x8xf32>, vector<8x32xf32>, vector<8x32xf32> -> vector<8x32xf32>
    %402 = vector.broadcast %400 : vector<8x1xf32> to vector<8x32xf32>
    %403 = arith.mulf %401, %402 : vector<8x32xf32>
    %404 = arith.addf %375, %403 : vector<8x32xf32>
    %405 = vector.extract_strided_slice %286 {offsets = [0, 128], sizes = [8, 32], strides = [1, 1]} : vector<8x256xf32> to vector<8x32xf32>
    %406 = vector.extract_strided_slice %283 {offsets = [4, 0], sizes = [1, 32], strides = [1, 1]} : vector<8x32xf32> to vector<1x32xf32>
    %407 = vector.broadcast %406 : vector<1x32xf32> to vector<8x32xf32>
    %408 = arith.mulf %405, %407 : vector<8x32xf32>
    %cst_120 = arith.constant dense<0.000000e+00> : vector<8xf32>
    %409 = vector.multi_reduction <add>, %408, %cst_120 [1] : vector<8x32xf32> to vector<8xf32>
    %410 = vector.shape_cast %409 : vector<8xf32> to vector<8x1xf32>
    %411 = vector.extract_strided_slice %287 {offsets = [4, 0], sizes = [1, 8], strides = [1, 1]} : vector<8x8xf32> to vector<1x8xf32>
    %412 = vector.broadcast %410 : vector<8x1xf32> to vector<8x8xf32>
    %413 = vector.broadcast %411 : vector<1x8xf32> to vector<8x8xf32>
    %414 = arith.addf %412, %413 : vector<8x8xf32>
    %cst_121 = arith.constant 0.000000e+00 : f32
    %415 = vector.broadcast %cst_121 : f32 to vector<8x8xf32>
    %416 = arith.cmpf ogt, %414, %415 : vector<8x8xf32>
    %cst_122 = arith.constant 2.000000e-01 : f32
    %417 = vector.broadcast %cst_122 : f32 to vector<8x8xf32>
    %418 = arith.mulf %417, %414 : vector<8x8xf32>
    %419 = arith.select %416, %414, %418 : vector<8x8xi1>, vector<8x8xf32>
    %cst_123 = arith.constant dense<0xFF800000> : vector<8xf32>
    %420 = vector.multi_reduction <maximumf>, %419, %cst_123 [1] : vector<8x8xf32> to vector<8xf32>
    %421 = vector.shape_cast %420 : vector<8xf32> to vector<8x1xf32>
    %422 = vector.broadcast %421 : vector<8x1xf32> to vector<8x8xf32>
    %423 = arith.subf %419, %422 : vector<8x8xf32>
    %424 = math.exp %423 : vector<8x8xf32>
    %cst_124 = arith.constant dense<0.000000e+00> : vector<8xf32>
    %425 = vector.multi_reduction <add>, %424, %cst_124 [1] : vector<8x8xf32> to vector<8xf32>
    %426 = vector.shape_cast %425 : vector<8xf32> to vector<8x1xf32>
    %427 = tpu.reciprocal %426 {approx = true} : vector<8x1xf32> -> vector<8x1xf32>
    %cst_125 = arith.constant 1.250000e-01 : f32
    %428 = vector.broadcast %cst_125 : f32 to vector<8x1xf32>
    %429 = arith.mulf %427, %428 : vector<8x1xf32>
    %cst_126 = arith.constant dense<0.000000e+00> : vector<8x32xf32>
    %430 = tpu.matmul %424, %405, %cst_126 {dimension_numbers = #tpu.dot_dimension_numbers<[1], [0], [0], [1], [0, 0, 1, 1], [], []>} : vector<8x8xf32>, vector<8x32xf32>, vector<8x32xf32> -> vector<8x32xf32>
    %431 = vector.broadcast %429 : vector<8x1xf32> to vector<8x32xf32>
    %432 = arith.mulf %430, %431 : vector<8x32xf32>
    %433 = arith.addf %404, %432 : vector<8x32xf32>
    %434 = vector.extract_strided_slice %286 {offsets = [0, 160], sizes = [8, 32], strides = [1, 1]} : vector<8x256xf32> to vector<8x32xf32>
    %435 = vector.extract_strided_slice %283 {offsets = [5, 0], sizes = [1, 32], strides = [1, 1]} : vector<8x32xf32> to vector<1x32xf32>
    %436 = vector.broadcast %435 : vector<1x32xf32> to vector<8x32xf32>
    %437 = arith.mulf %434, %436 : vector<8x32xf32>
    %cst_127 = arith.constant dense<0.000000e+00> : vector<8xf32>
    %438 = vector.multi_reduction <add>, %437, %cst_127 [1] : vector<8x32xf32> to vector<8xf32>
    %439 = vector.shape_cast %438 : vector<8xf32> to vector<8x1xf32>
    %440 = vector.extract_strided_slice %287 {offsets = [5, 0], sizes = [1, 8], strides = [1, 1]} : vector<8x8xf32> to vector<1x8xf32>
    %441 = vector.broadcast %439 : vector<8x1xf32> to vector<8x8xf32>
    %442 = vector.broadcast %440 : vector<1x8xf32> to vector<8x8xf32>
    %443 = arith.addf %441, %442 : vector<8x8xf32>
    %cst_128 = arith.constant 0.000000e+00 : f32
    %444 = vector.broadcast %cst_128 : f32 to vector<8x8xf32>
    %445 = arith.cmpf ogt, %443, %444 : vector<8x8xf32>
    %cst_129 = arith.constant 2.000000e-01 : f32
    %446 = vector.broadcast %cst_129 : f32 to vector<8x8xf32>
    %447 = arith.mulf %446, %443 : vector<8x8xf32>
    %448 = arith.select %445, %443, %447 : vector<8x8xi1>, vector<8x8xf32>
    %cst_130 = arith.constant dense<0xFF800000> : vector<8xf32>
    %449 = vector.multi_reduction <maximumf>, %448, %cst_130 [1] : vector<8x8xf32> to vector<8xf32>
    %450 = vector.shape_cast %449 : vector<8xf32> to vector<8x1xf32>
    %451 = vector.broadcast %450 : vector<8x1xf32> to vector<8x8xf32>
    %452 = arith.subf %448, %451 : vector<8x8xf32>
    %453 = math.exp %452 : vector<8x8xf32>
    %cst_131 = arith.constant dense<0.000000e+00> : vector<8xf32>
    %454 = vector.multi_reduction <add>, %453, %cst_131 [1] : vector<8x8xf32> to vector<8xf32>
    %455 = vector.shape_cast %454 : vector<8xf32> to vector<8x1xf32>
    %456 = tpu.reciprocal %455 {approx = true} : vector<8x1xf32> -> vector<8x1xf32>
    %cst_132 = arith.constant 1.250000e-01 : f32
    %457 = vector.broadcast %cst_132 : f32 to vector<8x1xf32>
    %458 = arith.mulf %456, %457 : vector<8x1xf32>
    %cst_133 = arith.constant dense<0.000000e+00> : vector<8x32xf32>
    %459 = tpu.matmul %453, %434, %cst_133 {dimension_numbers = #tpu.dot_dimension_numbers<[1], [0], [0], [1], [0, 0, 1, 1], [], []>} : vector<8x8xf32>, vector<8x32xf32>, vector<8x32xf32> -> vector<8x32xf32>
    %460 = vector.broadcast %458 : vector<8x1xf32> to vector<8x32xf32>
    %461 = arith.mulf %459, %460 : vector<8x32xf32>
    %462 = arith.addf %433, %461 : vector<8x32xf32>
    %463 = vector.extract_strided_slice %286 {offsets = [0, 192], sizes = [8, 32], strides = [1, 1]} : vector<8x256xf32> to vector<8x32xf32>
    %464 = vector.extract_strided_slice %283 {offsets = [6, 0], sizes = [1, 32], strides = [1, 1]} : vector<8x32xf32> to vector<1x32xf32>
    %465 = vector.broadcast %464 : vector<1x32xf32> to vector<8x32xf32>
    %466 = arith.mulf %463, %465 : vector<8x32xf32>
    %cst_134 = arith.constant dense<0.000000e+00> : vector<8xf32>
    %467 = vector.multi_reduction <add>, %466, %cst_134 [1] : vector<8x32xf32> to vector<8xf32>
    %468 = vector.shape_cast %467 : vector<8xf32> to vector<8x1xf32>
    %469 = vector.extract_strided_slice %287 {offsets = [6, 0], sizes = [1, 8], strides = [1, 1]} : vector<8x8xf32> to vector<1x8xf32>
    %470 = vector.broadcast %468 : vector<8x1xf32> to vector<8x8xf32>
    %471 = vector.broadcast %469 : vector<1x8xf32> to vector<8x8xf32>
    %472 = arith.addf %470, %471 : vector<8x8xf32>
    %cst_135 = arith.constant 0.000000e+00 : f32
    %473 = vector.broadcast %cst_135 : f32 to vector<8x8xf32>
    %474 = arith.cmpf ogt, %472, %473 : vector<8x8xf32>
    %cst_136 = arith.constant 2.000000e-01 : f32
    %475 = vector.broadcast %cst_136 : f32 to vector<8x8xf32>
    %476 = arith.mulf %475, %472 : vector<8x8xf32>
    %477 = arith.select %474, %472, %476 : vector<8x8xi1>, vector<8x8xf32>
    %cst_137 = arith.constant dense<0xFF800000> : vector<8xf32>
    %478 = vector.multi_reduction <maximumf>, %477, %cst_137 [1] : vector<8x8xf32> to vector<8xf32>
    %479 = vector.shape_cast %478 : vector<8xf32> to vector<8x1xf32>
    %480 = vector.broadcast %479 : vector<8x1xf32> to vector<8x8xf32>
    %481 = arith.subf %477, %480 : vector<8x8xf32>
    %482 = math.exp %481 : vector<8x8xf32>
    %cst_138 = arith.constant dense<0.000000e+00> : vector<8xf32>
    %483 = vector.multi_reduction <add>, %482, %cst_138 [1] : vector<8x8xf32> to vector<8xf32>
    %484 = vector.shape_cast %483 : vector<8xf32> to vector<8x1xf32>
    %485 = tpu.reciprocal %484 {approx = true} : vector<8x1xf32> -> vector<8x1xf32>
    %cst_139 = arith.constant 1.250000e-01 : f32
    %486 = vector.broadcast %cst_139 : f32 to vector<8x1xf32>
    %487 = arith.mulf %485, %486 : vector<8x1xf32>
    %cst_140 = arith.constant dense<0.000000e+00> : vector<8x32xf32>
    %488 = tpu.matmul %482, %463, %cst_140 {dimension_numbers = #tpu.dot_dimension_numbers<[1], [0], [0], [1], [0, 0, 1, 1], [], []>} : vector<8x8xf32>, vector<8x32xf32>, vector<8x32xf32> -> vector<8x32xf32>
    %489 = vector.broadcast %487 : vector<8x1xf32> to vector<8x32xf32>
    %490 = arith.mulf %488, %489 : vector<8x32xf32>
    %491 = arith.addf %462, %490 : vector<8x32xf32>
    %492 = vector.extract_strided_slice %286 {offsets = [0, 224], sizes = [8, 32], strides = [1, 1]} : vector<8x256xf32> to vector<8x32xf32>
    %493 = vector.extract_strided_slice %283 {offsets = [7, 0], sizes = [1, 32], strides = [1, 1]} : vector<8x32xf32> to vector<1x32xf32>
    %494 = vector.broadcast %493 : vector<1x32xf32> to vector<8x32xf32>
    %495 = arith.mulf %492, %494 : vector<8x32xf32>
    %cst_141 = arith.constant dense<0.000000e+00> : vector<8xf32>
    %496 = vector.multi_reduction <add>, %495, %cst_141 [1] : vector<8x32xf32> to vector<8xf32>
    %497 = vector.shape_cast %496 : vector<8xf32> to vector<8x1xf32>
    %498 = vector.extract_strided_slice %287 {offsets = [7, 0], sizes = [1, 8], strides = [1, 1]} : vector<8x8xf32> to vector<1x8xf32>
    %499 = vector.broadcast %497 : vector<8x1xf32> to vector<8x8xf32>
    %500 = vector.broadcast %498 : vector<1x8xf32> to vector<8x8xf32>
    %501 = arith.addf %499, %500 : vector<8x8xf32>
    %cst_142 = arith.constant 0.000000e+00 : f32
    %502 = vector.broadcast %cst_142 : f32 to vector<8x8xf32>
    %503 = arith.cmpf ogt, %501, %502 : vector<8x8xf32>
    %cst_143 = arith.constant 2.000000e-01 : f32
    %504 = vector.broadcast %cst_143 : f32 to vector<8x8xf32>
    %505 = arith.mulf %504, %501 : vector<8x8xf32>
    %506 = arith.select %503, %501, %505 : vector<8x8xi1>, vector<8x8xf32>
    %cst_144 = arith.constant dense<0xFF800000> : vector<8xf32>
    %507 = vector.multi_reduction <maximumf>, %506, %cst_144 [1] : vector<8x8xf32> to vector<8xf32>
    %508 = vector.shape_cast %507 : vector<8xf32> to vector<8x1xf32>
    %509 = vector.broadcast %508 : vector<8x1xf32> to vector<8x8xf32>
    %510 = arith.subf %506, %509 : vector<8x8xf32>
    %511 = math.exp %510 : vector<8x8xf32>
    %cst_145 = arith.constant dense<0.000000e+00> : vector<8xf32>
    %512 = vector.multi_reduction <add>, %511, %cst_145 [1] : vector<8x8xf32> to vector<8xf32>
    %513 = vector.shape_cast %512 : vector<8xf32> to vector<8x1xf32>
    %514 = tpu.reciprocal %513 {approx = true} : vector<8x1xf32> -> vector<8x1xf32>
    %cst_146 = arith.constant 1.250000e-01 : f32
    %515 = vector.broadcast %cst_146 : f32 to vector<8x1xf32>
    %516 = arith.mulf %514, %515 : vector<8x1xf32>
    %cst_147 = arith.constant dense<0.000000e+00> : vector<8x32xf32>
    %517 = tpu.matmul %511, %492, %cst_147 {dimension_numbers = #tpu.dot_dimension_numbers<[1], [0], [0], [1], [0, 0, 1, 1], [], []>} : vector<8x8xf32>, vector<8x32xf32>, vector<8x32xf32> -> vector<8x32xf32>
    %518 = vector.broadcast %516 : vector<8x1xf32> to vector<8x32xf32>
    %519 = arith.mulf %517, %518 : vector<8x32xf32>
    %520 = arith.addf %491, %519 : vector<8x32xf32>
    %521 = vector.broadcast %285 : vector<1x32xf32> to vector<8x32xf32>
    %522 = arith.addf %520, %521 : vector<8x32xf32>
    %c0_148 = arith.constant 0 : index
    %c0_149 = arith.constant 0 : index
    %c0_150 = arith.constant 0 : index
    %523 = vector.load %arg7[%c0_148, %c0_149, %c0_150] : memref<3x32x32xf32, #tpu.memory_space<vmem>>, vector<1x32x32xf32>
    %524 = vector.shape_cast %523 : vector<1x32x32xf32> to vector<32x32xf32>
    %c0_151 = arith.constant 0 : index
    %c0_152 = arith.constant 0 : index
    %c0_153 = arith.constant 0 : index
    %525 = vector.load %arg8[%c0_151, %c0_152, %c0_153] : memref<3x1x32xf32, #tpu.memory_space<vmem>>, vector<1x1x32xf32>
    %526 = vector.shape_cast %525 : vector<1x1x32xf32> to vector<1x32xf32>
    %c0_154 = arith.constant 0 : index
    %c0_155 = arith.constant 0 : index
    %c0_156 = arith.constant 0 : index
    %527 = vector.load %arg9[%c0_154, %c0_155, %c0_156] : memref<3x1x32xf32, #tpu.memory_space<vmem>>, vector<1x1x32xf32>
    %528 = vector.shape_cast %527 : vector<1x1x32xf32> to vector<1x32xf32>
    %c0_157 = arith.constant 0 : index
    %c0_158 = arith.constant 0 : index
    %c0_159 = arith.constant 0 : index
    %529 = vector.load %arg10[%c0_157, %c0_158, %c0_159] : memref<3x1x32xf32, #tpu.memory_space<vmem>>, vector<1x1x32xf32>
    %530 = vector.shape_cast %529 : vector<1x1x32xf32> to vector<1x32xf32>
    %531 = arith.addf %522, %277 : vector<8x32xf32>
    %cst_160 = arith.constant dense<0.000000e+00> : vector<8x32xf32>
    %532 = tpu.matmul %531, %524, %cst_160 {dimension_numbers = #tpu.dot_dimension_numbers<[1], [0], [0], [1], [0, 0, 1, 1], [], []>} : vector<8x32xf32>, vector<32x32xf32>, vector<8x32xf32> -> vector<8x32xf32>
    %533 = vector.broadcast %526 : vector<1x32xf32> to vector<8x32xf32>
    %534 = arith.addf %532, %533 : vector<8x32xf32>
    %cst_161 = arith.constant 0.000000e+00 : f32
    %535 = vector.broadcast %cst_161 : f32 to vector<8x32xf32>
    %536 = arith.cmpf ogt, %534, %535 : vector<8x32xf32>
    %cst_162 = arith.constant 0.00999999977 : f32
    %537 = vector.broadcast %cst_162 : f32 to vector<8x32xf32>
    %538 = arith.mulf %537, %534 : vector<8x32xf32>
    %539 = arith.select %536, %534, %538 : vector<8x32xi1>, vector<8x32xf32>
    %540 = arith.addf %539, %277 : vector<8x32xf32>
    %cst_163 = arith.constant dense<0.000000e+00> : vector<32xf32>
    %541 = vector.multi_reduction <add>, %540, %cst_163 [0] : vector<8x32xf32> to vector<32xf32>
    %542 = vector.shape_cast %541 : vector<32xf32> to vector<1x32xf32>
    %cst_164 = arith.constant 8.000000e+00 : f32
    %543 = vector.broadcast %cst_164 : f32 to vector<1x32xf32>
    %544 = arith.divf %542, %543 : vector<1x32xf32>
    %545 = vector.broadcast %544 : vector<1x32xf32> to vector<8x32xf32>
    %546 = arith.subf %540, %545 : vector<8x32xf32>
    %547 = arith.mulf %546, %546 : vector<8x32xf32>
    %cst_165 = arith.constant dense<0.000000e+00> : vector<32xf32>
    %548 = vector.multi_reduction <add>, %547, %cst_165 [0] : vector<8x32xf32> to vector<32xf32>
    %549 = vector.shape_cast %548 : vector<32xf32> to vector<1x32xf32>
    %cst_166 = arith.constant 8.000000e+00 : f32
    %550 = vector.broadcast %cst_166 : f32 to vector<1x32xf32>
    %551 = arith.divf %549, %550 : vector<1x32xf32>
    %552 = vector.broadcast %544 : vector<1x32xf32> to vector<8x32xf32>
    %553 = arith.subf %540, %552 : vector<8x32xf32>
    %554 = vector.broadcast %528 : vector<1x32xf32> to vector<8x32xf32>
    %555 = arith.mulf %554, %553 : vector<8x32xf32>
    %cst_167 = arith.constant 9.99999974E-6 : f32
    %556 = vector.broadcast %cst_167 : f32 to vector<1x32xf32>
    %557 = arith.addf %551, %556 : vector<1x32xf32>
    %558 = math.rsqrt %557 : vector<1x32xf32>
    %559 = vector.broadcast %558 : vector<1x32xf32> to vector<8x32xf32>
    %560 = arith.mulf %555, %559 : vector<8x32xf32>
    %561 = vector.broadcast %530 : vector<1x32xf32> to vector<8x32xf32>
    %562 = arith.addf %560, %561 : vector<8x32xf32>
    %c1 = arith.constant 1 : index
    %c0_168 = arith.constant 0 : index
    %c0_169 = arith.constant 0 : index
    %563 = vector.load %arg3[%c1, %c0_168, %c0_169] : memref<3x32x256xf32, #tpu.memory_space<vmem>>, vector<1x32x256xf32>
    %564 = vector.shape_cast %563 : vector<1x32x256xf32> to vector<32x256xf32>
    %c1_170 = arith.constant 1 : index
    %c0_171 = arith.constant 0 : index
    %c0_172 = arith.constant 0 : index
    %565 = vector.load %arg4[%c1_170, %c0_171, %c0_172] : memref<3x8x256xf32, #tpu.memory_space<vmem>>, vector<1x8x256xf32>
    %566 = vector.shape_cast %565 : vector<1x8x256xf32> to vector<8x256xf32>
    %c1_173 = arith.constant 1 : index
    %c0_174 = arith.constant 0 : index
    %c0_175 = arith.constant 0 : index
    %567 = vector.load %arg5[%c1_173, %c0_174, %c0_175] : memref<3x8x32xf32, #tpu.memory_space<vmem>>, vector<1x8x32xf32>
    %568 = vector.shape_cast %567 : vector<1x8x32xf32> to vector<8x32xf32>
    %c1_176 = arith.constant 1 : index
    %c0_177 = arith.constant 0 : index
    %c0_178 = arith.constant 0 : index
    %569 = vector.load %arg6[%c1_176, %c0_177, %c0_178] : memref<3x1x32xf32, #tpu.memory_space<vmem>>, vector<1x1x32xf32>
    %570 = vector.shape_cast %569 : vector<1x1x32xf32> to vector<1x32xf32>
    %cst_179 = arith.constant dense<0.000000e+00> : vector<8x256xf32>
    %571 = tpu.matmul %562, %564, %cst_179 {dimension_numbers = #tpu.dot_dimension_numbers<[1], [0], [0], [1], [0, 0, 1, 1], [], []>} : vector<8x32xf32>, vector<32x256xf32>, vector<8x256xf32> -> vector<8x256xf32>
    %cst_180 = arith.constant dense<0.000000e+00> : vector<8x8xf32>
    %572 = tpu.matmul %566, %571, %cst_180 {dimension_numbers = #tpu.dot_dimension_numbers<[1], [1], [0], [0], [0, 0, 1, 0], [], []>} : vector<8x256xf32>, vector<8x256xf32>, vector<8x8xf32> -> vector<8x8xf32>
    %cst_181 = arith.constant 0.000000e+00 : f32
    %573 = vector.broadcast %cst_181 : f32 to vector<8x32xf32>
    %574 = vector.extract_strided_slice %571 {offsets = [0, 0], sizes = [8, 32], strides = [1, 1]} : vector<8x256xf32> to vector<8x32xf32>
    %575 = vector.extract_strided_slice %568 {offsets = [0, 0], sizes = [1, 32], strides = [1, 1]} : vector<8x32xf32> to vector<1x32xf32>
    %576 = vector.broadcast %575 : vector<1x32xf32> to vector<8x32xf32>
    %577 = arith.mulf %574, %576 : vector<8x32xf32>
    %cst_182 = arith.constant dense<0.000000e+00> : vector<8xf32>
    %578 = vector.multi_reduction <add>, %577, %cst_182 [1] : vector<8x32xf32> to vector<8xf32>
    %579 = vector.shape_cast %578 : vector<8xf32> to vector<8x1xf32>
    %580 = vector.extract_strided_slice %572 {offsets = [0, 0], sizes = [1, 8], strides = [1, 1]} : vector<8x8xf32> to vector<1x8xf32>
    %581 = vector.broadcast %579 : vector<8x1xf32> to vector<8x8xf32>
    %582 = vector.broadcast %580 : vector<1x8xf32> to vector<8x8xf32>
    %583 = arith.addf %581, %582 : vector<8x8xf32>
    %cst_183 = arith.constant 0.000000e+00 : f32
    %584 = vector.broadcast %cst_183 : f32 to vector<8x8xf32>
    %585 = arith.cmpf ogt, %583, %584 : vector<8x8xf32>
    %cst_184 = arith.constant 2.000000e-01 : f32
    %586 = vector.broadcast %cst_184 : f32 to vector<8x8xf32>
    %587 = arith.mulf %586, %583 : vector<8x8xf32>
    %588 = arith.select %585, %583, %587 : vector<8x8xi1>, vector<8x8xf32>
    %cst_185 = arith.constant dense<0xFF800000> : vector<8xf32>
    %589 = vector.multi_reduction <maximumf>, %588, %cst_185 [1] : vector<8x8xf32> to vector<8xf32>
    %590 = vector.shape_cast %589 : vector<8xf32> to vector<8x1xf32>
    %591 = vector.broadcast %590 : vector<8x1xf32> to vector<8x8xf32>
    %592 = arith.subf %588, %591 : vector<8x8xf32>
    %593 = math.exp %592 : vector<8x8xf32>
    %cst_186 = arith.constant dense<0.000000e+00> : vector<8xf32>
    %594 = vector.multi_reduction <add>, %593, %cst_186 [1] : vector<8x8xf32> to vector<8xf32>
    %595 = vector.shape_cast %594 : vector<8xf32> to vector<8x1xf32>
    %596 = tpu.reciprocal %595 {approx = true} : vector<8x1xf32> -> vector<8x1xf32>
    %cst_187 = arith.constant 1.250000e-01 : f32
    %597 = vector.broadcast %cst_187 : f32 to vector<8x1xf32>
    %598 = arith.mulf %596, %597 : vector<8x1xf32>
    %cst_188 = arith.constant dense<0.000000e+00> : vector<8x32xf32>
    %599 = tpu.matmul %593, %574, %cst_188 {dimension_numbers = #tpu.dot_dimension_numbers<[1], [0], [0], [1], [0, 0, 1, 1], [], []>} : vector<8x8xf32>, vector<8x32xf32>, vector<8x32xf32> -> vector<8x32xf32>
    %600 = vector.broadcast %598 : vector<8x1xf32> to vector<8x32xf32>
    %601 = arith.mulf %599, %600 : vector<8x32xf32>
    %602 = arith.addf %573, %601 : vector<8x32xf32>
    %603 = vector.extract_strided_slice %571 {offsets = [0, 32], sizes = [8, 32], strides = [1, 1]} : vector<8x256xf32> to vector<8x32xf32>
    %604 = vector.extract_strided_slice %568 {offsets = [1, 0], sizes = [1, 32], strides = [1, 1]} : vector<8x32xf32> to vector<1x32xf32>
    %605 = vector.broadcast %604 : vector<1x32xf32> to vector<8x32xf32>
    %606 = arith.mulf %603, %605 : vector<8x32xf32>
    %cst_189 = arith.constant dense<0.000000e+00> : vector<8xf32>
    %607 = vector.multi_reduction <add>, %606, %cst_189 [1] : vector<8x32xf32> to vector<8xf32>
    %608 = vector.shape_cast %607 : vector<8xf32> to vector<8x1xf32>
    %609 = vector.extract_strided_slice %572 {offsets = [1, 0], sizes = [1, 8], strides = [1, 1]} : vector<8x8xf32> to vector<1x8xf32>
    %610 = vector.broadcast %608 : vector<8x1xf32> to vector<8x8xf32>
    %611 = vector.broadcast %609 : vector<1x8xf32> to vector<8x8xf32>
    %612 = arith.addf %610, %611 : vector<8x8xf32>
    %cst_190 = arith.constant 0.000000e+00 : f32
    %613 = vector.broadcast %cst_190 : f32 to vector<8x8xf32>
    %614 = arith.cmpf ogt, %612, %613 : vector<8x8xf32>
    %cst_191 = arith.constant 2.000000e-01 : f32
    %615 = vector.broadcast %cst_191 : f32 to vector<8x8xf32>
    %616 = arith.mulf %615, %612 : vector<8x8xf32>
    %617 = arith.select %614, %612, %616 : vector<8x8xi1>, vector<8x8xf32>
    %cst_192 = arith.constant dense<0xFF800000> : vector<8xf32>
    %618 = vector.multi_reduction <maximumf>, %617, %cst_192 [1] : vector<8x8xf32> to vector<8xf32>
    %619 = vector.shape_cast %618 : vector<8xf32> to vector<8x1xf32>
    %620 = vector.broadcast %619 : vector<8x1xf32> to vector<8x8xf32>
    %621 = arith.subf %617, %620 : vector<8x8xf32>
    %622 = math.exp %621 : vector<8x8xf32>
    %cst_193 = arith.constant dense<0.000000e+00> : vector<8xf32>
    %623 = vector.multi_reduction <add>, %622, %cst_193 [1] : vector<8x8xf32> to vector<8xf32>
    %624 = vector.shape_cast %623 : vector<8xf32> to vector<8x1xf32>
    %625 = tpu.reciprocal %624 {approx = true} : vector<8x1xf32> -> vector<8x1xf32>
    %cst_194 = arith.constant 1.250000e-01 : f32
    %626 = vector.broadcast %cst_194 : f32 to vector<8x1xf32>
    %627 = arith.mulf %625, %626 : vector<8x1xf32>
    %cst_195 = arith.constant dense<0.000000e+00> : vector<8x32xf32>
    %628 = tpu.matmul %622, %603, %cst_195 {dimension_numbers = #tpu.dot_dimension_numbers<[1], [0], [0], [1], [0, 0, 1, 1], [], []>} : vector<8x8xf32>, vector<8x32xf32>, vector<8x32xf32> -> vector<8x32xf32>
    %629 = vector.broadcast %627 : vector<8x1xf32> to vector<8x32xf32>
    %630 = arith.mulf %628, %629 : vector<8x32xf32>
    %631 = arith.addf %602, %630 : vector<8x32xf32>
    %632 = vector.extract_strided_slice %571 {offsets = [0, 64], sizes = [8, 32], strides = [1, 1]} : vector<8x256xf32> to vector<8x32xf32>
    %633 = vector.extract_strided_slice %568 {offsets = [2, 0], sizes = [1, 32], strides = [1, 1]} : vector<8x32xf32> to vector<1x32xf32>
    %634 = vector.broadcast %633 : vector<1x32xf32> to vector<8x32xf32>
    %635 = arith.mulf %632, %634 : vector<8x32xf32>
    %cst_196 = arith.constant dense<0.000000e+00> : vector<8xf32>
    %636 = vector.multi_reduction <add>, %635, %cst_196 [1] : vector<8x32xf32> to vector<8xf32>
    %637 = vector.shape_cast %636 : vector<8xf32> to vector<8x1xf32>
    %638 = vector.extract_strided_slice %572 {offsets = [2, 0], sizes = [1, 8], strides = [1, 1]} : vector<8x8xf32> to vector<1x8xf32>
    %639 = vector.broadcast %637 : vector<8x1xf32> to vector<8x8xf32>
    %640 = vector.broadcast %638 : vector<1x8xf32> to vector<8x8xf32>
    %641 = arith.addf %639, %640 : vector<8x8xf32>
    %cst_197 = arith.constant 0.000000e+00 : f32
    %642 = vector.broadcast %cst_197 : f32 to vector<8x8xf32>
    %643 = arith.cmpf ogt, %641, %642 : vector<8x8xf32>
    %cst_198 = arith.constant 2.000000e-01 : f32
    %644 = vector.broadcast %cst_198 : f32 to vector<8x8xf32>
    %645 = arith.mulf %644, %641 : vector<8x8xf32>
    %646 = arith.select %643, %641, %645 : vector<8x8xi1>, vector<8x8xf32>
    %cst_199 = arith.constant dense<0xFF800000> : vector<8xf32>
    %647 = vector.multi_reduction <maximumf>, %646, %cst_199 [1] : vector<8x8xf32> to vector<8xf32>
    %648 = vector.shape_cast %647 : vector<8xf32> to vector<8x1xf32>
    %649 = vector.broadcast %648 : vector<8x1xf32> to vector<8x8xf32>
    %650 = arith.subf %646, %649 : vector<8x8xf32>
    %651 = math.exp %650 : vector<8x8xf32>
    %cst_200 = arith.constant dense<0.000000e+00> : vector<8xf32>
    %652 = vector.multi_reduction <add>, %651, %cst_200 [1] : vector<8x8xf32> to vector<8xf32>
    %653 = vector.shape_cast %652 : vector<8xf32> to vector<8x1xf32>
    %654 = tpu.reciprocal %653 {approx = true} : vector<8x1xf32> -> vector<8x1xf32>
    %cst_201 = arith.constant 1.250000e-01 : f32
    %655 = vector.broadcast %cst_201 : f32 to vector<8x1xf32>
    %656 = arith.mulf %654, %655 : vector<8x1xf32>
    %cst_202 = arith.constant dense<0.000000e+00> : vector<8x32xf32>
    %657 = tpu.matmul %651, %632, %cst_202 {dimension_numbers = #tpu.dot_dimension_numbers<[1], [0], [0], [1], [0, 0, 1, 1], [], []>} : vector<8x8xf32>, vector<8x32xf32>, vector<8x32xf32> -> vector<8x32xf32>
    %658 = vector.broadcast %656 : vector<8x1xf32> to vector<8x32xf32>
    %659 = arith.mulf %657, %658 : vector<8x32xf32>
    %660 = arith.addf %631, %659 : vector<8x32xf32>
    %661 = vector.extract_strided_slice %571 {offsets = [0, 96], sizes = [8, 32], strides = [1, 1]} : vector<8x256xf32> to vector<8x32xf32>
    %662 = vector.extract_strided_slice %568 {offsets = [3, 0], sizes = [1, 32], strides = [1, 1]} : vector<8x32xf32> to vector<1x32xf32>
    %663 = vector.broadcast %662 : vector<1x32xf32> to vector<8x32xf32>
    %664 = arith.mulf %661, %663 : vector<8x32xf32>
    %cst_203 = arith.constant dense<0.000000e+00> : vector<8xf32>
    %665 = vector.multi_reduction <add>, %664, %cst_203 [1] : vector<8x32xf32> to vector<8xf32>
    %666 = vector.shape_cast %665 : vector<8xf32> to vector<8x1xf32>
    %667 = vector.extract_strided_slice %572 {offsets = [3, 0], sizes = [1, 8], strides = [1, 1]} : vector<8x8xf32> to vector<1x8xf32>
    %668 = vector.broadcast %666 : vector<8x1xf32> to vector<8x8xf32>
    %669 = vector.broadcast %667 : vector<1x8xf32> to vector<8x8xf32>
    %670 = arith.addf %668, %669 : vector<8x8xf32>
    %cst_204 = arith.constant 0.000000e+00 : f32
    %671 = vector.broadcast %cst_204 : f32 to vector<8x8xf32>
    %672 = arith.cmpf ogt, %670, %671 : vector<8x8xf32>
    %cst_205 = arith.constant 2.000000e-01 : f32
    %673 = vector.broadcast %cst_205 : f32 to vector<8x8xf32>
    %674 = arith.mulf %673, %670 : vector<8x8xf32>
    %675 = arith.select %672, %670, %674 : vector<8x8xi1>, vector<8x8xf32>
    %cst_206 = arith.constant dense<0xFF800000> : vector<8xf32>
    %676 = vector.multi_reduction <maximumf>, %675, %cst_206 [1] : vector<8x8xf32> to vector<8xf32>
    %677 = vector.shape_cast %676 : vector<8xf32> to vector<8x1xf32>
    %678 = vector.broadcast %677 : vector<8x1xf32> to vector<8x8xf32>
    %679 = arith.subf %675, %678 : vector<8x8xf32>
    %680 = math.exp %679 : vector<8x8xf32>
    %cst_207 = arith.constant dense<0.000000e+00> : vector<8xf32>
    %681 = vector.multi_reduction <add>, %680, %cst_207 [1] : vector<8x8xf32> to vector<8xf32>
    %682 = vector.shape_cast %681 : vector<8xf32> to vector<8x1xf32>
    %683 = tpu.reciprocal %682 {approx = true} : vector<8x1xf32> -> vector<8x1xf32>
    %cst_208 = arith.constant 1.250000e-01 : f32
    %684 = vector.broadcast %cst_208 : f32 to vector<8x1xf32>
    %685 = arith.mulf %683, %684 : vector<8x1xf32>
    %cst_209 = arith.constant dense<0.000000e+00> : vector<8x32xf32>
    %686 = tpu.matmul %680, %661, %cst_209 {dimension_numbers = #tpu.dot_dimension_numbers<[1], [0], [0], [1], [0, 0, 1, 1], [], []>} : vector<8x8xf32>, vector<8x32xf32>, vector<8x32xf32> -> vector<8x32xf32>
    %687 = vector.broadcast %685 : vector<8x1xf32> to vector<8x32xf32>
    %688 = arith.mulf %686, %687 : vector<8x32xf32>
    %689 = arith.addf %660, %688 : vector<8x32xf32>
    %690 = vector.extract_strided_slice %571 {offsets = [0, 128], sizes = [8, 32], strides = [1, 1]} : vector<8x256xf32> to vector<8x32xf32>
    %691 = vector.extract_strided_slice %568 {offsets = [4, 0], sizes = [1, 32], strides = [1, 1]} : vector<8x32xf32> to vector<1x32xf32>
    %692 = vector.broadcast %691 : vector<1x32xf32> to vector<8x32xf32>
    %693 = arith.mulf %690, %692 : vector<8x32xf32>
    %cst_210 = arith.constant dense<0.000000e+00> : vector<8xf32>
    %694 = vector.multi_reduction <add>, %693, %cst_210 [1] : vector<8x32xf32> to vector<8xf32>
    %695 = vector.shape_cast %694 : vector<8xf32> to vector<8x1xf32>
    %696 = vector.extract_strided_slice %572 {offsets = [4, 0], sizes = [1, 8], strides = [1, 1]} : vector<8x8xf32> to vector<1x8xf32>
    %697 = vector.broadcast %695 : vector<8x1xf32> to vector<8x8xf32>
    %698 = vector.broadcast %696 : vector<1x8xf32> to vector<8x8xf32>
    %699 = arith.addf %697, %698 : vector<8x8xf32>
    %cst_211 = arith.constant 0.000000e+00 : f32
    %700 = vector.broadcast %cst_211 : f32 to vector<8x8xf32>
    %701 = arith.cmpf ogt, %699, %700 : vector<8x8xf32>
    %cst_212 = arith.constant 2.000000e-01 : f32
    %702 = vector.broadcast %cst_212 : f32 to vector<8x8xf32>
    %703 = arith.mulf %702, %699 : vector<8x8xf32>
    %704 = arith.select %701, %699, %703 : vector<8x8xi1>, vector<8x8xf32>
    %cst_213 = arith.constant dense<0xFF800000> : vector<8xf32>
    %705 = vector.multi_reduction <maximumf>, %704, %cst_213 [1] : vector<8x8xf32> to vector<8xf32>
    %706 = vector.shape_cast %705 : vector<8xf32> to vector<8x1xf32>
    %707 = vector.broadcast %706 : vector<8x1xf32> to vector<8x8xf32>
    %708 = arith.subf %704, %707 : vector<8x8xf32>
    %709 = math.exp %708 : vector<8x8xf32>
    %cst_214 = arith.constant dense<0.000000e+00> : vector<8xf32>
    %710 = vector.multi_reduction <add>, %709, %cst_214 [1] : vector<8x8xf32> to vector<8xf32>
    %711 = vector.shape_cast %710 : vector<8xf32> to vector<8x1xf32>
    %712 = tpu.reciprocal %711 {approx = true} : vector<8x1xf32> -> vector<8x1xf32>
    %cst_215 = arith.constant 1.250000e-01 : f32
    %713 = vector.broadcast %cst_215 : f32 to vector<8x1xf32>
    %714 = arith.mulf %712, %713 : vector<8x1xf32>
    %cst_216 = arith.constant dense<0.000000e+00> : vector<8x32xf32>
    %715 = tpu.matmul %709, %690, %cst_216 {dimension_numbers = #tpu.dot_dimension_numbers<[1], [0], [0], [1], [0, 0, 1, 1], [], []>} : vector<8x8xf32>, vector<8x32xf32>, vector<8x32xf32> -> vector<8x32xf32>
    %716 = vector.broadcast %714 : vector<8x1xf32> to vector<8x32xf32>
    %717 = arith.mulf %715, %716 : vector<8x32xf32>
    %718 = arith.addf %689, %717 : vector<8x32xf32>
    %719 = vector.extract_strided_slice %571 {offsets = [0, 160], sizes = [8, 32], strides = [1, 1]} : vector<8x256xf32> to vector<8x32xf32>
    %720 = vector.extract_strided_slice %568 {offsets = [5, 0], sizes = [1, 32], strides = [1, 1]} : vector<8x32xf32> to vector<1x32xf32>
    %721 = vector.broadcast %720 : vector<1x32xf32> to vector<8x32xf32>
    %722 = arith.mulf %719, %721 : vector<8x32xf32>
    %cst_217 = arith.constant dense<0.000000e+00> : vector<8xf32>
    %723 = vector.multi_reduction <add>, %722, %cst_217 [1] : vector<8x32xf32> to vector<8xf32>
    %724 = vector.shape_cast %723 : vector<8xf32> to vector<8x1xf32>
    %725 = vector.extract_strided_slice %572 {offsets = [5, 0], sizes = [1, 8], strides = [1, 1]} : vector<8x8xf32> to vector<1x8xf32>
    %726 = vector.broadcast %724 : vector<8x1xf32> to vector<8x8xf32>
    %727 = vector.broadcast %725 : vector<1x8xf32> to vector<8x8xf32>
    %728 = arith.addf %726, %727 : vector<8x8xf32>
    %cst_218 = arith.constant 0.000000e+00 : f32
    %729 = vector.broadcast %cst_218 : f32 to vector<8x8xf32>
    %730 = arith.cmpf ogt, %728, %729 : vector<8x8xf32>
    %cst_219 = arith.constant 2.000000e-01 : f32
    %731 = vector.broadcast %cst_219 : f32 to vector<8x8xf32>
    %732 = arith.mulf %731, %728 : vector<8x8xf32>
    %733 = arith.select %730, %728, %732 : vector<8x8xi1>, vector<8x8xf32>
    %cst_220 = arith.constant dense<0xFF800000> : vector<8xf32>
    %734 = vector.multi_reduction <maximumf>, %733, %cst_220 [1] : vector<8x8xf32> to vector<8xf32>
    %735 = vector.shape_cast %734 : vector<8xf32> to vector<8x1xf32>
    %736 = vector.broadcast %735 : vector<8x1xf32> to vector<8x8xf32>
    %737 = arith.subf %733, %736 : vector<8x8xf32>
    %738 = math.exp %737 : vector<8x8xf32>
    %cst_221 = arith.constant dense<0.000000e+00> : vector<8xf32>
    %739 = vector.multi_reduction <add>, %738, %cst_221 [1] : vector<8x8xf32> to vector<8xf32>
    %740 = vector.shape_cast %739 : vector<8xf32> to vector<8x1xf32>
    %741 = tpu.reciprocal %740 {approx = true} : vector<8x1xf32> -> vector<8x1xf32>
    %cst_222 = arith.constant 1.250000e-01 : f32
    %742 = vector.broadcast %cst_222 : f32 to vector<8x1xf32>
    %743 = arith.mulf %741, %742 : vector<8x1xf32>
    %cst_223 = arith.constant dense<0.000000e+00> : vector<8x32xf32>
    %744 = tpu.matmul %738, %719, %cst_223 {dimension_numbers = #tpu.dot_dimension_numbers<[1], [0], [0], [1], [0, 0, 1, 1], [], []>} : vector<8x8xf32>, vector<8x32xf32>, vector<8x32xf32> -> vector<8x32xf32>
    %745 = vector.broadcast %743 : vector<8x1xf32> to vector<8x32xf32>
    %746 = arith.mulf %744, %745 : vector<8x32xf32>
    %747 = arith.addf %718, %746 : vector<8x32xf32>
    %748 = vector.extract_strided_slice %571 {offsets = [0, 192], sizes = [8, 32], strides = [1, 1]} : vector<8x256xf32> to vector<8x32xf32>
    %749 = vector.extract_strided_slice %568 {offsets = [6, 0], sizes = [1, 32], strides = [1, 1]} : vector<8x32xf32> to vector<1x32xf32>
    %750 = vector.broadcast %749 : vector<1x32xf32> to vector<8x32xf32>
    %751 = arith.mulf %748, %750 : vector<8x32xf32>
    %cst_224 = arith.constant dense<0.000000e+00> : vector<8xf32>
    %752 = vector.multi_reduction <add>, %751, %cst_224 [1] : vector<8x32xf32> to vector<8xf32>
    %753 = vector.shape_cast %752 : vector<8xf32> to vector<8x1xf32>
    %754 = vector.extract_strided_slice %572 {offsets = [6, 0], sizes = [1, 8], strides = [1, 1]} : vector<8x8xf32> to vector<1x8xf32>
    %755 = vector.broadcast %753 : vector<8x1xf32> to vector<8x8xf32>
    %756 = vector.broadcast %754 : vector<1x8xf32> to vector<8x8xf32>
    %757 = arith.addf %755, %756 : vector<8x8xf32>
    %cst_225 = arith.constant 0.000000e+00 : f32
    %758 = vector.broadcast %cst_225 : f32 to vector<8x8xf32>
    %759 = arith.cmpf ogt, %757, %758 : vector<8x8xf32>
    %cst_226 = arith.constant 2.000000e-01 : f32
    %760 = vector.broadcast %cst_226 : f32 to vector<8x8xf32>
    %761 = arith.mulf %760, %757 : vector<8x8xf32>
    %762 = arith.select %759, %757, %761 : vector<8x8xi1>, vector<8x8xf32>
    %cst_227 = arith.constant dense<0xFF800000> : vector<8xf32>
    %763 = vector.multi_reduction <maximumf>, %762, %cst_227 [1] : vector<8x8xf32> to vector<8xf32>
    %764 = vector.shape_cast %763 : vector<8xf32> to vector<8x1xf32>
    %765 = vector.broadcast %764 : vector<8x1xf32> to vector<8x8xf32>
    %766 = arith.subf %762, %765 : vector<8x8xf32>
    %767 = math.exp %766 : vector<8x8xf32>
    %cst_228 = arith.constant dense<0.000000e+00> : vector<8xf32>
    %768 = vector.multi_reduction <add>, %767, %cst_228 [1] : vector<8x8xf32> to vector<8xf32>
    %769 = vector.shape_cast %768 : vector<8xf32> to vector<8x1xf32>
    %770 = tpu.reciprocal %769 {approx = true} : vector<8x1xf32> -> vector<8x1xf32>
    %cst_229 = arith.constant 1.250000e-01 : f32
    %771 = vector.broadcast %cst_229 : f32 to vector<8x1xf32>
    %772 = arith.mulf %770, %771 : vector<8x1xf32>
    %cst_230 = arith.constant dense<0.000000e+00> : vector<8x32xf32>
    %773 = tpu.matmul %767, %748, %cst_230 {dimension_numbers = #tpu.dot_dimension_numbers<[1], [0], [0], [1], [0, 0, 1, 1], [], []>} : vector<8x8xf32>, vector<8x32xf32>, vector<8x32xf32> -> vector<8x32xf32>
    %774 = vector.broadcast %772 : vector<8x1xf32> to vector<8x32xf32>
    %775 = arith.mulf %773, %774 : vector<8x32xf32>
    %776 = arith.addf %747, %775 : vector<8x32xf32>
    %777 = vector.extract_strided_slice %571 {offsets = [0, 224], sizes = [8, 32], strides = [1, 1]} : vector<8x256xf32> to vector<8x32xf32>
    %778 = vector.extract_strided_slice %568 {offsets = [7, 0], sizes = [1, 32], strides = [1, 1]} : vector<8x32xf32> to vector<1x32xf32>
    %779 = vector.broadcast %778 : vector<1x32xf32> to vector<8x32xf32>
    %780 = arith.mulf %777, %779 : vector<8x32xf32>
    %cst_231 = arith.constant dense<0.000000e+00> : vector<8xf32>
    %781 = vector.multi_reduction <add>, %780, %cst_231 [1] : vector<8x32xf32> to vector<8xf32>
    %782 = vector.shape_cast %781 : vector<8xf32> to vector<8x1xf32>
    %783 = vector.extract_strided_slice %572 {offsets = [7, 0], sizes = [1, 8], strides = [1, 1]} : vector<8x8xf32> to vector<1x8xf32>
    %784 = vector.broadcast %782 : vector<8x1xf32> to vector<8x8xf32>
    %785 = vector.broadcast %783 : vector<1x8xf32> to vector<8x8xf32>
    %786 = arith.addf %784, %785 : vector<8x8xf32>
    %cst_232 = arith.constant 0.000000e+00 : f32
    %787 = vector.broadcast %cst_232 : f32 to vector<8x8xf32>
    %788 = arith.cmpf ogt, %786, %787 : vector<8x8xf32>
    %cst_233 = arith.constant 2.000000e-01 : f32
    %789 = vector.broadcast %cst_233 : f32 to vector<8x8xf32>
    %790 = arith.mulf %789, %786 : vector<8x8xf32>
    %791 = arith.select %788, %786, %790 : vector<8x8xi1>, vector<8x8xf32>
    %cst_234 = arith.constant dense<0xFF800000> : vector<8xf32>
    %792 = vector.multi_reduction <maximumf>, %791, %cst_234 [1] : vector<8x8xf32> to vector<8xf32>
    %793 = vector.shape_cast %792 : vector<8xf32> to vector<8x1xf32>
    %794 = vector.broadcast %793 : vector<8x1xf32> to vector<8x8xf32>
    %795 = arith.subf %791, %794 : vector<8x8xf32>
    %796 = math.exp %795 : vector<8x8xf32>
    %cst_235 = arith.constant dense<0.000000e+00> : vector<8xf32>
    %797 = vector.multi_reduction <add>, %796, %cst_235 [1] : vector<8x8xf32> to vector<8xf32>
    %798 = vector.shape_cast %797 : vector<8xf32> to vector<8x1xf32>
    %799 = tpu.reciprocal %798 {approx = true} : vector<8x1xf32> -> vector<8x1xf32>
    %cst_236 = arith.constant 1.250000e-01 : f32
    %800 = vector.broadcast %cst_236 : f32 to vector<8x1xf32>
    %801 = arith.mulf %799, %800 : vector<8x1xf32>
    %cst_237 = arith.constant dense<0.000000e+00> : vector<8x32xf32>
    %802 = tpu.matmul %796, %777, %cst_237 {dimension_numbers = #tpu.dot_dimension_numbers<[1], [0], [0], [1], [0, 0, 1, 1], [], []>} : vector<8x8xf32>, vector<8x32xf32>, vector<8x32xf32> -> vector<8x32xf32>
    %803 = vector.broadcast %801 : vector<8x1xf32> to vector<8x32xf32>
    %804 = arith.mulf %802, %803 : vector<8x32xf32>
    %805 = arith.addf %776, %804 : vector<8x32xf32>
    %806 = vector.broadcast %570 : vector<1x32xf32> to vector<8x32xf32>
    %807 = arith.addf %805, %806 : vector<8x32xf32>
    %c1_238 = arith.constant 1 : index
    %c0_239 = arith.constant 0 : index
    %c0_240 = arith.constant 0 : index
    %808 = vector.load %arg7[%c1_238, %c0_239, %c0_240] : memref<3x32x32xf32, #tpu.memory_space<vmem>>, vector<1x32x32xf32>
    %809 = vector.shape_cast %808 : vector<1x32x32xf32> to vector<32x32xf32>
    %c1_241 = arith.constant 1 : index
    %c0_242 = arith.constant 0 : index
    %c0_243 = arith.constant 0 : index
    %810 = vector.load %arg8[%c1_241, %c0_242, %c0_243] : memref<3x1x32xf32, #tpu.memory_space<vmem>>, vector<1x1x32xf32>
    %811 = vector.shape_cast %810 : vector<1x1x32xf32> to vector<1x32xf32>
    %c1_244 = arith.constant 1 : index
    %c0_245 = arith.constant 0 : index
    %c0_246 = arith.constant 0 : index
    %812 = vector.load %arg9[%c1_244, %c0_245, %c0_246] : memref<3x1x32xf32, #tpu.memory_space<vmem>>, vector<1x1x32xf32>
    %813 = vector.shape_cast %812 : vector<1x1x32xf32> to vector<1x32xf32>
    %c1_247 = arith.constant 1 : index
    %c0_248 = arith.constant 0 : index
    %c0_249 = arith.constant 0 : index
    %814 = vector.load %arg10[%c1_247, %c0_248, %c0_249] : memref<3x1x32xf32, #tpu.memory_space<vmem>>, vector<1x1x32xf32>
    %815 = vector.shape_cast %814 : vector<1x1x32xf32> to vector<1x32xf32>
    %816 = arith.addf %807, %562 : vector<8x32xf32>
    %cst_250 = arith.constant dense<0.000000e+00> : vector<8x32xf32>
    %817 = tpu.matmul %816, %809, %cst_250 {dimension_numbers = #tpu.dot_dimension_numbers<[1], [0], [0], [1], [0, 0, 1, 1], [], []>} : vector<8x32xf32>, vector<32x32xf32>, vector<8x32xf32> -> vector<8x32xf32>
    %818 = vector.broadcast %811 : vector<1x32xf32> to vector<8x32xf32>
    %819 = arith.addf %817, %818 : vector<8x32xf32>
    %cst_251 = arith.constant 0.000000e+00 : f32
    %820 = vector.broadcast %cst_251 : f32 to vector<8x32xf32>
    %821 = arith.maximumf %819, %820 : vector<8x32xf32>
    %822 = arith.addf %821, %562 : vector<8x32xf32>
    %cst_252 = arith.constant dense<0.000000e+00> : vector<32xf32>
    %823 = vector.multi_reduction <add>, %822, %cst_252 [0] : vector<8x32xf32> to vector<32xf32>
    %824 = vector.shape_cast %823 : vector<32xf32> to vector<1x32xf32>
    %cst_253 = arith.constant 8.000000e+00 : f32
    %825 = vector.broadcast %cst_253 : f32 to vector<1x32xf32>
    %826 = arith.divf %824, %825 : vector<1x32xf32>
    %827 = vector.broadcast %826 : vector<1x32xf32> to vector<8x32xf32>
    %828 = arith.subf %822, %827 : vector<8x32xf32>
    %829 = arith.mulf %828, %828 : vector<8x32xf32>
    %cst_254 = arith.constant dense<0.000000e+00> : vector<32xf32>
    %830 = vector.multi_reduction <add>, %829, %cst_254 [0] : vector<8x32xf32> to vector<32xf32>
    %831 = vector.shape_cast %830 : vector<32xf32> to vector<1x32xf32>
    %cst_255 = arith.constant 8.000000e+00 : f32
    %832 = vector.broadcast %cst_255 : f32 to vector<1x32xf32>
    %833 = arith.divf %831, %832 : vector<1x32xf32>
    %834 = vector.broadcast %826 : vector<1x32xf32> to vector<8x32xf32>
    %835 = arith.subf %822, %834 : vector<8x32xf32>
    %836 = vector.broadcast %813 : vector<1x32xf32> to vector<8x32xf32>
    %837 = arith.mulf %836, %835 : vector<8x32xf32>
    %cst_256 = arith.constant 9.99999974E-6 : f32
    %838 = vector.broadcast %cst_256 : f32 to vector<1x32xf32>
    %839 = arith.addf %833, %838 : vector<1x32xf32>
    %840 = math.rsqrt %839 : vector<1x32xf32>
    %841 = vector.broadcast %840 : vector<1x32xf32> to vector<8x32xf32>
    %842 = arith.mulf %837, %841 : vector<8x32xf32>
    %843 = vector.broadcast %815 : vector<1x32xf32> to vector<8x32xf32>
    %844 = arith.addf %842, %843 : vector<8x32xf32>
    %c2 = arith.constant 2 : index
    %c0_257 = arith.constant 0 : index
    %c0_258 = arith.constant 0 : index
    %845 = vector.load %arg3[%c2, %c0_257, %c0_258] : memref<3x32x256xf32, #tpu.memory_space<vmem>>, vector<1x32x256xf32>
    %846 = vector.shape_cast %845 : vector<1x32x256xf32> to vector<32x256xf32>
    %c2_259 = arith.constant 2 : index
    %c0_260 = arith.constant 0 : index
    %c0_261 = arith.constant 0 : index
    %847 = vector.load %arg4[%c2_259, %c0_260, %c0_261] : memref<3x8x256xf32, #tpu.memory_space<vmem>>, vector<1x8x256xf32>
    %848 = vector.shape_cast %847 : vector<1x8x256xf32> to vector<8x256xf32>
    %c2_262 = arith.constant 2 : index
    %c0_263 = arith.constant 0 : index
    %c0_264 = arith.constant 0 : index
    %849 = vector.load %arg5[%c2_262, %c0_263, %c0_264] : memref<3x8x32xf32, #tpu.memory_space<vmem>>, vector<1x8x32xf32>
    %850 = vector.shape_cast %849 : vector<1x8x32xf32> to vector<8x32xf32>
    %c2_265 = arith.constant 2 : index
    %c0_266 = arith.constant 0 : index
    %c0_267 = arith.constant 0 : index
    %851 = vector.load %arg6[%c2_265, %c0_266, %c0_267] : memref<3x1x32xf32, #tpu.memory_space<vmem>>, vector<1x1x32xf32>
    %852 = vector.shape_cast %851 : vector<1x1x32xf32> to vector<1x32xf32>
    %cst_268 = arith.constant dense<0.000000e+00> : vector<8x256xf32>
    %853 = tpu.matmul %844, %846, %cst_268 {dimension_numbers = #tpu.dot_dimension_numbers<[1], [0], [0], [1], [0, 0, 1, 1], [], []>} : vector<8x32xf32>, vector<32x256xf32>, vector<8x256xf32> -> vector<8x256xf32>
    %cst_269 = arith.constant dense<0.000000e+00> : vector<8x8xf32>
    %854 = tpu.matmul %848, %853, %cst_269 {dimension_numbers = #tpu.dot_dimension_numbers<[1], [1], [0], [0], [0, 0, 1, 0], [], []>} : vector<8x256xf32>, vector<8x256xf32>, vector<8x8xf32> -> vector<8x8xf32>
    %cst_270 = arith.constant 0.000000e+00 : f32
    %855 = vector.broadcast %cst_270 : f32 to vector<8x32xf32>
    %856 = vector.extract_strided_slice %853 {offsets = [0, 0], sizes = [8, 32], strides = [1, 1]} : vector<8x256xf32> to vector<8x32xf32>
    %857 = vector.extract_strided_slice %850 {offsets = [0, 0], sizes = [1, 32], strides = [1, 1]} : vector<8x32xf32> to vector<1x32xf32>
    %858 = vector.broadcast %857 : vector<1x32xf32> to vector<8x32xf32>
    %859 = arith.mulf %856, %858 : vector<8x32xf32>
    %cst_271 = arith.constant dense<0.000000e+00> : vector<8xf32>
    %860 = vector.multi_reduction <add>, %859, %cst_271 [1] : vector<8x32xf32> to vector<8xf32>
    %861 = vector.shape_cast %860 : vector<8xf32> to vector<8x1xf32>
    %862 = vector.extract_strided_slice %854 {offsets = [0, 0], sizes = [1, 8], strides = [1, 1]} : vector<8x8xf32> to vector<1x8xf32>
    %863 = vector.broadcast %861 : vector<8x1xf32> to vector<8x8xf32>
    %864 = vector.broadcast %862 : vector<1x8xf32> to vector<8x8xf32>
    %865 = arith.addf %863, %864 : vector<8x8xf32>
    %cst_272 = arith.constant 0.000000e+00 : f32
    %866 = vector.broadcast %cst_272 : f32 to vector<8x8xf32>
    %867 = arith.cmpf ogt, %865, %866 : vector<8x8xf32>
    %cst_273 = arith.constant 2.000000e-01 : f32
    %868 = vector.broadcast %cst_273 : f32 to vector<8x8xf32>
    %869 = arith.mulf %868, %865 : vector<8x8xf32>
    %870 = arith.select %867, %865, %869 : vector<8x8xi1>, vector<8x8xf32>
    %cst_274 = arith.constant dense<0xFF800000> : vector<8xf32>
    %871 = vector.multi_reduction <maximumf>, %870, %cst_274 [1] : vector<8x8xf32> to vector<8xf32>
    %872 = vector.shape_cast %871 : vector<8xf32> to vector<8x1xf32>
    %873 = vector.broadcast %872 : vector<8x1xf32> to vector<8x8xf32>
    %874 = arith.subf %870, %873 : vector<8x8xf32>
    %875 = math.exp %874 : vector<8x8xf32>
    %cst_275 = arith.constant dense<0.000000e+00> : vector<8xf32>
    %876 = vector.multi_reduction <add>, %875, %cst_275 [1] : vector<8x8xf32> to vector<8xf32>
    %877 = vector.shape_cast %876 : vector<8xf32> to vector<8x1xf32>
    %878 = tpu.reciprocal %877 {approx = true} : vector<8x1xf32> -> vector<8x1xf32>
    %cst_276 = arith.constant 1.250000e-01 : f32
    %879 = vector.broadcast %cst_276 : f32 to vector<8x1xf32>
    %880 = arith.mulf %878, %879 : vector<8x1xf32>
    %cst_277 = arith.constant dense<0.000000e+00> : vector<8x32xf32>
    %881 = tpu.matmul %875, %856, %cst_277 {dimension_numbers = #tpu.dot_dimension_numbers<[1], [0], [0], [1], [0, 0, 1, 1], [], []>} : vector<8x8xf32>, vector<8x32xf32>, vector<8x32xf32> -> vector<8x32xf32>
    %882 = vector.broadcast %880 : vector<8x1xf32> to vector<8x32xf32>
    %883 = arith.mulf %881, %882 : vector<8x32xf32>
    %884 = arith.addf %855, %883 : vector<8x32xf32>
    %885 = vector.extract_strided_slice %853 {offsets = [0, 32], sizes = [8, 32], strides = [1, 1]} : vector<8x256xf32> to vector<8x32xf32>
    %886 = vector.extract_strided_slice %850 {offsets = [1, 0], sizes = [1, 32], strides = [1, 1]} : vector<8x32xf32> to vector<1x32xf32>
    %887 = vector.broadcast %886 : vector<1x32xf32> to vector<8x32xf32>
    %888 = arith.mulf %885, %887 : vector<8x32xf32>
    %cst_278 = arith.constant dense<0.000000e+00> : vector<8xf32>
    %889 = vector.multi_reduction <add>, %888, %cst_278 [1] : vector<8x32xf32> to vector<8xf32>
    %890 = vector.shape_cast %889 : vector<8xf32> to vector<8x1xf32>
    %891 = vector.extract_strided_slice %854 {offsets = [1, 0], sizes = [1, 8], strides = [1, 1]} : vector<8x8xf32> to vector<1x8xf32>
    %892 = vector.broadcast %890 : vector<8x1xf32> to vector<8x8xf32>
    %893 = vector.broadcast %891 : vector<1x8xf32> to vector<8x8xf32>
    %894 = arith.addf %892, %893 : vector<8x8xf32>
    %cst_279 = arith.constant 0.000000e+00 : f32
    %895 = vector.broadcast %cst_279 : f32 to vector<8x8xf32>
    %896 = arith.cmpf ogt, %894, %895 : vector<8x8xf32>
    %cst_280 = arith.constant 2.000000e-01 : f32
    %897 = vector.broadcast %cst_280 : f32 to vector<8x8xf32>
    %898 = arith.mulf %897, %894 : vector<8x8xf32>
    %899 = arith.select %896, %894, %898 : vector<8x8xi1>, vector<8x8xf32>
    %cst_281 = arith.constant dense<0xFF800000> : vector<8xf32>
    %900 = vector.multi_reduction <maximumf>, %899, %cst_281 [1] : vector<8x8xf32> to vector<8xf32>
    %901 = vector.shape_cast %900 : vector<8xf32> to vector<8x1xf32>
    %902 = vector.broadcast %901 : vector<8x1xf32> to vector<8x8xf32>
    %903 = arith.subf %899, %902 : vector<8x8xf32>
    %904 = math.exp %903 : vector<8x8xf32>
    %cst_282 = arith.constant dense<0.000000e+00> : vector<8xf32>
    %905 = vector.multi_reduction <add>, %904, %cst_282 [1] : vector<8x8xf32> to vector<8xf32>
    %906 = vector.shape_cast %905 : vector<8xf32> to vector<8x1xf32>
    %907 = tpu.reciprocal %906 {approx = true} : vector<8x1xf32> -> vector<8x1xf32>
    %cst_283 = arith.constant 1.250000e-01 : f32
    %908 = vector.broadcast %cst_283 : f32 to vector<8x1xf32>
    %909 = arith.mulf %907, %908 : vector<8x1xf32>
    %cst_284 = arith.constant dense<0.000000e+00> : vector<8x32xf32>
    %910 = tpu.matmul %904, %885, %cst_284 {dimension_numbers = #tpu.dot_dimension_numbers<[1], [0], [0], [1], [0, 0, 1, 1], [], []>} : vector<8x8xf32>, vector<8x32xf32>, vector<8x32xf32> -> vector<8x32xf32>
    %911 = vector.broadcast %909 : vector<8x1xf32> to vector<8x32xf32>
    %912 = arith.mulf %910, %911 : vector<8x32xf32>
    %913 = arith.addf %884, %912 : vector<8x32xf32>
    %914 = vector.extract_strided_slice %853 {offsets = [0, 64], sizes = [8, 32], strides = [1, 1]} : vector<8x256xf32> to vector<8x32xf32>
    %915 = vector.extract_strided_slice %850 {offsets = [2, 0], sizes = [1, 32], strides = [1, 1]} : vector<8x32xf32> to vector<1x32xf32>
    %916 = vector.broadcast %915 : vector<1x32xf32> to vector<8x32xf32>
    %917 = arith.mulf %914, %916 : vector<8x32xf32>
    %cst_285 = arith.constant dense<0.000000e+00> : vector<8xf32>
    %918 = vector.multi_reduction <add>, %917, %cst_285 [1] : vector<8x32xf32> to vector<8xf32>
    %919 = vector.shape_cast %918 : vector<8xf32> to vector<8x1xf32>
    %920 = vector.extract_strided_slice %854 {offsets = [2, 0], sizes = [1, 8], strides = [1, 1]} : vector<8x8xf32> to vector<1x8xf32>
    %921 = vector.broadcast %919 : vector<8x1xf32> to vector<8x8xf32>
    %922 = vector.broadcast %920 : vector<1x8xf32> to vector<8x8xf32>
    %923 = arith.addf %921, %922 : vector<8x8xf32>
    %cst_286 = arith.constant 0.000000e+00 : f32
    %924 = vector.broadcast %cst_286 : f32 to vector<8x8xf32>
    %925 = arith.cmpf ogt, %923, %924 : vector<8x8xf32>
    %cst_287 = arith.constant 2.000000e-01 : f32
    %926 = vector.broadcast %cst_287 : f32 to vector<8x8xf32>
    %927 = arith.mulf %926, %923 : vector<8x8xf32>
    %928 = arith.select %925, %923, %927 : vector<8x8xi1>, vector<8x8xf32>
    %cst_288 = arith.constant dense<0xFF800000> : vector<8xf32>
    %929 = vector.multi_reduction <maximumf>, %928, %cst_288 [1] : vector<8x8xf32> to vector<8xf32>
    %930 = vector.shape_cast %929 : vector<8xf32> to vector<8x1xf32>
    %931 = vector.broadcast %930 : vector<8x1xf32> to vector<8x8xf32>
    %932 = arith.subf %928, %931 : vector<8x8xf32>
    %933 = math.exp %932 : vector<8x8xf32>
    %cst_289 = arith.constant dense<0.000000e+00> : vector<8xf32>
    %934 = vector.multi_reduction <add>, %933, %cst_289 [1] : vector<8x8xf32> to vector<8xf32>
    %935 = vector.shape_cast %934 : vector<8xf32> to vector<8x1xf32>
    %936 = tpu.reciprocal %935 {approx = true} : vector<8x1xf32> -> vector<8x1xf32>
    %cst_290 = arith.constant 1.250000e-01 : f32
    %937 = vector.broadcast %cst_290 : f32 to vector<8x1xf32>
    %938 = arith.mulf %936, %937 : vector<8x1xf32>
    %cst_291 = arith.constant dense<0.000000e+00> : vector<8x32xf32>
    %939 = tpu.matmul %933, %914, %cst_291 {dimension_numbers = #tpu.dot_dimension_numbers<[1], [0], [0], [1], [0, 0, 1, 1], [], []>} : vector<8x8xf32>, vector<8x32xf32>, vector<8x32xf32> -> vector<8x32xf32>
    %940 = vector.broadcast %938 : vector<8x1xf32> to vector<8x32xf32>
    %941 = arith.mulf %939, %940 : vector<8x32xf32>
    %942 = arith.addf %913, %941 : vector<8x32xf32>
    %943 = vector.extract_strided_slice %853 {offsets = [0, 96], sizes = [8, 32], strides = [1, 1]} : vector<8x256xf32> to vector<8x32xf32>
    %944 = vector.extract_strided_slice %850 {offsets = [3, 0], sizes = [1, 32], strides = [1, 1]} : vector<8x32xf32> to vector<1x32xf32>
    %945 = vector.broadcast %944 : vector<1x32xf32> to vector<8x32xf32>
    %946 = arith.mulf %943, %945 : vector<8x32xf32>
    %cst_292 = arith.constant dense<0.000000e+00> : vector<8xf32>
    %947 = vector.multi_reduction <add>, %946, %cst_292 [1] : vector<8x32xf32> to vector<8xf32>
    %948 = vector.shape_cast %947 : vector<8xf32> to vector<8x1xf32>
    %949 = vector.extract_strided_slice %854 {offsets = [3, 0], sizes = [1, 8], strides = [1, 1]} : vector<8x8xf32> to vector<1x8xf32>
    %950 = vector.broadcast %948 : vector<8x1xf32> to vector<8x8xf32>
    %951 = vector.broadcast %949 : vector<1x8xf32> to vector<8x8xf32>
    %952 = arith.addf %950, %951 : vector<8x8xf32>
    %cst_293 = arith.constant 0.000000e+00 : f32
    %953 = vector.broadcast %cst_293 : f32 to vector<8x8xf32>
    %954 = arith.cmpf ogt, %952, %953 : vector<8x8xf32>
    %cst_294 = arith.constant 2.000000e-01 : f32
    %955 = vector.broadcast %cst_294 : f32 to vector<8x8xf32>
    %956 = arith.mulf %955, %952 : vector<8x8xf32>
    %957 = arith.select %954, %952, %956 : vector<8x8xi1>, vector<8x8xf32>
    %cst_295 = arith.constant dense<0xFF800000> : vector<8xf32>
    %958 = vector.multi_reduction <maximumf>, %957, %cst_295 [1] : vector<8x8xf32> to vector<8xf32>
    %959 = vector.shape_cast %958 : vector<8xf32> to vector<8x1xf32>
    %960 = vector.broadcast %959 : vector<8x1xf32> to vector<8x8xf32>
    %961 = arith.subf %957, %960 : vector<8x8xf32>
    %962 = math.exp %961 : vector<8x8xf32>
    %cst_296 = arith.constant dense<0.000000e+00> : vector<8xf32>
    %963 = vector.multi_reduction <add>, %962, %cst_296 [1] : vector<8x8xf32> to vector<8xf32>
    %964 = vector.shape_cast %963 : vector<8xf32> to vector<8x1xf32>
    %965 = tpu.reciprocal %964 {approx = true} : vector<8x1xf32> -> vector<8x1xf32>
    %cst_297 = arith.constant 1.250000e-01 : f32
    %966 = vector.broadcast %cst_297 : f32 to vector<8x1xf32>
    %967 = arith.mulf %965, %966 : vector<8x1xf32>
    %cst_298 = arith.constant dense<0.000000e+00> : vector<8x32xf32>
    %968 = tpu.matmul %962, %943, %cst_298 {dimension_numbers = #tpu.dot_dimension_numbers<[1], [0], [0], [1], [0, 0, 1, 1], [], []>} : vector<8x8xf32>, vector<8x32xf32>, vector<8x32xf32> -> vector<8x32xf32>
    %969 = vector.broadcast %967 : vector<8x1xf32> to vector<8x32xf32>
    %970 = arith.mulf %968, %969 : vector<8x32xf32>
    %971 = arith.addf %942, %970 : vector<8x32xf32>
    %972 = vector.extract_strided_slice %853 {offsets = [0, 128], sizes = [8, 32], strides = [1, 1]} : vector<8x256xf32> to vector<8x32xf32>
    %973 = vector.extract_strided_slice %850 {offsets = [4, 0], sizes = [1, 32], strides = [1, 1]} : vector<8x32xf32> to vector<1x32xf32>
    %974 = vector.broadcast %973 : vector<1x32xf32> to vector<8x32xf32>
    %975 = arith.mulf %972, %974 : vector<8x32xf32>
    %cst_299 = arith.constant dense<0.000000e+00> : vector<8xf32>
    %976 = vector.multi_reduction <add>, %975, %cst_299 [1] : vector<8x32xf32> to vector<8xf32>
    %977 = vector.shape_cast %976 : vector<8xf32> to vector<8x1xf32>
    %978 = vector.extract_strided_slice %854 {offsets = [4, 0], sizes = [1, 8], strides = [1, 1]} : vector<8x8xf32> to vector<1x8xf32>
    %979 = vector.broadcast %977 : vector<8x1xf32> to vector<8x8xf32>
    %980 = vector.broadcast %978 : vector<1x8xf32> to vector<8x8xf32>
    %981 = arith.addf %979, %980 : vector<8x8xf32>
    %cst_300 = arith.constant 0.000000e+00 : f32
    %982 = vector.broadcast %cst_300 : f32 to vector<8x8xf32>
    %983 = arith.cmpf ogt, %981, %982 : vector<8x8xf32>
    %cst_301 = arith.constant 2.000000e-01 : f32
    %984 = vector.broadcast %cst_301 : f32 to vector<8x8xf32>
    %985 = arith.mulf %984, %981 : vector<8x8xf32>
    %986 = arith.select %983, %981, %985 : vector<8x8xi1>, vector<8x8xf32>
    %cst_302 = arith.constant dense<0xFF800000> : vector<8xf32>
    %987 = vector.multi_reduction <maximumf>, %986, %cst_302 [1] : vector<8x8xf32> to vector<8xf32>
    %988 = vector.shape_cast %987 : vector<8xf32> to vector<8x1xf32>
    %989 = vector.broadcast %988 : vector<8x1xf32> to vector<8x8xf32>
    %990 = arith.subf %986, %989 : vector<8x8xf32>
    %991 = math.exp %990 : vector<8x8xf32>
    %cst_303 = arith.constant dense<0.000000e+00> : vector<8xf32>
    %992 = vector.multi_reduction <add>, %991, %cst_303 [1] : vector<8x8xf32> to vector<8xf32>
    %993 = vector.shape_cast %992 : vector<8xf32> to vector<8x1xf32>
    %994 = tpu.reciprocal %993 {approx = true} : vector<8x1xf32> -> vector<8x1xf32>
    %cst_304 = arith.constant 1.250000e-01 : f32
    %995 = vector.broadcast %cst_304 : f32 to vector<8x1xf32>
    %996 = arith.mulf %994, %995 : vector<8x1xf32>
    %cst_305 = arith.constant dense<0.000000e+00> : vector<8x32xf32>
    %997 = tpu.matmul %991, %972, %cst_305 {dimension_numbers = #tpu.dot_dimension_numbers<[1], [0], [0], [1], [0, 0, 1, 1], [], []>} : vector<8x8xf32>, vector<8x32xf32>, vector<8x32xf32> -> vector<8x32xf32>
    %998 = vector.broadcast %996 : vector<8x1xf32> to vector<8x32xf32>
    %999 = arith.mulf %997, %998 : vector<8x32xf32>
    %1000 = arith.addf %971, %999 : vector<8x32xf32>
    %1001 = vector.extract_strided_slice %853 {offsets = [0, 160], sizes = [8, 32], strides = [1, 1]} : vector<8x256xf32> to vector<8x32xf32>
    %1002 = vector.extract_strided_slice %850 {offsets = [5, 0], sizes = [1, 32], strides = [1, 1]} : vector<8x32xf32> to vector<1x32xf32>
    %1003 = vector.broadcast %1002 : vector<1x32xf32> to vector<8x32xf32>
    %1004 = arith.mulf %1001, %1003 : vector<8x32xf32>
    %cst_306 = arith.constant dense<0.000000e+00> : vector<8xf32>
    %1005 = vector.multi_reduction <add>, %1004, %cst_306 [1] : vector<8x32xf32> to vector<8xf32>
    %1006 = vector.shape_cast %1005 : vector<8xf32> to vector<8x1xf32>
    %1007 = vector.extract_strided_slice %854 {offsets = [5, 0], sizes = [1, 8], strides = [1, 1]} : vector<8x8xf32> to vector<1x8xf32>
    %1008 = vector.broadcast %1006 : vector<8x1xf32> to vector<8x8xf32>
    %1009 = vector.broadcast %1007 : vector<1x8xf32> to vector<8x8xf32>
    %1010 = arith.addf %1008, %1009 : vector<8x8xf32>
    %cst_307 = arith.constant 0.000000e+00 : f32
    %1011 = vector.broadcast %cst_307 : f32 to vector<8x8xf32>
    %1012 = arith.cmpf ogt, %1010, %1011 : vector<8x8xf32>
    %cst_308 = arith.constant 2.000000e-01 : f32
    %1013 = vector.broadcast %cst_308 : f32 to vector<8x8xf32>
    %1014 = arith.mulf %1013, %1010 : vector<8x8xf32>
    %1015 = arith.select %1012, %1010, %1014 : vector<8x8xi1>, vector<8x8xf32>
    %cst_309 = arith.constant dense<0xFF800000> : vector<8xf32>
    %1016 = vector.multi_reduction <maximumf>, %1015, %cst_309 [1] : vector<8x8xf32> to vector<8xf32>
    %1017 = vector.shape_cast %1016 : vector<8xf32> to vector<8x1xf32>
    %1018 = vector.broadcast %1017 : vector<8x1xf32> to vector<8x8xf32>
    %1019 = arith.subf %1015, %1018 : vector<8x8xf32>
    %1020 = math.exp %1019 : vector<8x8xf32>
    %cst_310 = arith.constant dense<0.000000e+00> : vector<8xf32>
    %1021 = vector.multi_reduction <add>, %1020, %cst_310 [1] : vector<8x8xf32> to vector<8xf32>
    %1022 = vector.shape_cast %1021 : vector<8xf32> to vector<8x1xf32>
    %1023 = tpu.reciprocal %1022 {approx = true} : vector<8x1xf32> -> vector<8x1xf32>
    %cst_311 = arith.constant 1.250000e-01 : f32
    %1024 = vector.broadcast %cst_311 : f32 to vector<8x1xf32>
    %1025 = arith.mulf %1023, %1024 : vector<8x1xf32>
    %cst_312 = arith.constant dense<0.000000e+00> : vector<8x32xf32>
    %1026 = tpu.matmul %1020, %1001, %cst_312 {dimension_numbers = #tpu.dot_dimension_numbers<[1], [0], [0], [1], [0, 0, 1, 1], [], []>} : vector<8x8xf32>, vector<8x32xf32>, vector<8x32xf32> -> vector<8x32xf32>
    %1027 = vector.broadcast %1025 : vector<8x1xf32> to vector<8x32xf32>
    %1028 = arith.mulf %1026, %1027 : vector<8x32xf32>
    %1029 = arith.addf %1000, %1028 : vector<8x32xf32>
    %1030 = vector.extract_strided_slice %853 {offsets = [0, 192], sizes = [8, 32], strides = [1, 1]} : vector<8x256xf32> to vector<8x32xf32>
    %1031 = vector.extract_strided_slice %850 {offsets = [6, 0], sizes = [1, 32], strides = [1, 1]} : vector<8x32xf32> to vector<1x32xf32>
    %1032 = vector.broadcast %1031 : vector<1x32xf32> to vector<8x32xf32>
    %1033 = arith.mulf %1030, %1032 : vector<8x32xf32>
    %cst_313 = arith.constant dense<0.000000e+00> : vector<8xf32>
    %1034 = vector.multi_reduction <add>, %1033, %cst_313 [1] : vector<8x32xf32> to vector<8xf32>
    %1035 = vector.shape_cast %1034 : vector<8xf32> to vector<8x1xf32>
    %1036 = vector.extract_strided_slice %854 {offsets = [6, 0], sizes = [1, 8], strides = [1, 1]} : vector<8x8xf32> to vector<1x8xf32>
    %1037 = vector.broadcast %1035 : vector<8x1xf32> to vector<8x8xf32>
    %1038 = vector.broadcast %1036 : vector<1x8xf32> to vector<8x8xf32>
    %1039 = arith.addf %1037, %1038 : vector<8x8xf32>
    %cst_314 = arith.constant 0.000000e+00 : f32
    %1040 = vector.broadcast %cst_314 : f32 to vector<8x8xf32>
    %1041 = arith.cmpf ogt, %1039, %1040 : vector<8x8xf32>
    %cst_315 = arith.constant 2.000000e-01 : f32
    %1042 = vector.broadcast %cst_315 : f32 to vector<8x8xf32>
    %1043 = arith.mulf %1042, %1039 : vector<8x8xf32>
    %1044 = arith.select %1041, %1039, %1043 : vector<8x8xi1>, vector<8x8xf32>
    %cst_316 = arith.constant dense<0xFF800000> : vector<8xf32>
    %1045 = vector.multi_reduction <maximumf>, %1044, %cst_316 [1] : vector<8x8xf32> to vector<8xf32>
    %1046 = vector.shape_cast %1045 : vector<8xf32> to vector<8x1xf32>
    %1047 = vector.broadcast %1046 : vector<8x1xf32> to vector<8x8xf32>
    %1048 = arith.subf %1044, %1047 : vector<8x8xf32>
    %1049 = math.exp %1048 : vector<8x8xf32>
    %cst_317 = arith.constant dense<0.000000e+00> : vector<8xf32>
    %1050 = vector.multi_reduction <add>, %1049, %cst_317 [1] : vector<8x8xf32> to vector<8xf32>
    %1051 = vector.shape_cast %1050 : vector<8xf32> to vector<8x1xf32>
    %1052 = tpu.reciprocal %1051 {approx = true} : vector<8x1xf32> -> vector<8x1xf32>
    %cst_318 = arith.constant 1.250000e-01 : f32
    %1053 = vector.broadcast %cst_318 : f32 to vector<8x1xf32>
    %1054 = arith.mulf %1052, %1053 : vector<8x1xf32>
    %cst_319 = arith.constant dense<0.000000e+00> : vector<8x32xf32>
    %1055 = tpu.matmul %1049, %1030, %cst_319 {dimension_numbers = #tpu.dot_dimension_numbers<[1], [0], [0], [1], [0, 0, 1, 1], [], []>} : vector<8x8xf32>, vector<8x32xf32>, vector<8x32xf32> -> vector<8x32xf32>
    %1056 = vector.broadcast %1054 : vector<8x1xf32> to vector<8x32xf32>
    %1057 = arith.mulf %1055, %1056 : vector<8x32xf32>
    %1058 = arith.addf %1029, %1057 : vector<8x32xf32>
    %1059 = vector.extract_strided_slice %853 {offsets = [0, 224], sizes = [8, 32], strides = [1, 1]} : vector<8x256xf32> to vector<8x32xf32>
    %1060 = vector.extract_strided_slice %850 {offsets = [7, 0], sizes = [1, 32], strides = [1, 1]} : vector<8x32xf32> to vector<1x32xf32>
    %1061 = vector.broadcast %1060 : vector<1x32xf32> to vector<8x32xf32>
    %1062 = arith.mulf %1059, %1061 : vector<8x32xf32>
    %cst_320 = arith.constant dense<0.000000e+00> : vector<8xf32>
    %1063 = vector.multi_reduction <add>, %1062, %cst_320 [1] : vector<8x32xf32> to vector<8xf32>
    %1064 = vector.shape_cast %1063 : vector<8xf32> to vector<8x1xf32>
    %1065 = vector.extract_strided_slice %854 {offsets = [7, 0], sizes = [1, 8], strides = [1, 1]} : vector<8x8xf32> to vector<1x8xf32>
    %1066 = vector.broadcast %1064 : vector<8x1xf32> to vector<8x8xf32>
    %1067 = vector.broadcast %1065 : vector<1x8xf32> to vector<8x8xf32>
    %1068 = arith.addf %1066, %1067 : vector<8x8xf32>
    %cst_321 = arith.constant 0.000000e+00 : f32
    %1069 = vector.broadcast %cst_321 : f32 to vector<8x8xf32>
    %1070 = arith.cmpf ogt, %1068, %1069 : vector<8x8xf32>
    %cst_322 = arith.constant 2.000000e-01 : f32
    %1071 = vector.broadcast %cst_322 : f32 to vector<8x8xf32>
    %1072 = arith.mulf %1071, %1068 : vector<8x8xf32>
    %1073 = arith.select %1070, %1068, %1072 : vector<8x8xi1>, vector<8x8xf32>
    %cst_323 = arith.constant dense<0xFF800000> : vector<8xf32>
    %1074 = vector.multi_reduction <maximumf>, %1073, %cst_323 [1] : vector<8x8xf32> to vector<8xf32>
    %1075 = vector.shape_cast %1074 : vector<8xf32> to vector<8x1xf32>
    %1076 = vector.broadcast %1075 : vector<8x1xf32> to vector<8x8xf32>
    %1077 = arith.subf %1073, %1076 : vector<8x8xf32>
    %1078 = math.exp %1077 : vector<8x8xf32>
    %cst_324 = arith.constant dense<0.000000e+00> : vector<8xf32>
    %1079 = vector.multi_reduction <add>, %1078, %cst_324 [1] : vector<8x8xf32> to vector<8xf32>
    %1080 = vector.shape_cast %1079 : vector<8xf32> to vector<8x1xf32>
    %1081 = tpu.reciprocal %1080 {approx = true} : vector<8x1xf32> -> vector<8x1xf32>
    %cst_325 = arith.constant 1.250000e-01 : f32
    %1082 = vector.broadcast %cst_325 : f32 to vector<8x1xf32>
    %1083 = arith.mulf %1081, %1082 : vector<8x1xf32>
    %cst_326 = arith.constant dense<0.000000e+00> : vector<8x32xf32>
    %1084 = tpu.matmul %1078, %1059, %cst_326 {dimension_numbers = #tpu.dot_dimension_numbers<[1], [0], [0], [1], [0, 0, 1, 1], [], []>} : vector<8x8xf32>, vector<8x32xf32>, vector<8x32xf32> -> vector<8x32xf32>
    %1085 = vector.broadcast %1083 : vector<8x1xf32> to vector<8x32xf32>
    %1086 = arith.mulf %1084, %1085 : vector<8x32xf32>
    %1087 = arith.addf %1058, %1086 : vector<8x32xf32>
    %1088 = vector.broadcast %852 : vector<1x32xf32> to vector<8x32xf32>
    %1089 = arith.addf %1087, %1088 : vector<8x32xf32>
    %c2_327 = arith.constant 2 : index
    %c0_328 = arith.constant 0 : index
    %c0_329 = arith.constant 0 : index
    %1090 = vector.load %arg7[%c2_327, %c0_328, %c0_329] : memref<3x32x32xf32, #tpu.memory_space<vmem>>, vector<1x32x32xf32>
    %1091 = vector.shape_cast %1090 : vector<1x32x32xf32> to vector<32x32xf32>
    %c2_330 = arith.constant 2 : index
    %c0_331 = arith.constant 0 : index
    %c0_332 = arith.constant 0 : index
    %1092 = vector.load %arg8[%c2_330, %c0_331, %c0_332] : memref<3x1x32xf32, #tpu.memory_space<vmem>>, vector<1x1x32xf32>
    %1093 = vector.shape_cast %1092 : vector<1x1x32xf32> to vector<1x32xf32>
    %c2_333 = arith.constant 2 : index
    %c0_334 = arith.constant 0 : index
    %c0_335 = arith.constant 0 : index
    %1094 = vector.load %arg9[%c2_333, %c0_334, %c0_335] : memref<3x1x32xf32, #tpu.memory_space<vmem>>, vector<1x1x32xf32>
    %1095 = vector.shape_cast %1094 : vector<1x1x32xf32> to vector<1x32xf32>
    %c2_336 = arith.constant 2 : index
    %c0_337 = arith.constant 0 : index
    %c0_338 = arith.constant 0 : index
    %1096 = vector.load %arg10[%c2_336, %c0_337, %c0_338] : memref<3x1x32xf32, #tpu.memory_space<vmem>>, vector<1x1x32xf32>
    %1097 = vector.shape_cast %1096 : vector<1x1x32xf32> to vector<1x32xf32>
    %1098 = arith.addf %1089, %844 : vector<8x32xf32>
    %cst_339 = arith.constant dense<0.000000e+00> : vector<8x32xf32>
    %1099 = tpu.matmul %1098, %1091, %cst_339 {dimension_numbers = #tpu.dot_dimension_numbers<[1], [0], [0], [1], [0, 0, 1, 1], [], []>} : vector<8x32xf32>, vector<32x32xf32>, vector<8x32xf32> -> vector<8x32xf32>
    %1100 = vector.broadcast %1093 : vector<1x32xf32> to vector<8x32xf32>
    %1101 = arith.addf %1099, %1100 : vector<8x32xf32>
    %cst_340 = arith.constant 0.000000e+00 : f32
    %1102 = vector.broadcast %cst_340 : f32 to vector<8x32xf32>
    %1103 = arith.maximumf %1101, %1102 : vector<8x32xf32>
    %1104 = arith.addf %1103, %844 : vector<8x32xf32>
    %cst_341 = arith.constant dense<0.000000e+00> : vector<32xf32>
    %1105 = vector.multi_reduction <add>, %1104, %cst_341 [0] : vector<8x32xf32> to vector<32xf32>
    %1106 = vector.shape_cast %1105 : vector<32xf32> to vector<1x32xf32>
    %cst_342 = arith.constant 8.000000e+00 : f32
    %1107 = vector.broadcast %cst_342 : f32 to vector<1x32xf32>
    %1108 = arith.divf %1106, %1107 : vector<1x32xf32>
    %1109 = vector.broadcast %1108 : vector<1x32xf32> to vector<8x32xf32>
    %1110 = arith.subf %1104, %1109 : vector<8x32xf32>
    %1111 = arith.mulf %1110, %1110 : vector<8x32xf32>
    %cst_343 = arith.constant dense<0.000000e+00> : vector<32xf32>
    %1112 = vector.multi_reduction <add>, %1111, %cst_343 [0] : vector<8x32xf32> to vector<32xf32>
    %1113 = vector.shape_cast %1112 : vector<32xf32> to vector<1x32xf32>
    %cst_344 = arith.constant 8.000000e+00 : f32
    %1114 = vector.broadcast %cst_344 : f32 to vector<1x32xf32>
    %1115 = arith.divf %1113, %1114 : vector<1x32xf32>
    %1116 = vector.broadcast %1108 : vector<1x32xf32> to vector<8x32xf32>
    %1117 = arith.subf %1104, %1116 : vector<8x32xf32>
    %1118 = vector.broadcast %1095 : vector<1x32xf32> to vector<8x32xf32>
    %1119 = arith.mulf %1118, %1117 : vector<8x32xf32>
    %cst_345 = arith.constant 9.99999974E-6 : f32
    %1120 = vector.broadcast %cst_345 : f32 to vector<1x32xf32>
    %1121 = arith.addf %1115, %1120 : vector<1x32xf32>
    %1122 = math.rsqrt %1121 : vector<1x32xf32>
    %1123 = vector.broadcast %1122 : vector<1x32xf32> to vector<8x32xf32>
    %1124 = arith.mulf %1119, %1123 : vector<8x32xf32>
    %1125 = vector.broadcast %1097 : vector<1x32xf32> to vector<8x32xf32>
    %1126 = arith.addf %1124, %1125 : vector<8x32xf32>
    %c0_346 = arith.constant 0 : index
    %c0_347 = arith.constant 0 : index
    %1127 = vector.load %arg11[%c0_346, %c0_347] : memref<1x32xf32, #tpu.memory_space<vmem>>, vector<1x32xf32>
    %1128 = vector.broadcast %1127 : vector<1x32xf32> to vector<8x32xf32>
    %1129 = arith.mulf %1126, %1128 : vector<8x32xf32>
    %cst_348 = arith.constant dense<0.000000e+00> : vector<8xf32>
    %1130 = vector.multi_reduction <add>, %1129, %cst_348 [1] : vector<8x32xf32> to vector<8xf32>
    %1131 = vector.shape_cast %1130 : vector<8xf32> to vector<8x1xf32>
    %cst_349 = arith.constant dense<0.000000e+00> : vector<1x8xf32>
    %1132 = tpu.matmul %1127, %1126, %cst_349 {dimension_numbers = #tpu.dot_dimension_numbers<[1], [1], [0], [0], [0, 0, 1, 0], [], []>} : vector<1x32xf32>, vector<8x32xf32>, vector<1x8xf32> -> vector<1x8xf32>
    %c0_350 = arith.constant 0 : index
    %c0_351 = arith.constant 0 : index
    %1133 = vector.load %arg13[%c0_350, %c0_351] : memref<1x1xf32, #tpu.memory_space<vmem>>, vector<1x1xf32>
    %1134 = vector.broadcast %1133 : vector<1x1xf32> to vector<8x1xf32>
    %1135 = arith.mulf %1131, %1134 : vector<8x1xf32>
    %c0_352 = arith.constant 0 : index
    %c0_353 = arith.constant 0 : index
    %1136 = vector.load %arg12[%c0_352, %c0_353] : memref<1x1xf32, #tpu.memory_space<vmem>>, vector<1x1xf32>
    %1137 = vector.broadcast %1136 : vector<1x1xf32> to vector<1x8xf32>
    %1138 = arith.mulf %1132, %1137 : vector<1x8xf32>
    %1139 = vector.broadcast %1135 : vector<8x1xf32> to vector<8x8xf32>
    %1140 = vector.broadcast %1138 : vector<1x8xf32> to vector<8x8xf32>
    %1141 = arith.addf %1139, %1140 : vector<8x8xf32>
    %cst_354 = arith.constant 0.000000e+00 : f32
    %1142 = vector.broadcast %cst_354 : f32 to vector<8x8xf32>
    %1143 = arith.cmpf ogt, %1141, %1142 : vector<8x8xf32>
    %cst_355 = arith.constant 2.000000e-01 : f32
    %1144 = vector.broadcast %cst_355 : f32 to vector<8x8xf32>
    %1145 = arith.mulf %1144, %1141 : vector<8x8xf32>
    %1146 = arith.select %1143, %1141, %1145 : vector<8x8xi1>, vector<8x8xf32>
    %cst_356 = arith.constant dense<0xFF800000> : vector<8xf32>
    %1147 = vector.multi_reduction <maximumf>, %1146, %cst_356 [1] : vector<8x8xf32> to vector<8xf32>
    %1148 = vector.shape_cast %1147 : vector<8xf32> to vector<8x1xf32>
    %1149 = vector.broadcast %1148 : vector<8x1xf32> to vector<8x8xf32>
    %1150 = arith.subf %1146, %1149 : vector<8x8xf32>
    %1151 = math.exp %1150 : vector<8x8xf32>
    %cst_357 = arith.constant dense<0.000000e+00> : vector<8xf32>
    %1152 = vector.multi_reduction <add>, %1151, %cst_357 [1] : vector<8x8xf32> to vector<8xf32>
    %1153 = vector.shape_cast %1152 : vector<8xf32> to vector<8x1xf32>
    %1154 = tpu.reciprocal %1153 {approx = true} : vector<8x1xf32> -> vector<8x1xf32>
    %1155 = vector.broadcast %1132 : vector<1x8xf32> to vector<8x8xf32>
    %1156 = arith.mulf %1151, %1155 : vector<8x8xf32>
    %cst_358 = arith.constant dense<0.000000e+00> : vector<8xf32>
    %1157 = vector.multi_reduction <add>, %1156, %cst_358 [1] : vector<8x8xf32> to vector<8xf32>
    %1158 = vector.shape_cast %1157 : vector<8xf32> to vector<8x1xf32>
    %1159 = arith.mulf %1158, %1154 : vector<8x1xf32>
    %c0_359 = arith.constant 0 : index
    %c0_360 = arith.constant 0 : index
    %1160 = vector.load %arg14[%c0_359, %c0_360] : memref<1x1xf32, #tpu.memory_space<vmem>>, vector<1x1xf32>
    %1161 = vector.broadcast %1160 : vector<1x1xf32> to vector<8x1xf32>
    %1162 = arith.addf %1159, %1161 : vector<8x1xf32>
    %c0_361 = arith.constant 0 : index
    %c0_362 = arith.constant 0 : index
    %1163 = vector.load %arg19[%c0_361, %c0_362] : memref<8x1xf32, #tpu.memory_space<vmem>>, vector<8x1xf32>
    tpu.vector_store %arg19[%c0_361, %c0_362], %1162 {strides = array<i32>} : memref<8x1xf32, #tpu.memory_space<vmem>>, vector<8x1xf32>,
    %cst_363 = arith.constant dense<0.000000e+00> : vector<32xf32>
    %1164 = vector.multi_reduction <add>, %1126, %cst_363 [0] : vector<8x32xf32> to vector<32xf32>
    %1165 = vector.shape_cast %1164 : vector<32xf32> to vector<1x32xf32>
    %cst_364 = arith.constant 8.000000e+00 : f32
    %1166 = vector.broadcast %cst_364 : f32 to vector<1x32xf32>
    %1167 = arith.divf %1165, %1166 : vector<1x32xf32>
    %c0_365 = arith.constant 0 : index
    %c0_366 = arith.constant 0 : index
    %1168 = vector.load %arg15[%c0_365, %c0_366] : memref<32x32xf32, #tpu.memory_space<vmem>>, vector<32x32xf32>
    %cst_367 = arith.constant dense<0.000000e+00> : vector<1x32xf32>
    %1169 = tpu.matmul %1167, %1168, %cst_367 {dimension_numbers = #tpu.dot_dimension_numbers<[1], [0], [0], [1], [0, 0, 1, 1], [], []>} : vector<1x32xf32>, vector<32x32xf32>, vector<1x32xf32> -> vector<1x32xf32>
    %c0_368 = arith.constant 0 : index
    %c0_369 = arith.constant 0 : index
    %1170 = vector.load %arg16[%c0_368, %c0_369] : memref<1x32xf32, #tpu.memory_space<vmem>>, vector<1x32xf32>
    %1171 = arith.addf %1169, %1170 : vector<1x32xf32>
    %cst_370 = arith.constant 0.000000e+00 : f32
    %1172 = vector.broadcast %cst_370 : f32 to vector<1x32xf32>
    %1173 = arith.maximumf %1171, %1172 : vector<1x32xf32>
    %c0_371 = arith.constant 0 : index
    %c0_372 = arith.constant 0 : index
    %1174 = vector.load %arg17[%c0_371, %c0_372] : memref<32x1xf32, #tpu.memory_space<vmem>>, vector<32x1xf32>
    %cst_373 = arith.constant dense<0.000000e+00> : vector<1x1xf32>
    %1175 = tpu.matmul %1173, %1174, %cst_373 {dimension_numbers = #tpu.dot_dimension_numbers<[1], [0], [0], [1], [0, 0, 1, 1], [], []>} : vector<1x32xf32>, vector<32x1xf32>, vector<1x1xf32> -> vector<1x1xf32>
    %c0_374 = arith.constant 0 : index
    %c0_375 = arith.constant 0 : index
    %1176 = vector.load %arg18[%c0_374, %c0_375] : memref<1x1xf32, #tpu.memory_space<vmem>>, vector<1x1xf32>
    %1177 = arith.addf %1175, %1176 : vector<1x1xf32>
    %c0_376 = arith.constant 0 : index
    %c0_377 = arith.constant 0 : index
    %1178 = vector.load %arg20[%c0_376, %c0_377] : memref<1x1xf32, #tpu.memory_space<vmem>>, vector<1x1xf32>
    tpu.vector_store %arg20[%c0_376, %c0_377], %1177 {strides = array<i32>} : memref<1x1xf32, #tpu.memory_space<vmem>>, vector<1x1xf32>,
    return
  }
}

</mosaic_0001>

<bundles_post_ra>
// kernel: tpu_custom_call.1
= control target key start
LH: loop header
LB: loop body
LE: loop exit
PB: predicated region body
PF: predicated region fallthrough
CT: control target
= control target key end

     0   :  { %s6630_s0 = inlined_call_operand.vmem [shape: f32[8,4], index: 0, kind: input, shape index: {}]   ;;  %s6631_s1 = inlined_call_operand.vmem [shape: f32[4,32], index: 1, kind: input, shape index: {}]   ;;  %s6632_s2 = inlined_call_operand.hbm [shape: f32[1,32], index: 2, kind: input, shape index: {}]   ;;  %s6633_s3 = inlined_call_operand.hbm [shape: f32[3,32,256], index: 3, kind: input, shape index: {}]   ;;  %s6634_s4 = inlined_call_operand.vmem [shape: f32[3,8,256], index: 4, kind: input, shape index: {}]   ;;  %s6635_s5 = inlined_call_operand.hbm [shape: f32[3,8,32], index: 5, kind: input, shape index: {}]   ;;  %s6636_s6 = inlined_call_operand.vmem [shape: f32[3,1,32], index: 6, kind: input, shape index: {}]   ;;  %s6637_s7 = inlined_call_operand.hbm [shape: f32[3,32,32], index: 7, kind: input, shape index: {}]   ;;  %s6638_s8 = inlined_call_operand.vmem [shape: f32[3,1,32], index: 8, kind: input, shape index: {}]   ;;  %s6639_s9 = inlined_call_operand.vmem [shape: f32[3,1,32], index: 9, kind: input, shape index: {}]   ;;  %s6640_s10 = inlined_call_operand.vmem [shape: f32[3,1,32], index: 10, kind: input, shape index: {}]   ;;  %s6641_s11 = inlined_call_operand.vmem [shape: f32[1,32], index: 11, kind: input, shape index: {}]   ;;  %s6642_s12 = inlined_call_operand.<no memory space> [shape: f32[1,1], index: 12, kind: input, shape index: {}]   ;;  %s6643_s15 = inlined_call_operand.hbm [shape: f32[32,32], index: 15, kind: input, shape index: {}]   ;;  %s6644_s16 = inlined_call_operand.vmem [shape: f32[1,32], index: 16, kind: input, shape index: {}]   ;;  %s6645_s17 = inlined_call_operand.vmem [shape: f32[32,1], index: 17, kind: input, shape index: {}]   ;;  %s6646_s19 = inlined_call_operand.vmem [shape: f32[8,1], index: 19, kind: output, shape index: {0}]   ;;  %s6647_s20 = inlined_call_operand.hbm [shape: f32[1,1], index: 20, kind: output, shape index: {1}]   ;;  %s6648_s13 = inlined_call_operand.<no memory space> [shape: f32[1,1], index: 13, kind: input, shape index: {}]   ;;  %s6649_s14 = inlined_call_operand.<no memory space> [shape: f32[1,1], index: 14, kind: input, shape index: {}]   ;;  %s6650_s18 = inlined_call_operand.<no memory space> [shape: f32[1,1], index: 18, kind: input, shape index: {}]  }
   0x1   :  { %6652 = sst [smem:[#allocation20_spill]] %s6630_s0  ;;  %v26_v0 = vstv %s6642_s12  ;;  %v28_v1 = vstv %s6648_s13  ;;  %v30_v2 = vstv %s6649_s14  ;;  %v32_v3 = vstv %s6650_s18 }
   0x2   :  { %6653 = sst [smem:[#allocation21_spill]] %s6631_s1  ;;  %27 = vst [vmem:[#allocation2] sm:$0x1] %v26_v0  ;;  %29 = vst [vmem:[#allocation3] sm:$0x1] %v28_v1 }
   0x3   :  { %6654 = sst [smem:[#allocation22_spill]] %s6632_s2  ;;  %31 = vst [vmem:[#allocation4] sm:$0x1] %v30_v2  ;;  %33 = vst [vmem:[#allocation5] sm:$0x1] %v32_v3 }
   0x4   :  { %6655 = sst [smem:[#allocation23_spill]] %s6633_s3 }
   0x5   :  { %6656 = sst [smem:[#allocation24_spill]] %s6634_s4 }
   0x6   :  { %34 = vsyncpa [#allocation7], 0 }
   0x7   :  { %35 = vsyncpa [#allocation10], 0 }
   0x8   :  { %36 = vsyncpa [#allocation13], 0 }
   0x9   :  { %37 = vsyncpa [#allocation8], 0  ;;  %s5706_s12 = smov [#allocation9]  }
   0xa   :  { %s57_s27 = sshll.u32 %s5706_s12, 4  ;;  %s58_s27 = int_to_ptr.vmem [resolvable:$true] %s57_s27 }
   0xb   :  { %s5586_s13 = scalar_lea.vmem %s58_s27, 3072  ;;  %p5591_p1 = scmp.lt.s32.totalorder %s58_s27, %s58_s27 }
   0xc   :  { %p5587_p0 = scmp.ne.s32.totalorder %s58_s27, %s5586_s13  ;;  %p5592_p2 = scmp.lt.s32.totalorder %s5586_s13, %s5586_s13 }
   0xe   :  { %p5593_p3 = por %p5592_p2, %p5591_p1 }
  0x10   :  { %p5594_p4 = pnand %p5593_p3, %p5587_p0 }
  0x12   :  { %5597 = shalt.err (!%p5594_p4)
}
  0x13   :  { %s5707_s14 = smov 256   ;;  %s5708_s18 = smov 16  }
  0x14   :  { %s6657_s29 = sld [smem:[#allocation23_spill]]  ;;  %s5709_s30 = smov [#allocation12]  }
  0x15   :  { %s85_s0 = sshll.u32 %s5709_s30, 4  ;;  %s5710_s21 = smov [#allocation6]   ;;  %s86_s0 = int_to_ptr.vmem [resolvable:$true] %s85_s0 }
  0x16   :  { %s48_s1 = sshll.u32 %s5710_s21, 4  ;;  %s5606_s22 = scalar_lea.vmem %s86_s0, 1536  ;;  %s49_s1 = int_to_ptr.vmem [resolvable:$true] %s48_s1 }
  0x17   :  { %p5607_p5 = scmp.ne.s32.totalorder %s86_s0, %s5606_s22  ;;  %p5611_p6 = scmp.lt.s32.totalorder %s86_s0, %s86_s0 }
  0x18   :  { %p5612_p7 = scmp.lt.s32.totalorder %s5606_s22, %s5606_s22 }
  0x1a   :  { %63 = dma.hbm_to_vmem [thread:$0]  %s6657_s29, 3072, %s58_s27, [#allocation10], %s5707_s14, %s5707_s14, %s5708_s18  }
  0x1b   :  { %p5613_p8 = por %p5612_p7, %p5611_p6 }
  0x1d   :  { %p5614_p9 = pnand %p5613_p8, %p5607_p5 }
  0x1f   :  { %5617 = shalt.err (!%p5614_p9)
}
  0x20   :  { %s5711_s23 = smov 128   ;;  %s5712_s24 = smov 8  }
  0x21   :  { %91 = dma.hbm_to_vmem [thread:$0]  %s6637_s7, 1536, %s86_s0, [#allocation13], %s5711_s23, %s5711_s23, %s5712_s24  }
  0x22   :  { %s5626_s3 = scalar_lea.vmem %s49_s1, 16  ;;  %s5630_s26 = scalar_lea.vmem %s49_s1, 32 }
  0x23   :  { %p5627_p10 = scmp.ne.s32.totalorder %s49_s1, %s5626_s3  ;;  %p5631_p11 = scmp.lt.s32.totalorder %s49_s1, %s49_s1 }
  0x24   :  { %p5632_p12 = scmp.lt.s32.totalorder %s5630_s26, %s5626_s3 }
  0x26   :  { %p5633_p13 = por %p5632_p12, %p5631_p11 }
  0x28   :  { %p5634_p0 = pnand %p5633_p13, %p5627_p10 }
  0x2a   :  { %5637 = shalt.err (!%p5634_p0)
}
  0x2b   :  { %s6658_s13 = sld [smem:[#allocation22_spill]]  ;;  %s5713_s14 = smov [#allocation11]  }
  0x2c   :  { %s71_s18 = sshll.u32 %s5713_s14, 4  ;;  %s5714_s28 = smov [#allocation14]   ;;  %s72_s18 = int_to_ptr.vmem [resolvable:$true] %s71_s18 }
  0x2d   :  { %s111_s4 = sshll.u32 %s5714_s28, 4  ;;  %s5646_s29 = scalar_lea.vmem %s72_s18, 384  ;;  %s112_s4 = int_to_ptr.vmem [resolvable:$true] %s111_s4 }
  0x2e   :  { %p5647_p1 = scmp.ne.s32.totalorder %s72_s18, %s5646_s29  ;;  %p5651_p2 = scmp.lt.s32.totalorder %s72_s18, %s72_s18 }
  0x2f   :  { %p5652_p3 = scmp.lt.s32.totalorder %s5646_s29, %s5646_s29 }
  0x31   :  { %51 = dma.hbm_to_vmem [thread:$0]  %s6658_s13, 16, %s49_s1, [#allocation7]  }
  0x32   :  { %p5653_p4 = por %p5652_p3, %p5651_p2 }
  0x34   :  { %p5654_p5 = pnand %p5653_p4, %p5647_p1 }
  0x36   :  { %5657 = shalt.err (!%p5654_p5)
}
  0x37   :  { %77 = dma.hbm_to_vmem [thread:$0]  %s6635_s5, 384, %s72_s18, [#allocation10], %s5711_s23, %s5711_s23, %s5712_s24  }
  0x38   :  { %s5666_s0 = scalar_lea.vmem %s112_s4, 512  ;;  %p5671_p7 = scmp.lt.s32.totalorder %s112_s4, %s112_s4 }
  0x39   :  { %p5667_p6 = scmp.ne.s32.totalorder %s112_s4, %s5666_s0  ;;  %p5672_p8 = scmp.lt.s32.totalorder %s5666_s0, %s5666_s0 }
  0x3b   :  { %p5673_p9 = por %p5672_p8, %p5671_p7 }
  0x3d   :  { %p5674_p10 = pnand %p5673_p9, %p5667_p6 }
  0x3f   :  { %5677 = shalt.err (!%p5674_p10)
}
  0x40   :  { %117 = dma.hbm_to_vmem [thread:$0]  %s6643_s15, 512, %s112_s4, [#allocation13], %s5711_s23, %s5711_s23, %s5712_s24  }
  0x41   :  { %5698 = dma.done.wait [#allocation7], 16  }
  0x42   :  { %5699 = vsyncadd [#allocation7], 4294967280 }
  0x43   :  { %5700 = dma.done.wait [#allocation10], 3456  }
  0x44   :  { %5701 = vsyncadd [#allocation10], 4294963840 }
  0x45   :  { %5702 = dma.done.wait [#allocation13], 2048  }
  0x46   :  { %5703 = vsyncadd [#allocation13], 4294965248  ;;  %v5715_v4 = vmov 0   ;;  %v5716_v5 = vmov 2   ;;  %s6659_s2 = sld [smem:[#allocation20_spill]]  ;;  %v5717_v7 = vmov 1   ;;  %v146_v11 = vlaneseq }
  0x47   :  { %5434 = vset.pattern.permute.xlu0 %v5715_v4  ;;  %5436 = vset.pattern.permute.xlu1 %v5716_v5  ;;  %v5718_v8 = vmov 3   ;;  %v5869_v9 = vld [vmem:[#allocation9 + $0x38] sm:$0xff]  ;;  %v5872_v10 = vld [vmem:[#allocation9 + $0x30] sm:$0xff]  ;;  %v5875_v12 = vld [vmem:[#allocation9 + $0x28] sm:$0xff]  ;;  %v5719_v18 = vmov 0.0   ;;  %s5720_s15 = smov 32  }
  0x48   :  { %232 = vmatprep.subr.mxu0 %v5869_v9  ;;  %v5878_v13 = vld [vmem:[#allocation9 + $0x20] sm:$0xff]  ;;  %v5881_v14 = vld [vmem:[#allocation9 + $0x18] sm:$0xff]  ;;  %v5883_v15 = vld [vmem:[#allocation9 + $0x10] sm:$0xff]  ;;  %272 = vmatprep.mubr.f32.mxu0 %v5719_v18  ;;  %v5891_v19 = vshrl.u32 %v146_v11, 7  ;;  %s5721_s23 = smov 64   ;;  %s5722_s24 = smov 96  }
  0x49   :  { %233 = vmatpush1.msra.mxu0 %v5872_v10  ;;  %v5885_v16 = vld [vmem:[#allocation9 + $0x8] sm:$0xff]  ;;  %v5888_v17 = vld [vmem:[#allocation9] sm:$0xff]  ;;  %s6660_s26 = sld [smem:[#allocation21_spill]]  ;;  %v5034_v49 = vld [vmem:[#allocation6] ss:$0 sm:$0xff]  ;;  %vm204_vm1 = vcmask 261120  }
  0x4a   :  { %234 = vmatprep.subr.mxu0 %v5875_v12  ;;  %v5896_v20 = vsub.s32 2, %v5891_v19  ;;  %v5899_v21 = vsub.s32 1, %v5891_v19  ;;  %v5902_v22 = vld [vmem:[#allocation11] sm:$0xff]  ;;  %v5905_v23 = vsub.s32 5, %v5891_v19  ;;  %v5909_v24 = vsub.s32 3, %v5891_v19  ;;  %s6661_s13 = sld [smem:[#allocation24_spill]] }
  0x4b   :  { %235 = vmatpush1.msra.mxu0 %v5878_v13  ;;  %v5922_v29 = vsub.s32 6, %v5891_v19  ;;  %v5925_v30 = vsub.s32 7, %v5891_v19  ;;  %v5936_v33 = vsub.s32 0, %v5891_v19  ;;  %vm365_vm3 = vcmask 64512  }
  0x4c   :  { %v139_v6 = vld [vmem:[%s6659_s2] sm:$0xff]  ;;  %236 = vmatprep.subr.mxu0 %v5881_v14  ;;  %v455_v25 = vrot.slane %v5902_v22, %v5899_v21  ;;  %v569_v26 = vrot.slane %v5902_v22, %v5896_v20  ;;  %v682_v27 = vrot.slane %v5902_v22, %v5909_v24  ;;  %v897_v28 = vrot.slane %v5902_v22, %v5905_v23 }
  0x4d   :  { %143 = vperm.xlu0 %5434, %v139_v6   ;;  %162 = vperm.xlu1 %5436, %v139_v6   ;;  %v1011_v31 = vrot.slane %v5902_v22, %v5922_v29  ;;  %v1124_v32 = vrot.slane %v5902_v22, %v5925_v30  ;;  %v6001_v11 = vrot.slane %v5902_v22, %v5936_v33  ;;  %vm5723_vm5 = vmmov 0  }
  0x4e   :  { %237 = vmatpush1.msra.mxu0 %v5883_v15 }
  0x4f   :  { %238 = vmatprep.subr.mxu0 %v5885_v16  ;;  %v140_v34 = vld [vmem:[%s6660_s26] sm:$0xf] }
  0x50   :  { %239 = vmatpush1.msra.mxu0 %v5888_v17  ;;  %v149_v37 = vrot.slane %v140_v34, %v5936_v33  ;;  %v158_v38 = vrot.slane %v140_v34, %v5899_v21  ;;  %v168_v39 = vrot.slane %v140_v34, %v5896_v20  ;;  %v178_v40 = vrot.slane %v140_v34, %v5909_v24  ;;  %v5949_v54 = vld [vmem:[%s6661_s13 + $0x8] sm:$0xff]  ;;  %v5970_v63 = vld [vmem:[%s6661_s13] sm:$0xff] }
  0x51   :  { %5435 = vset.pattern.permute.xlu0 %v5717_v7  ;;  %5437 = vset.pattern.permute.xlu1 %v5718_v8 }
  0x52   :  { %152 = vperm.xlu0 %5435, %v139_v6   ;;  %172 = vperm.xlu1 %5437, %v139_v6   ;;  %v5991_v6 = vsub.s32 4, %v5891_v19 }
  0x53   :  { %5200 = vmatprep.subr.mxu0 %v5719_v18  ;;  %343 = vmatprep.mubr.f32.mxu1 %v5949_v54 }
  0x54   :  { %v5995_v7 = vrot.slane %v5902_v22, %v5991_v6 }
  0x56   :  { %5438 = vset.pattern.permute.xlu1 %v5715_v4  ;;  %5439 = vset.pattern.permute.xlu0 %v5715_v4 }
  0x57   :  { %457 = vrot.lane.b32.xlu1 %v455_v25, %s5720_s15  ;;  %571 = vrot.lane.b32.xlu0 %v569_v26, %s5721_s23 }
  0x5b   :  { %684 = vrot.lane.b32.xlu1 %v682_v27, %s5722_s24  ;;  %899 = vrot.lane.b32.xlu0 %v897_v28, %s5720_s15 }
  0x5f   :  { %1013 = vrot.lane.b32.xlu1 %v1011_v31, %s5721_s23  ;;  %1126 = vrot.lane.b32.xlu0 %v1124_v32, %s5722_s24 }
  0xc8   :  { %v144_v35 = vpop.permute.xlu0 %143  ;;  %v163_v36 = vpop.permute.xlu1 %162 }
  0xc9   :  { %v150_v43 = vmul.f32 %v149_v37, %v144_v35  ;;  %v169_v45 = vmul.f32 %v168_v39, %v163_v36 }
  0xcd   :  { %v153_v41 = vpop.permute.xlu0 %152  ;;  %v173_v42 = vpop.permute.xlu1 %172 }
  0xce   :  { %v159_v44 = vmul.f32 %v158_v38, %v153_v41  ;;  %v179_v47 = vmul.f32 %v178_v40, %v173_v42 }
  0xd0   :  { %v160_v46 = vadd.f32 %v159_v44, %v150_v43 }
  0xd1   :  { %v5952_v55 = vpop.permute.xlu1 %457  ;;  %v5954_v56 = vpop.permute.xlu0 %571 }
  0xd2   :  { %v170_v48 = vadd.f32 %v169_v45, %v160_v46 }
  0xd4   :  { %v180_v50 = vadd.f32 %v179_v47, %v170_v48 }
  0xd5   :  { %v5956_v57 = vpop.permute.xlu1 %684  ;;  %v5958_v59 = vpop.permute.xlu0 %899 }
  0xd6   :  { %v188_v51 = vadd.f32 %v5034_v49, %v180_v50 }
  0xd8   :  { %vm189_vm0 = vcmp.gt.f32.partialorder %v188_v51, 0.0  ;;  %v190_v52 = vmul.f32 0.01, %v188_v51 }
  0xd9   :  { %v5974_v1 = vpop.permute.xlu1 %1013  ;;  %v5978_v3 = vpop.permute.xlu0 %1126 }
  0xda   :  { %v191_v53 = vsel %vm189_vm0, %v188_v51, %v190_v52 }
  0xdb   :  { %5035 = vmatmul.mubr.msk.f32.vlgmr.msra.gmra.mxu0 %vm204_vm1, %v191_v53 }
  0xdc   :  { %5202 = vmatprep.mubr.msk.f32.mxu0 %vm5723_vm5, %v5719_v18 }
 0x19b   :  { %v274_v58 = vpop.f32.mrf.mxu0 }
 0x19c   :  { %v460_v60 = vmul.f32 %v5952_v55, %v274_v58  ;;  %v574_v61 = vmul.f32 %v5954_v56, %v274_v58  ;;  %v687_v0 = vmul.f32 %v5956_v57, %v274_v58  ;;  %v353_v26 = vmul.f32 %v6001_v11, %v274_v58 }
 0x19d   :  { %v5962_v62 = vpop.f32.mrf.mxu0 }
 0x19e   :  { %462 = vrot.lane.b32.xlu1 %v460_v60, %s5722_s24  ;;  %309 = vmatprep.subr.mxu1 %v5962_v62  ;;  %v902_v2 = vmul.f32 %v5958_v59, %v5962_v62  ;;  %v1016_v4 = vmul.f32 %v5974_v1, %v5962_v62  ;;  %v1129_v5 = vmul.f32 %v5978_v3, %v5962_v62  ;;  %v354_v27 = vsel %vm204_vm1, %v353_v26, 0.0 }
 0x19f   :  { %576 = vrot.lane.b32.xlu0 %v574_v61, %s5721_s23  ;;  %310 = vmatpush1.xpose.msra.mxu1 %v274_v58  ;;  %v796_v8 = vmul.f32 %v5995_v7, %v5962_v62 }
 0x1a0   :  { %5195 = vmatprep.subr.mxu1 %v5719_v18 }
 0x1a1   :  { %v797_v25 = vsel %vm204_vm1, %v796_v8, 0.0 }
 0x1a2   :  { %689 = vrot.lane.b32.xlu1 %v687_v0, %s5720_s15  ;;  %344 = vmatmul.mubr.f32.vlgmr.msra.gmra.mxu1 %v5970_v63 }
 0x1a3   :  { %904 = vrot.lane.b32.xlu0 %v902_v2, %s5722_s24  ;;  %5196 = vmatpush3.msra.mxu1 %v274_v58 }
 0x1a4   :  { %5205 = vmatprep.subr.mxu1 %v5719_v18  ;;  %5197 = vmatprep.mubr.msk.f32.mxu1 %vm5723_vm5, %v5719_v18 }
 0x1a6   :  { %1018 = vrot.lane.b32.xlu1 %v1016_v4, %s5721_s23 }
 0x1a7   :  { %1131 = vrot.lane.b32.xlu0 %v1129_v5, %s5720_s15 }
 0x1c6   :  { %798 = vadd.xlane.f32.xlu0 %v797_v25 }
 0x1ca   :  { %355 = vadd.xlane.f32.xlu1 %v354_v27 }
 0x210   :  { %v463_v19 = vpop.permute.xlu1 %462 }
 0x211   :  { %v577_v28 = vpop.permute.xlu0 %576  ;;  %v465_v31 = vsel %vm204_vm1, %v463_v19, 0.0 }
 0x212   :  { %466 = vadd.xlane.f32.xlu0 %v465_v31  ;;  %v579_v22 = vsel %vm204_vm1, %v577_v28, 0.0 }
 0x214   :  { %v690_v32 = vpop.permute.xlu1 %689 }
 0x215   :  { %v905_v34 = vpop.permute.xlu0 %904  ;;  %v692_v35 = vsel %vm204_vm1, %v690_v32, 0.0 }
 0x216   :  { %693 = vadd.xlane.f32.xlu1 %v692_v35  ;;  %580 = vadd.xlane.f32.xlu0 %v579_v22  ;;  %v907_v38 = vsel %vm204_vm1, %v905_v34, 0.0 }
 0x218   :  { %v1019_v36 = vpop.permute.xlu1 %1018 }
 0x219   :  { %v1021_v37 = vsel %vm204_vm1, %v1019_v36, 0.0  ;;  %v1132_v39 = vpop.permute.xlu0 %1131 }
 0x21a   :  { %1022 = vadd.xlane.f32.xlu0 %v1021_v37  ;;  %908 = vadd.xlane.f32.xlu1 %v907_v38  ;;  %v1134_v40 = vsel %vm204_vm1, %v1132_v39, 0.0 }
 0x21e   :  { %1135 = vadd.xlane.f32.xlu1 %v1134_v40 }
 0x22f   :  { %601 = vrot.lane.b32.xlu1 %v274_v58, %s5721_s23 }
 0x230   :  { %488 = vrot.lane.b32.xlu0 %v274_v58, %s5722_s24 }
 0x233   :  { %714 = vrot.lane.b32.xlu1 %v274_v58, %s5720_s15 }
 0x24f   :  { %v799_v42 = vpop.xlane.xlu0 %798 }
 0x253   :  { %v356_v45 = vpop.xlane.xlu1 %355 }
 0x262   :  { %v6015_v41 = vpop.f32.mrf.mxu1 }
 0x263   :  { %v360_v43 = vrot.slane %v6015_v41, %v5936_v33  ;;  %v803_v44 = vrot.slane %v6015_v41, %v5991_v6  ;;  %v471_v60 = vrot.slane %v6015_v41, %v5899_v21  ;;  %v698_v2 = vrot.slane %v6015_v41, %v5909_v24 }
 0x264   :  { %v347_v46 = vpop.f32.mrf.mxu1  ;;  %v585_v4 = vrot.slane %v6015_v41, %v5896_v20  ;;  %v913_v31 = vrot.slane %v6015_v41, %v5905_v23 }
 0x265   :  { %v361_v47 = vadd.f32 %v360_v43, %v356_v45  ;;  %v804_v48 = vadd.f32 %v803_v44, %v799_v42  ;;  %v1140_v42 = vrot.slane %v6015_v41, %v5925_v30 }
 0x267   :  { %vm362_vm2 = vcmp.gt.f32.partialorder %v361_v47, 0.0  ;;  %v363_v49 = vmul.f32 0.2, %v361_v47  ;;  %v806_v50 = vmul.f32 0.2, %v804_v48  ;;  %vm805_vm4 = vcmp.gt.f32.partialorder %v804_v48, 0.0 }
 0x269   :  { %v6021_v51 = vsel %vm362_vm2, %v361_v47, %v363_v49  ;;  %v6025_v53 = vsel %vm805_vm4, %v804_v48, %v806_v50 }
 0x26a   :  { %v366_v52 = vsel %vm365_vm3, %v6021_v51, -inf  ;;  %v808_v58 = vsel %vm365_vm3, %v6025_v53, -inf }
 0x26b   :  { %367 = vmax.xlane.f32.xlu0 %v366_v52 }
 0x26f   :  { %809 = vmax.xlane.f32.xlu0 %v808_v58  ;;  %v1027_v58 = vrot.slane %v6015_v41, %v5922_v29 }
 0x29b   :  { %v467_v61 = vpop.xlane.xlu0 %466 }
 0x29c   :  { %v472_v0 = vadd.f32 %v471_v60, %v467_v61 }
 0x29e   :  { %vm473_vm6 = vcmp.gt.f32.partialorder %v472_v0, 0.0  ;;  %v474_v5 = vmul.f32 0.2, %v472_v0 }
 0x29f   :  { %v694_v8 = vpop.xlane.xlu1 %693  ;;  %v581_v25 = vpop.xlane.xlu0 %580 }
 0x2a0   :  { %v699_v26 = vadd.f32 %v698_v2, %v694_v8  ;;  %v586_v27 = vadd.f32 %v585_v4, %v581_v25  ;;  %v475_v19 = vsel %vm473_vm6, %v472_v0, %v474_v5 }
 0x2a1   :  { %v476_v28 = vsel %vm365_vm3, %v475_v19, -inf }
 0x2a2   :  { %477 = vmax.xlane.f32.xlu1 %v476_v28  ;;  %vm700_vm7 = vcmp.gt.f32.partialorder %v699_v26, 0.0  ;;  %v701_v32 = vmul.f32 0.2, %v699_v26  ;;  %vm587_vm8 = vcmp.gt.f32.partialorder %v586_v27, 0.0  ;;  %v588_v34 = vmul.f32 0.2, %v586_v27 }
 0x2a3   :  { %v909_v35 = vpop.xlane.xlu1 %908  ;;  %v1023_v22 = vpop.xlane.xlu0 %1022 }
 0x2a4   :  { %v914_v36 = vadd.f32 %v913_v31, %v909_v35  ;;  %v702_v37 = vsel %vm700_vm7, %v699_v26, %v701_v32  ;;  %v589_v38 = vsel %vm587_vm8, %v586_v27, %v588_v34  ;;  %v1028_v60 = vadd.f32 %v1027_v58, %v1023_v22 }
 0x2a5   :  { %v703_v39 = vsel %vm365_vm3, %v702_v37, -inf  ;;  %v590_v40 = vsel %vm365_vm3, %v589_v38, -inf }
 0x2a6   :  { %704 = vmax.xlane.f32.xlu1 %v703_v39  ;;  %591 = vmax.xlane.f32.xlu0 %v590_v40  ;;  %vm915_vm9 = vcmp.gt.f32.partialorder %v914_v36, 0.0  ;;  %v916_v43 = vmul.f32 0.2, %v914_v36  ;;  %v1030_v61 = vmul.f32 0.2, %v1028_v60  ;;  %vm1029_vm11 = vcmp.gt.f32.partialorder %v1028_v60, 0.0 }
 0x2a7   :  { %v1136_v44 = vpop.xlane.xlu1 %1135  ;;  %v489_v45 = vpop.permute.xlu0 %488 }
 0x2a8   :  { %v1141_v46 = vadd.f32 %v1140_v42, %v1136_v44  ;;  %5201 = vmatpush3.msra.mxu0 %v489_v45  ;;  %v917_v47 = vsel %vm915_vm9, %v914_v36, %v916_v43  ;;  %v6055_v0 = vsel %vm1029_vm11, %v1028_v60, %v1030_v61 }
 0x2a9   :  { %v918_v48 = vsel %vm365_vm3, %v917_v47, -inf  ;;  %5210 = vmatprep.subr.mxu0 %v5719_v18  ;;  %v1032_v2 = vsel %vm365_vm3, %v6055_v0, -inf }
 0x2aa   :  { %919 = vmax.xlane.f32.xlu1 %v918_v48  ;;  %vm1142_vm10 = vcmp.gt.f32.partialorder %v1141_v46, 0.0  ;;  %v1143_v49 = vmul.f32 0.2, %v1141_v46 }
 0x2ab   :  { %v602_v26 = vpop.permute.xlu1 %601 }
 0x2ac   :  { %v1144_v50 = vsel %vm1142_vm10, %v1141_v46, %v1143_v49 }
 0x2ad   :  { %v1145_v52 = vsel %vm365_vm3, %v1144_v50, -inf }
 0x2ae   :  { %1146 = vmax.xlane.f32.xlu1 %v1145_v52 }
 0x2af   :  { %v715_v27 = vpop.permute.xlu1 %714 }
 0x2bc   :  { %930 = vrot.lane.b32.xlu0 %v5962_v62, %s5722_s24 }
 0x2bf   :  { %1043 = vrot.lane.b32.xlu1 %v5962_v62, %s5721_s23 }
 0x2db   :  { %1033 = vmax.xlane.f32.xlu0 %v1032_v2 }
 0x2f1   :  { %1156 = vrot.lane.b32.xlu0 %v5962_v62, %s5720_s15 }
 0x2f4   :  { %v368_v4 = vpop.xlane.xlu0 %367 }
 0x2f5   :  { %v369_v5 = vsub.f32 %v6021_v51, %v368_v4 }
 0x2f7   :  { %v370_v8 = vmul.f32 1.442695, %v369_v5 }
 0x2f8   :  { %v810_v28 = vpop.xlane.xlu0 %809 }
 0x2f9   :  { %5440 = vpow2.f32 %v370_v8  ;;  %v811_v34 = vsub.f32 %v6025_v53, %v810_v28 }
 0x2fb   :  { %v812_v43 = vmul.f32 1.442695, %v811_v34 }
 0x306   :  { %v5441_v25 = vpop.eup %5440 }
 0x307   :  { %5198 = vmatmul.mubr.msk.f32.vlgmr.msra.gmra.mxu1 %vm365_vm3, %v5441_v25  ;;  %v372_v41 = vsel %vm365_vm3, %v5441_v25, 0.0 }
 0x308   :  { %5206 = vmatpush3.msra.mxu1 %v602_v26  ;;  %373 = vadd.xlane.f32.xlu1 %v372_v41 }
 0x309   :  { %5207 = vmatprep.mubr.msk.f32.mxu1 %vm5723_vm5, %v5719_v18  ;;  %5215 = vmatprep.subr.mxu1 %v5719_v18 }
 0x32b   :  { %v478_v31 = vpop.xlane.xlu1 %477 }
 0x32c   :  { %v479_v32 = vsub.f32 %v475_v19, %v478_v31 }
 0x32e   :  { %v480_v51 = vmul.f32 1.442695, %v479_v32 }
 0x32f   :  { %v705_v35 = vpop.xlane.xlu1 %704  ;;  %v592_v22 = vpop.xlane.xlu0 %591 }
 0x330   :  { %5442 = vpow2.f32 %v480_v51  ;;  %v706_v36 = vsub.f32 %v702_v37, %v705_v35  ;;  %v593_v39 = vsub.f32 %v589_v38, %v592_v22 }
 0x332   :  { %v707_v40 = vmul.f32 1.442695, %v706_v36  ;;  %v594_v42 = vmul.f32 1.442695, %v593_v39 }
 0x333   :  { %v920_v44 = vpop.xlane.xlu1 %919  ;;  %v931_v52 = vpop.permute.xlu0 %930 }
 0x334   :  { %5444 = vpow2.f32 %v707_v40  ;;  %v921_v45 = vsub.f32 %v917_v47, %v920_v44 }
 0x335   :  { %5446 = vpow2.f32 %v594_v42 }
 0x336   :  { %v922_v46 = vmul.f32 1.442695, %v921_v45  ;;  %5448 = vpow2.f32 %v812_v43 }
 0x337   :  { %v1147_v48 = vpop.xlane.xlu1 %1146 }
 0x338   :  { %5450 = vpow2.f32 %v922_v46  ;;  %v1148_v19 = vsub.f32 %v1144_v50, %v1147_v48 }
 0x33a   :  { %v1149_v49 = vmul.f32 1.442695, %v1148_v19 }
 0x33b   :  { %v1044_v4 = vpop.permute.xlu1 %1043 }
 0x33c   :  { %5452 = vpow2.f32 %v1149_v49 }
 0x33d   :  { %v5443_v53 = vpop.eup %5442 }
 0x33e   :  { %5203 = vmatmul.mubr.msk.f32.vlgmr.msra.gmra.mxu0 %vm365_vm3, %v5443_v53  ;;  %v482_v37 = vsel %vm365_vm3, %v5443_v53, 0.0 }
 0x33f   :  { %5211 = vmatpush3.msra.mxu0 %v715_v27  ;;  %483 = vadd.xlane.f32.xlu0 %v482_v37 }
 0x340   :  { %5212 = vmatprep.mubr.msk.f32.mxu0 %vm5723_vm5, %v5719_v18  ;;  %5220 = vmatprep.subr.mxu0 %v5719_v18 }
 0x341   :  { %v5445_v38 = vpop.eup %5444 }
 0x342   :  { %v5447_v47 = vpop.eup %5446  ;;  %5213 = vmatmul.mubr.msk.f32.vlgmr.msra.gmra.mxu0 %vm365_vm3, %v5445_v38  ;;  %v709_v50 = vsel %vm365_vm3, %v5445_v38, 0.0 }
 0x343   :  { %5208 = vmatmul.mubr.msk.f32.vlgmr.msra.gmra.mxu1 %vm365_vm3, %v5447_v47  ;;  %5221 = vmatpush3.msra.mxu0 %v931_v52  ;;  %v596_v58 = vsel %vm365_vm3, %v5447_v47, 0.0  ;;  %v5449_v60 = vpop.eup %5448 }
 0x344   :  { %5216 = vmatpush3.msra.mxu1 %v5962_v62  ;;  %710 = vadd.xlane.f32.xlu1 %v709_v50  ;;  %v814_v62 = vsel %vm365_vm3, %v5449_v60, 0.0 }
 0x345   :  { %v5451_v61 = vpop.eup %5450  ;;  %597 = vadd.xlane.f32.xlu0 %v596_v58  ;;  %5217 = vmatprep.mubr.msk.f32.mxu1 %vm5723_vm5, %v5719_v18 }
 0x346   :  { %5222 = vmatprep.mubr.msk.f32.mxu0 %vm5723_vm5, %v5719_v18  ;;  %5225 = vmatprep.subr.mxu1 %v5719_v18  ;;  %v924_v2 = vsel %vm365_vm3, %v5451_v61, 0.0 }
 0x347   :  { %5218 = vmatmul.mubr.msk.f32.vlgmr.msra.gmra.mxu1 %vm365_vm3, %v5449_v60  ;;  %5223 = vmatmul.mubr.msk.f32.vlgmr.msra.gmra.mxu0 %vm365_vm3, %v5451_v61 }
 0x348   :  { %5226 = vmatpush3.msra.mxu1 %v1044_v4  ;;  %925 = vadd.xlane.f32.xlu1 %v924_v2 }
 0x349   :  { %v5453_v5 = vpop.eup %5452  ;;  %815 = vadd.xlane.f32.xlu0 %v814_v62  ;;  %5230 = vmatprep.subr.mxu0 %v5719_v18 }
 0x34a   :  { %v1151_v8 = vsel %vm365_vm3, %v5453_v5, 0.0  ;;  %5232 = vmatprep.mubr.msk.f32.mxu0 %vm5723_vm5, %v5719_v18  ;;  %5227 = vmatprep.mubr.msk.f32.mxu1 %vm5723_vm5, %v5719_v18 }
 0x34b   :  { %1268 = vmatprep.subr.mxu1 %v5869_v9 }
 0x34c   :  { %1152 = vadd.xlane.f32.xlu1 %v1151_v8 }
 0x364   :  { %v1034_v25 = vpop.xlane.xlu0 %1033 }
 0x365   :  { %v1035_v26 = vsub.f32 %v6055_v0, %v1034_v25 }
 0x367   :  { %v1036_v41 = vmul.f32 1.442695, %v1035_v26 }
 0x368   :  { %v1157_v27 = vpop.permute.xlu0 %1156 }
 0x369   :  { %5454 = vpow2.f32 %v1036_v41  ;;  %5231 = vmatpush3.msra.mxu0 %v1157_v27 }
 0x36a   :  { %5233 = vmatmul.mubr.msk.f32.vlgmr.msra.gmra.mxu0 %vm365_vm3, %v5453_v5 }
 0x36b   :  { %1379 = vmatprep.mubr.f32.mxu0 %v5949_v54 }
 0x376   :  { %v5455_v28 = vpop.eup %5454 }
 0x377   :  { %5228 = vmatmul.mubr.msk.f32.vlgmr.msra.gmra.mxu1 %vm365_vm3, %v5455_v28  ;;  %v1038_v31 = vsel %vm365_vm3, %v5455_v28, 0.0 }
 0x378   :  { %1039 = vadd.xlane.f32.xlu0 %v1038_v31  ;;  %1269 = vmatpush1.msra.mxu1 %v5872_v10 }
 0x379   :  { %1270 = vmatprep.subr.mxu1 %v5875_v12  ;;  %1308 = vmatprep.mubr.f32.mxu1 %v5719_v18 }
 0x37a   :  { %1271 = vmatpush1.msra.mxu1 %v5878_v13 }
 0x37b   :  { %1272 = vmatprep.subr.mxu1 %v5881_v14 }
 0x37c   :  { %1273 = vmatpush1.msra.mxu1 %v5883_v15 }
 0x37d   :  { %1274 = vmatprep.subr.mxu1 %v5885_v16 }
 0x37e   :  { %1275 = vmatpush1.msra.mxu1 %v5888_v17 }
 0x37f   :  { %5240 = vmatprep.subr.mxu1 %v5719_v18 }
 0x391   :  { %v374_v15 = vpop.xlane.xlu1 %373 }
 0x3c7   :  { %v446_v9 = vpop.f32.mrf.mxu1 }
 0x3c8   :  { %v484_v36 = vpop.xlane.xlu0 %483 }
 0x3c9   :  { %v5199_v54 = vpop.f32.mrf.mxu1  ;;  %5456 = vrcp.f32 %v484_v36 }
 0x3ca   :  { %5458 = vrcp.f32 %v374_v15 }
 0x3cd   :  { %v711_v16 = vpop.xlane.xlu1 %710 }
 0x3ce   :  { %v598_v39 = vpop.xlane.xlu0 %597 }
 0x3cf   :  { %5460 = vrcp.f32 %v598_v39 }
 0x3d0   :  { %5462 = vrcp.f32 %v711_v16 }
 0x3d1   :  { %v926_v40 = vpop.xlane.xlu1 %925 }
 0x3d2   :  { %v816_v17 = vpop.xlane.xlu0 %815 }
 0x3d3   :  { %5464 = vrcp.f32 %v816_v17 }
 0x3d4   :  { %5466 = vrcp.f32 %v926_v40 }
 0x3d5   :  { %v1153_v48 = vpop.xlane.xlu1 %1152 }
 0x3d6   :  { %v5457_v42 = vpop.eup %5456 }
 0x3d7   :  { %v5459_v43 = vpop.eup %5458  ;;  %v486_v46 = vmul.f32 0.125, %v5457_v42 }
 0x3d8   :  { %v376_v19 = vmul.f32 0.125, %v5459_v43 }
 0x3da   :  { %v450_v37 = vmul.f32 %v446_v9, %v376_v19 }
 0x3dc   :  { %v5461_v44 = vpop.eup %5460 }
 0x3dd   :  { %v600_v53 = vmul.f32 0.125, %v5461_v44  ;;  %v5463_v47 = vpop.eup %5462 }
 0x3de   :  { %v713_v61 = vmul.f32 0.125, %v5463_v47 }
 0x3e0   :  { %v5465_v58 = vpop.eup %5464 }
 0x3e1   :  { %v818_v62 = vmul.f32 0.125, %v5465_v58  ;;  %v5467_v25 = vpop.eup %5466 }
 0x3e2   :  { %v928_v27 = vmul.f32 0.125, %v5467_v25 }
 0x3fe   :  { %v560_v0 = vpop.f32.mrf.mxu0 }
 0x3ff   :  { %v564_v49 = vmul.f32 %v560_v0, %v486_v46 }
 0x400   :  { %v5204_v10 = vpop.f32.mrf.mxu0 }
 0x401   :  { %v1040_v45 = vpop.xlane.xlu0 %1039  ;;  %v565_v52 = vadd.f32 %v564_v49, %v450_v37 }
 0x402   :  { %v786_v32 = vpop.f32.mrf.mxu0  ;;  %5468 = vrcp.f32 %v1040_v45 }
 0x403   :  { %v673_v12 = vpop.f32.mrf.mxu1  ;;  %5470 = vrcp.f32 %v1153_v48  ;;  %v790_v4 = vmul.f32 %v786_v32, %v713_v61  ;;  %v6111_v32 = vld [vmem:[%s6636_s6] ss:$0 sm:$0xff] }
 0x404   :  { %v5214_v51 = vpop.f32.mrf.mxu0  ;;  %v677_v38 = vmul.f32 %v673_v12, %v600_v53 }
 0x405   :  { %v5209_v34 = vpop.f32.mrf.mxu1 }
 0x406   :  { %v678_v60 = vadd.f32 %v677_v38, %v565_v52 }
 0x407   :  { %v888_v35 = vpop.f32.mrf.mxu1  ;;  %v1002_v13 = vpop.f32.mrf.mxu0 }
 0x408   :  { %v791_v5 = vadd.f32 %v790_v4, %v678_v60  ;;  %v892_v8 = vmul.f32 %v888_v35, %v818_v62  ;;  %v1006_v31 = vmul.f32 %v1002_v13, %v928_v27 }
 0x409   :  { %v5219_v22 = vpop.f32.mrf.mxu1  ;;  %v5224_v14 = vpop.f32.mrf.mxu0 }
 0x40a   :  { %v893_v41 = vadd.f32 %v892_v8, %v791_v5 }
 0x40c   :  { %v1007_v0 = vadd.f32 %v1006_v31, %v893_v41 }
 0x40f   :  { %v5469_v26 = vpop.eup %5468 }
 0x410   :  { %v5471_v28 = vpop.eup %5470  ;;  %v1042_v9 = vmul.f32 0.125, %v5469_v26 }
 0x411   :  { %v1155_v10 = vmul.f32 0.125, %v5471_v28 }
 0x42a   :  { %v1228_v50 = vpop.f32.mrf.mxu0 }
 0x42b   :  { %v1232_v34 = vmul.f32 %v1228_v50, %v1155_v10 }
 0x42c   :  { %v5234_v2 = vpop.f32.mrf.mxu0 }
 0x437   :  { %v1115_v54 = vpop.f32.mrf.mxu1 }
 0x438   :  { %v1119_v12 = vmul.f32 %v1115_v54, %v1042_v9 }
 0x439   :  { %v5229_v51 = vpop.f32.mrf.mxu1 }
 0x43a   :  { %v1120_v22 = vadd.f32 %v1119_v12, %v1007_v0 }
 0x43c   :  { %v1233_v35 = vadd.f32 %v1232_v34, %v1120_v22 }
 0x43e   :  { %v6114_v14 = vadd.f32 %v6111_v32, %v1233_v35 }
 0x440   :  { %5045 = vmatmul.mubr.msk.f32.vlgmr.msra.gmra.mxu1 %vm204_vm1, %v6114_v14 }
 0x441   :  { %5242 = vmatprep.mubr.msk.f32.mxu1 %vm5723_vm5, %v5719_v18 }
 0x500   :  { %v1310_v13 = vpop.f32.mrf.mxu1 }
 0x501   :  { %v1589_v36 = vmul.f32 %v1310_v13, %v5954_v56  ;;  %v1483_v15 = vmul.f32 %v1310_v13, %v5952_v55  ;;  %v1694_v16 = vmul.f32 %v1310_v13, %v5956_v57 }
 0x502   :  { %v6122_v39 = vpop.f32.mrf.mxu1 }
 0x503   :  { %1591 = vrot.lane.b32.xlu1 %v1589_v36, %s5721_s23  ;;  %1485 = vrot.lane.b32.xlu0 %v1483_v15, %s5722_s24  ;;  %v1897_v17 = vmul.f32 %v6122_v39, %v5958_v59  ;;  %v2003_v55 = vmul.f32 %v6122_v39, %v5974_v1  ;;  %v2108_v56 = vmul.f32 %v6122_v39, %v5978_v3 }
 0x504   :  { %1345 = vmatprep.subr.mxu0 %v6122_v39  ;;  %v1799_v57 = vmul.f32 %v6122_v39, %v5995_v7 }
 0x505   :  { %1346 = vmatpush1.xpose.msra.mxu0 %v1310_v13 }
 0x506   :  { %5235 = vmatprep.subr.mxu0 %v5719_v18  ;;  %v1800_v59 = vsel %vm204_vm1, %v1799_v57, 0.0 }
 0x507   :  { %1696 = vrot.lane.b32.xlu1 %v1694_v16, %s5720_s15  ;;  %1899 = vrot.lane.b32.xlu0 %v1897_v17, %s5722_s24 }
 0x508   :  { %1380 = vmatmul.mubr.f32.vlgmr.msra.gmra.mxu0 %v5970_v63  ;;  %v1385_v63 = vmul.f32 %v1310_v13, %v6001_v11 }
 0x509   :  { %5236 = vmatpush3.msra.mxu0 %v1310_v13  ;;  %5237 = vmatprep.mubr.msk.f32.mxu0 %vm5723_vm5, %v5719_v18 }
 0x50a   :  { %5245 = vmatprep.subr.mxu0 %v5719_v18  ;;  %v1386_v1 = vsel %vm204_vm1, %v1385_v63, 0.0 }
 0x50b   :  { %2005 = vrot.lane.b32.xlu1 %v2003_v55, %s5721_s23  ;;  %2110 = vrot.lane.b32.xlu0 %v2108_v56, %s5720_s15 }
 0x52a   :  { %1801 = vadd.xlane.f32.xlu0 %v1800_v59 }
 0x52f   :  { %1387 = vadd.xlane.f32.xlu1 %v1386_v1 }
 0x575   :  { %v1592_v3 = vpop.permute.xlu1 %1591  ;;  %v1486_v40 = vpop.permute.xlu0 %1485 }
 0x576   :  { %v1488_v42 = vsel %vm204_vm1, %v1486_v40, 0.0  ;;  %v1594_v46 = vsel %vm204_vm1, %v1592_v3, 0.0 }
 0x577   :  { %1489 = vadd.xlane.f32.xlu0 %v1488_v42 }
 0x579   :  { %v1697_v43 = vpop.permute.xlu1 %1696  ;;  %v1900_v44 = vpop.permute.xlu0 %1899 }
 0x57a   :  { %v1699_v45 = vsel %vm204_vm1, %v1697_v43, 0.0  ;;  %v1902_v48 = vsel %vm204_vm1, %v1900_v44, 0.0 }
 0x57b   :  { %1700 = vadd.xlane.f32.xlu1 %v1699_v45  ;;  %1595 = vadd.xlane.f32.xlu0 %v1594_v46 }
 0x57d   :  { %v2006_v7 = vpop.permute.xlu1 %2005  ;;  %v2111_v19 = vpop.permute.xlu0 %2110 }
 0x57e   :  { %v2008_v11 = vsel %vm204_vm1, %v2006_v7, 0.0  ;;  %v2113_v49 = vsel %vm204_vm1, %v2111_v19, 0.0 }
 0x57f   :  { %1903 = vadd.xlane.f32.xlu1 %v1902_v48  ;;  %2009 = vadd.xlane.f32.xlu0 %v2008_v11 }
 0x583   :  { %2114 = vadd.xlane.f32.xlu1 %v2113_v49 }
 0x594   :  { %1616 = vrot.lane.b32.xlu1 %v1310_v13, %s5721_s23 }
 0x595   :  { %1511 = vrot.lane.b32.xlu0 %v1310_v13, %s5722_s24 }
 0x598   :  { %1721 = vrot.lane.b32.xlu1 %v1310_v13, %s5720_s15 }
 0x5b3   :  { %v1802_v37 = vpop.xlane.xlu0 %1801 }
 0x5b8   :  { %v1388_v52 = vpop.xlane.xlu1 %1387 }
 0x5c8   :  { %v6157_v53 = vpop.f32.mrf.mxu0 }
 0x5c9   :  { %v1392_v38 = vrot.slane %v6157_v53, %v5936_v33  ;;  %v1806_v47 = vrot.slane %v6157_v53, %v5991_v6  ;;  %v1494_v25 = vrot.slane %v6157_v53, %v5899_v21  ;;  %v1705_v27 = vrot.slane %v6157_v53, %v5909_v24 }
 0x5ca   :  { %v1383_v50 = vpop.f32.mrf.mxu0  ;;  %v1600_v28 = vrot.slane %v6157_v53, %v5896_v20  ;;  %v1908_v34 = vrot.slane %v6157_v53, %v5905_v23  ;;  %v2119_v57 = vrot.slane %v6157_v53, %v5925_v30  ;;  %v2014_v46 = vrot.slane %v6157_v53, %v5922_v29 }
 0x5cb   :  { %v1393_v58 = vadd.f32 %v1392_v38, %v1388_v52  ;;  %v1807_v60 = vadd.f32 %v1806_v47, %v1802_v37 }
 0x5cd   :  { %vm1394_vm12 = vcmp.gt.f32.partialorder %v1393_v58, 0.0  ;;  %v1395_v61 = vmul.f32 0.2, %v1393_v58  ;;  %v1809_v2 = vmul.f32 0.2, %v1807_v60  ;;  %vm1808_vm13 = vcmp.gt.f32.partialorder %v1807_v60, 0.0 }
 0x5cf   :  { %v1396_v4 = vsel %vm1394_vm12, %v1393_v58, %v1395_v61  ;;  %v6164_v5 = vsel %vm1808_vm13, %v1807_v60, %v1809_v2 }
 0x5d0   :  { %v1397_v62 = vsel %vm365_vm3, %v1396_v4, -inf  ;;  %v1811_v8 = vsel %vm365_vm3, %v6164_v5, -inf }
 0x5d1   :  { %1398 = vmax.xlane.f32.xlu0 %v1397_v62 }
 0x5d5   :  { %1812 = vmax.xlane.f32.xlu0 %v1811_v8 }
 0x600   :  { %v1490_v26 = vpop.xlane.xlu0 %1489 }
 0x601   :  { %v1495_v41 = vadd.f32 %v1494_v25, %v1490_v26 }
 0x603   :  { %vm1496_vm14 = vcmp.gt.f32.partialorder %v1495_v41, 0.0  ;;  %v1497_v31 = vmul.f32 0.2, %v1495_v41 }
 0x604   :  { %v1701_v9 = vpop.xlane.xlu1 %1700  ;;  %v1596_v54 = vpop.xlane.xlu0 %1595 }
 0x605   :  { %v1706_v0 = vadd.f32 %v1705_v27, %v1701_v9  ;;  %v1601_v10 = vadd.f32 %v1600_v28, %v1596_v54  ;;  %v1498_v12 = vsel %vm1496_vm14, %v1495_v41, %v1497_v31 }
 0x606   :  { %v1499_v51 = vsel %vm365_vm3, %v1498_v12, -inf }
 0x607   :  { %1500 = vmax.xlane.f32.xlu1 %v1499_v51  ;;  %vm1707_vm15 = vcmp.gt.f32.partialorder %v1706_v0, 0.0  ;;  %v1708_v22 = vmul.f32 0.2, %v1706_v0  ;;  %vm1602_vm0 = vcmp.gt.f32.partialorder %v1601_v10, 0.0  ;;  %v1603_v35 = vmul.f32 0.2, %v1601_v10 }
 0x608   :  { %v1904_v13 = vpop.xlane.xlu1 %1903  ;;  %v2010_v36 = vpop.xlane.xlu0 %2009 }
 0x609   :  { %v1909_v15 = vadd.f32 %v1908_v34, %v1904_v13  ;;  %v1709_v16 = vsel %vm1707_vm15, %v1706_v0, %v1708_v22  ;;  %v1604_v17 = vsel %vm1602_vm0, %v1601_v10, %v1603_v35  ;;  %v2015_v7 = vadd.f32 %v2014_v46, %v2010_v36  ;;  %v2214_v46 = vld [vmem:[#allocation12] sm:$0xff] }
 0x60a   :  { %v1710_v55 = vsel %vm365_vm3, %v1709_v16, -inf  ;;  %v1605_v56 = vsel %vm365_vm3, %v1604_v17, -inf }
 0x60b   :  { %1711 = vmax.xlane.f32.xlu1 %v1710_v55  ;;  %1606 = vmax.xlane.f32.xlu0 %v1605_v56  ;;  %vm1910_vm2 = vcmp.gt.f32.partialorder %v1909_v15, 0.0  ;;  %v1911_v59 = vmul.f32 0.2, %v1909_v15  ;;  %v2017_v48 = vmul.f32 0.2, %v2015_v7  ;;  %vm2016_vm6 = vcmp.gt.f32.partialorder %v2015_v7, 0.0 }
 0x60c   :  { %v2115_v63 = vpop.xlane.xlu1 %2114  ;;  %v1512_v1 = vpop.permute.xlu0 %1511 }
 0x60d   :  { %v2120_v3 = vadd.f32 %v2119_v57, %v2115_v63  ;;  %5241 = vmatpush3.msra.mxu1 %v1512_v1  ;;  %v1912_v40 = vsel %vm1910_vm2, %v1909_v15, %v1911_v59  ;;  %v6190_v11 = vsel %vm2016_vm6, %v2015_v7, %v2017_v48 }
 0x60e   :  { %v1913_v42 = vsel %vm365_vm3, %v1912_v40, -inf  ;;  %5250 = vmatprep.subr.mxu1 %v5719_v18  ;;  %v2019_v19 = vsel %vm365_vm3, %v6190_v11, -inf }
 0x60f   :  { %1914 = vmax.xlane.f32.xlu1 %v1913_v42  ;;  %vm2121_vm4 = vcmp.gt.f32.partialorder %v2120_v3, 0.0  ;;  %v2122_v43 = vmul.f32 0.2, %v2120_v3 }
 0x610   :  { %v1617_v52 = vpop.permute.xlu1 %1616 }
 0x611   :  { %v2123_v44 = vsel %vm2121_vm4, %v2120_v3, %v2122_v43  ;;  %v2217_v43 = vld [vmem:[#allocation12 + $0x18] sm:$0xff] }
 0x612   :  { %v2124_v45 = vsel %vm365_vm3, %v2123_v44, -inf }
 0x613   :  { %2125 = vmax.xlane.f32.xlu1 %v2124_v45  ;;  %v2215_v45 = vld [vmem:[#allocation12 + $0x8] sm:$0xff] }
 0x614   :  { %v1722_v50 = vpop.permute.xlu1 %1721 }
 0x621   :  { %1925 = vrot.lane.b32.xlu0 %v6122_v39, %s5722_s24 }
 0x624   :  { %2030 = vrot.lane.b32.xlu1 %v6122_v39, %s5721_s23 }
 0x640   :  { %2020 = vmax.xlane.f32.xlu0 %v2019_v19 }
 0x656   :  { %2135 = vrot.lane.b32.xlu0 %v6122_v39, %s5720_s15 }
 0x65a   :  { %v1399_v49 = vpop.xlane.xlu0 %1398 }
 0x65b   :  { %v1400_v37 = vsub.f32 %v1396_v4, %v1399_v49 }
 0x65d   :  { %v1401_v38 = vmul.f32 1.442695, %v1400_v37 }
 0x65e   :  { %v1813_v58 = vpop.xlane.xlu0 %1812 }
 0x65f   :  { %5472 = vpow2.f32 %v1401_v38  ;;  %v1814_v4 = vsub.f32 %v6164_v5, %v1813_v58 }
 0x661   :  { %v1815_v28 = vmul.f32 1.442695, %v1814_v4 }
 0x66c   :  { %v5473_v47 = vpop.eup %5472 }
 0x66d   :  { %5238 = vmatmul.mubr.msk.f32.vlgmr.msra.gmra.mxu0 %vm365_vm3, %v5473_v47  ;;  %v1403_v53 = vsel %vm365_vm3, %v5473_v47, 0.0 }
 0x66e   :  { %5246 = vmatpush3.msra.mxu0 %v1617_v52  ;;  %1404 = vadd.xlane.f32.xlu1 %v1403_v53 }
 0x66f   :  { %5247 = vmatprep.mubr.msk.f32.mxu0 %vm5723_vm5, %v5719_v18  ;;  %5255 = vmatprep.subr.mxu0 %v5719_v18 }
 0x690   :  { %v1501_v60 = vpop.xlane.xlu1 %1500 }
 0x691   :  { %v1502_v61 = vsub.f32 %v1498_v12, %v1501_v60 }
 0x693   :  { %v1503_v2 = vmul.f32 1.442695, %v1502_v61 }
 0x694   :  { %v1712_v62 = vpop.xlane.xlu1 %1711  ;;  %v1607_v8 = vpop.xlane.xlu0 %1606 }
 0x695   :  { %5474 = vpow2.f32 %v1503_v2  ;;  %v1713_v25 = vsub.f32 %v1709_v16, %v1712_v62  ;;  %v1608_v26 = vsub.f32 %v1604_v17, %v1607_v8 }
 0x697   :  { %v1714_v41 = vmul.f32 1.442695, %v1713_v25  ;;  %v1609_v27 = vmul.f32 1.442695, %v1608_v26 }
 0x698   :  { %v1915_v31 = vpop.xlane.xlu1 %1914  ;;  %v1926_v35 = vpop.permute.xlu0 %1925 }
 0x699   :  { %5476 = vpow2.f32 %v1714_v41  ;;  %v1916_v9 = vsub.f32 %v1912_v40, %v1915_v31 }
 0x69a   :  { %5478 = vpow2.f32 %v1609_v27 }
 0x69b   :  { %v1917_v54 = vmul.f32 1.442695, %v1916_v9  ;;  %5480 = vpow2.f32 %v1815_v28 }
 0x69c   :  { %v2126_v0 = vpop.xlane.xlu1 %2125 }
 0x69d   :  { %5482 = vpow2.f32 %v1917_v54  ;;  %v2127_v10 = vsub.f32 %v2123_v44, %v2126_v0  ;;  %v2216_v44 = vld [vmem:[#allocation12 + $0x10] sm:$0xff] }
 0x69f   :  { %v2128_v12 = vmul.f32 1.442695, %v2127_v10 }
 0x6a0   :  { %v2031_v55 = vpop.permute.xlu1 %2030 }
 0x6a1   :  { %5484 = vpow2.f32 %v2128_v12 }
 0x6a2   :  { %v5475_v5 = vpop.eup %5474 }
 0x6a3   :  { %5243 = vmatmul.mubr.msk.f32.vlgmr.msra.gmra.mxu1 %vm365_vm3, %v5475_v5  ;;  %v1505_v51 = vsel %vm365_vm3, %v5475_v5, 0.0 }
 0x6a4   :  { %5251 = vmatpush3.msra.mxu1 %v1722_v50  ;;  %1506 = vadd.xlane.f32.xlu0 %v1505_v51 }
 0x6a5   :  { %5252 = vmatprep.mubr.msk.f32.mxu1 %vm5723_vm5, %v5719_v18  ;;  %5260 = vmatprep.subr.mxu1 %v5719_v18 }
 0x6a6   :  { %v5477_v34 = vpop.eup %5476 }
 0x6a7   :  { %v5479_v22 = vpop.eup %5478  ;;  %5253 = vmatmul.mubr.msk.f32.vlgmr.msra.gmra.mxu1 %vm365_vm3, %v5477_v34  ;;  %v1716_v13 = vsel %vm365_vm3, %v5477_v34, 0.0 }
 0x6a8   :  { %5248 = vmatmul.mubr.msk.f32.vlgmr.msra.gmra.mxu0 %vm365_vm3, %v5479_v22  ;;  %5261 = vmatpush3.msra.mxu1 %v1926_v35  ;;  %v1611_v36 = vsel %vm365_vm3, %v5479_v22, 0.0  ;;  %v5481_v15 = vpop.eup %5480 }
 0x6a9   :  { %5256 = vmatpush3.msra.mxu0 %v6122_v39  ;;  %1717 = vadd.xlane.f32.xlu1 %v1716_v13  ;;  %v1817_v39 = vsel %vm365_vm3, %v5481_v15, 0.0 }
 0x6aa   :  { %v5483_v16 = vpop.eup %5482  ;;  %1612 = vadd.xlane.f32.xlu0 %v1611_v36  ;;  %5257 = vmatprep.mubr.msk.f32.mxu0 %vm5723_vm5, %v5719_v18 }
 0x6ab   :  { %5262 = vmatprep.mubr.msk.f32.mxu1 %vm5723_vm5, %v5719_v18  ;;  %5265 = vmatprep.subr.mxu0 %v5719_v18  ;;  %v1919_v17 = vsel %vm365_vm3, %v5483_v16, 0.0 }
 0x6ac   :  { %5258 = vmatmul.mubr.msk.f32.vlgmr.msra.gmra.mxu0 %vm365_vm3, %v5481_v15  ;;  %5263 = vmatmul.mubr.msk.f32.vlgmr.msra.gmra.mxu1 %vm365_vm3, %v5483_v16 }
 0x6ad   :  { %5266 = vmatpush3.msra.mxu0 %v2031_v55  ;;  %1920 = vadd.xlane.f32.xlu1 %v1919_v17 }
 0x6ae   :  { %v5485_v56 = vpop.eup %5484  ;;  %1818 = vadd.xlane.f32.xlu0 %v1817_v39  ;;  %5270 = vmatprep.subr.mxu1 %v5719_v18 }
 0x6af   :  { %v2130_v57 = vsel %vm365_vm3, %v5485_v56, 0.0  ;;  %5272 = vmatprep.mubr.msk.f32.mxu1 %vm5723_vm5, %v5719_v18  ;;  %5267 = vmatprep.mubr.msk.f32.mxu0 %vm5723_vm5, %v5719_v18 }
 0x6b0   :  { %5275 = vmatprep.subr.mxu0 %v5719_v18 }
 0x6b1   :  { %2131 = vadd.xlane.f32.xlu1 %v2130_v57 }
 0x6c9   :  { %v2021_v59 = vpop.xlane.xlu0 %2020 }
 0x6ca   :  { %v2022_v63 = vsub.f32 %v6190_v11, %v2021_v59 }
 0x6cc   :  { %v2023_v1 = vmul.f32 1.442695, %v2022_v63 }
 0x6cd   :  { %v2136_v3 = vpop.permute.xlu0 %2135 }
 0x6ce   :  { %5486 = vpow2.f32 %v2023_v1  ;;  %5271 = vmatpush3.msra.mxu1 %v2136_v3 }
 0x6cf   :  { %5273 = vmatmul.mubr.msk.f32.vlgmr.msra.gmra.mxu1 %vm365_vm3, %v5485_v56 }
 0x6d0   :  { %2424 = vmatprep.mubr.f32.mxu1 %v5719_v18 }
 0x6db   :  { %v5487_v40 = vpop.eup %5486 }
 0x6dc   :  { %5268 = vmatmul.mubr.msk.f32.vlgmr.msra.gmra.mxu0 %vm365_vm3, %v5487_v40  ;;  %v2025_v42 = vsel %vm365_vm3, %v5487_v40, 0.0 }
 0x6dd   :  { %2026 = vadd.xlane.f32.xlu0 %v2025_v42  ;;  %5283 = vmatprep.mubr.msk.f32.mxu0 %vm5723_vm5, %v5719_v18 }
 0x6de   :  { %5276 = vmatpush3.msra.mxu0 %v2217_v43 }
 0x6df   :  { %5277 = vmatprep.subr.mxu0 %v5719_v18 }
 0x6e0   :  { %5278 = vmatpush3.msra.mxu0 %v2216_v44 }
 0x6e1   :  { %5279 = vmatprep.subr.mxu0 %v5719_v18 }
 0x6e2   :  { %5280 = vmatpush3.msra.mxu0 %v2215_v45 }
 0x6e3   :  { %5281 = vmatprep.subr.mxu0 %v5719_v18 }
 0x6e4   :  { %5282 = vmatpush3.msra.mxu0 %v2214_v46 }
 0x6f7   :  { %v1405_v61 = vpop.xlane.xlu1 %1404 }
 0x72d   :  { %v1477_v7 = vpop.f32.mrf.mxu0  ;;  %v1507_v60 = vpop.xlane.xlu0 %1506 }
 0x72e   :  { %5488 = vrcp.f32 %v1507_v60 }
 0x72f   :  { %v5239_v48 = vpop.f32.mrf.mxu0  ;;  %5490 = vrcp.f32 %v1405_v61 }
 0x732   :  { %v1718_v4 = vpop.xlane.xlu1 %1717 }
 0x733   :  { %v1613_v2 = vpop.xlane.xlu0 %1612 }
 0x734   :  { %5492 = vrcp.f32 %v1613_v2 }
 0x735   :  { %5494 = vrcp.f32 %v1718_v4 }
 0x736   :  { %v1921_v8 = vpop.xlane.xlu1 %1920 }
 0x737   :  { %v1819_v62 = vpop.xlane.xlu0 %1818 }
 0x738   :  { %5496 = vrcp.f32 %v1819_v62 }
 0x739   :  { %5498 = vrcp.f32 %v1921_v8 }
 0x73a   :  { %v2132_v31 = vpop.xlane.xlu1 %2131 }
 0x73b   :  { %v5489_v25 = vpop.eup %5488 }
 0x73c   :  { %v5491_v26 = vpop.eup %5490  ;;  %v1509_v28 = vmul.f32 0.125, %v5489_v25  ;;  %v5054_v25 = vld [vmem:[%s6638_s8] ss:$0 sm:$0xff] }
 0x73d   :  { %v1407_v9 = vmul.f32 0.125, %v5491_v26 }
 0x73f   :  { %v1481_v10 = vmul.f32 %v1477_v7, %v1407_v9 }
 0x741   :  { %v5493_v41 = vpop.eup %5492 }
 0x742   :  { %v1615_v0 = vmul.f32 0.125, %v5493_v41  ;;  %v5495_v5 = vpop.eup %5494 }
 0x743   :  { %v1720_v13 = vmul.f32 0.125, %v5495_v5 }
 0x745   :  { %v5497_v22 = vpop.eup %5496 }
 0x746   :  { %v1821_v16 = vmul.f32 0.125, %v5497_v22  ;;  %v5499_v39 = vpop.eup %5498 }
 0x747   :  { %v1923_v59 = vmul.f32 0.125, %v5499_v39 }
 0x763   :  { %v1583_v11 = vpop.f32.mrf.mxu1 }
 0x764   :  { %v1587_v54 = vmul.f32 %v1583_v11, %v1509_v28 }
 0x765   :  { %v5244_v19 = vpop.f32.mrf.mxu1 }
 0x766   :  { %v2027_v27 = vpop.xlane.xlu0 %2026  ;;  %v1588_v51 = vadd.f32 %v1587_v54, %v1481_v10 }
 0x767   :  { %v1793_v49 = vpop.f32.mrf.mxu1  ;;  %5500 = vrcp.f32 %v2027_v27 }
 0x768   :  { %v1688_v37 = vpop.f32.mrf.mxu0  ;;  %5502 = vrcp.f32 %v2132_v31  ;;  %v1797_v15 = vmul.f32 %v1793_v49, %v1720_v13  ;;  %v2349_v49 = vld [vmem:[#allocation9 + $0x78] sm:$0xff] }
 0x769   :  { %v5254_v38 = vpop.f32.mrf.mxu1  ;;  %v1692_v12 = vmul.f32 %v1688_v37, %v1615_v0  ;;  %2384 = vmatprep.subr.mxu1 %v2349_v49  ;;  %v2348_v37 = vld [vmem:[#allocation9 + $0x70] sm:$0xff] }
 0x76a   :  { %v5249_v47 = vpop.f32.mrf.mxu0  ;;  %2385 = vmatpush1.msra.mxu1 %v2348_v37  ;;  %v2347_v38 = vld [vmem:[#allocation9 + $0x68] sm:$0xff] }
 0x76b   :  { %v1693_v35 = vadd.f32 %v1692_v12, %v1588_v51  ;;  %2386 = vmatprep.subr.mxu1 %v2347_v38  ;;  %v2346_v47 = vld [vmem:[#allocation9 + $0x60] sm:$0xff] }
 0x76c   :  { %v1891_v52 = vpop.f32.mrf.mxu0  ;;  %v1997_v53 = vpop.f32.mrf.mxu1  ;;  %2387 = vmatpush1.msra.mxu1 %v2346_v47  ;;  %v5058_v47 = vld [vmem:[%s6661_s13 + $0x10] sm:$0xff] }
 0x76d   :  { %v1798_v17 = vadd.f32 %v1797_v15, %v1693_v35  ;;  %v1895_v55 = vmul.f32 %v1891_v52, %v1821_v16  ;;  %v2001_v1 = vmul.f32 %v1997_v53, %v1923_v59  ;;  %v2345_v52 = vld [vmem:[#allocation9 + $0x58] sm:$0xff]  ;;  %v2344_v53 = vld [vmem:[#allocation9 + $0x50] sm:$0xff] }
 0x76e   :  { %v5259_v50 = vpop.f32.mrf.mxu0  ;;  %v5264_v58 = vpop.f32.mrf.mxu1  ;;  %2388 = vmatprep.subr.mxu1 %v2345_v52  ;;  %v5056_v59 = vld [vmem:[%s6639_s9] ss:$0 sm:$0xff] }
 0x76f   :  { %v1896_v57 = vadd.f32 %v1895_v55, %v1798_v17  ;;  %v2343_v50 = vld [vmem:[#allocation9 + $0x48] sm:$0xff]  ;;  %v2342_v58 = vld [vmem:[#allocation9 + $0x40] sm:$0xff]  ;;  %2389 = vmatpush1.msra.mxu1 %v2344_v53 }
 0x770   :  { %2390 = vmatprep.subr.mxu1 %v2343_v50 }
 0x771   :  { %v2002_v42 = vadd.f32 %v2001_v1, %v1896_v57  ;;  %2391 = vmatpush1.msra.mxu1 %v2342_v58 }
 0x772   :  { %5286 = vmatprep.subr.mxu1 %v5719_v18 }
 0x774   :  { %v5501_v56 = vpop.eup %5500 }
 0x775   :  { %v5503_v63 = vpop.eup %5502  ;;  %v2029_v3 = vmul.f32 0.125, %v5501_v56 }
 0x776   :  { %v2134_v43 = vmul.f32 0.125, %v5503_v63 }
 0x78f   :  { %v2207_v34 = vpop.f32.mrf.mxu1 }
 0x790   :  { %v2211_v46 = vmul.f32 %v2207_v34, %v2134_v43  ;;  %v5059_v43 = vld [vmem:[%s6661_s13 + $0x18] sm:$0xff] }
 0x791   :  { %v5274_v36 = vpop.f32.mrf.mxu1 }
 0x79c   :  { %v2102_v40 = vpop.f32.mrf.mxu0 }
 0x79d   :  { %v2106_v44 = vmul.f32 %v2102_v40, %v2029_v3  ;;  %v5057_v3 = vld [vmem:[%s6640_s10] ss:$0 sm:$0xff] }
 0x79e   :  { %v5269_v45 = vpop.f32.mrf.mxu0 }
 0x79f   :  { %v2107_v7 = vadd.f32 %v2106_v44, %v2002_v42 }
 0x7a1   :  { %v2212_v48 = vadd.f32 %v2211_v46, %v2107_v7 }
 0x7a3   :  { %v2213_v11 = vadd.f32 %v6111_v32, %v2212_v48  ;;  %v6241_v32 = vld [vmem:[#allocation11 + $0x8] sm:$0xff] }
 0x7a4   :  { %v2720_v60 = vrot.slane %v6241_v32, %v5896_v20  ;;  %v2606_v61 = vrot.slane %v6241_v32, %v5899_v21  ;;  %v2833_v2 = vrot.slane %v6241_v32, %v5909_v24  ;;  %v3048_v4 = vrot.slane %v6241_v32, %v5905_v23 }
 0x7a5   :  { %v2221_v19 = vadd.f32 %v2213_v11, %v6114_v14  ;;  %v3162_v62 = vrot.slane %v6241_v32, %v5922_v29  ;;  %v3275_v8 = vrot.slane %v6241_v32, %v5925_v30 }
 0x7a6   :  { %2722 = vrot.lane.b32.xlu1 %v2720_v60, %s5721_s23  ;;  %2608 = vrot.lane.b32.xlu0 %v2606_v61, %s5720_s15  ;;  %v2946_v60 = vrot.slane %v6241_v32, %v5991_v6 }
 0x7a7   :  { %5284 = vmatmul.mubr.msk.f32.vlgmr.msra.gmra.mxu0 %vm204_vm1, %v2221_v19 }
 0x7a8   :  { %2495 = vmatprep.mubr.f32.mxu0 %v5059_v43 }
 0x7aa   :  { %2835 = vrot.lane.b32.xlu1 %v2833_v2, %s5722_s24  ;;  %3050 = vrot.lane.b32.xlu0 %v3048_v4, %s5720_s15  ;;  %v2504_v2 = vrot.slane %v6241_v32, %v5936_v33 }
 0x7ae   :  { %3164 = vrot.lane.b32.xlu1 %v3162_v62, %s5721_s23  ;;  %3277 = vrot.lane.b32.xlu0 %v3275_v8, %s5722_s24 }
 0x818   :  { %v2723_v44 = vpop.permute.xlu1 %2722  ;;  %v2609_v45 = vpop.permute.xlu0 %2608 }
 0x81c   :  { %v2836_v46 = vpop.permute.xlu1 %2835  ;;  %v3051_v7 = vpop.permute.xlu0 %3050 }
 0x820   :  { %v3165_v52 = vpop.permute.xlu1 %3164  ;;  %v3278_v53 = vpop.permute.xlu0 %3277 }
 0x867   :  { %v2297_v26 = vpop.f32.mrf.mxu0 }
 0x868   :  { %v2298_v41 = vadd.f32 %v5054_v25, %v2297_v26 }
 0x869   :  { %v5285_v27 = vpop.f32.mrf.mxu0 }
 0x86a   :  { %vm2301_vm7 = vcmp.gt.f32.partialorder %v2298_v41, 0.0  ;;  %v2302_v28 = vmul.f32 0.01, %v2298_v41 }
 0x86c   :  { %v2303_v31 = vsel %vm2301_vm7, %v2298_v41, %v2302_v28 }
 0x86d   :  { %v2304_v9 = vadd.f32 %v2303_v31, %v6114_v14 }
 0x86f   :  { %v2305_v54 = vsel %vm204_vm1, %v2304_v9, 0.0 }
 0x870   :  { %v2306_v0 = vrot.slane %v2305_v54, 4 }
 0x872   :  { %v2307_v10 = vadd.f32 %v2306_v0, %v2305_v54 }
 0x874   :  { %v2308_v12 = vrot.slane %v2307_v10, 2 }
 0x876   :  { %v2309_v5 = vadd.f32 %v2308_v12, %v2307_v10 }
 0x878   :  { %v2310_v51 = vrot.slane %v2309_v5, 1 }
 0x87a   :  { %v2311_v34 = vadd.f32 %v2310_v51, %v2309_v5 }
 0x87c   :  { %v2313_v22 = vmul.f32 0.125, %v2311_v34 }
 0x87e   :  { %v2314_v35 = vsub.f32 %v2304_v9, %v2313_v22 }
 0x880   :  { %v2315_v13 = vmul.f32 %v2314_v35, %v2314_v35  ;;  %v2330_v63 = vmul.f32 %v5056_v59, %v2314_v35 }
 0x882   :  { %v2316_v36 = vsel %vm204_vm1, %v2315_v13, 0.0 }
 0x883   :  { %v2317_v15 = vrot.slane %v2316_v36, 4 }
 0x885   :  { %v2318_v16 = vadd.f32 %v2317_v15, %v2316_v36 }
 0x887   :  { %v2319_v17 = vrot.slane %v2318_v16, 2 }
 0x889   :  { %v2320_v55 = vadd.f32 %v2319_v17, %v2318_v16 }
 0x88b   :  { %v2321_v39 = vrot.slane %v2320_v55, 1 }
 0x88d   :  { %v2322_v56 = vadd.f32 %v2321_v39, %v2320_v55 }
 0x88f   :  { %v2323_v14 = vmul.f32 0.125, %v2322_v56 }
 0x891   :  { %v2331_v57 = vadd.f32 1e-05, %v2323_v14 }
 0x893   :  { %5504 = vrsqrt.f32 %v2331_v57 }
 0x8a0   :  { %v5505_v1 = vpop.eup %5504 }
 0x8a1   :  { %v2333_v40 = vmul.f32 %v5505_v1, %v2330_v63 }
 0x8a3   :  { %v6274_v42 = vadd.f32 %v5057_v3, %v2333_v40 }
 0x8a5   :  { %5061 = vmatmul.mubr.msk.f32.vlgmr.msra.gmra.mxu1 %vm204_vm1, %v6274_v42 }
 0x8a6   :  { %5288 = vmatprep.mubr.msk.f32.mxu1 %vm5723_vm5, %v5719_v18 }
 0x965   :  { %v2426_v48 = vpop.f32.mrf.mxu1 }
 0x966   :  { %5287 = vmatpush3.msra.mxu1 %v2426_v48  ;;  %v2725_v11 = vmul.f32 %v2723_v44, %v2426_v48  ;;  %v2611_v19 = vmul.f32 %v2609_v45, %v2426_v48  ;;  %v2838_v37 = vmul.f32 %v2836_v46, %v2426_v48  ;;  %v2505_v62 = vmul.f32 %v2504_v2, %v2426_v48 }
 0x967   :  { %v6283_v49 = vpop.f32.mrf.mxu1  ;;  %5296 = vmatprep.subr.mxu1 %v5719_v18 }
 0x968   :  { %2727 = vrot.lane.b32.xlu0 %v2725_v11, %s5721_s23  ;;  %2613 = vrot.lane.b32.xlu1 %v2611_v19, %s5722_s24  ;;  %v3053_v38 = vmul.f32 %v3051_v7, %v6283_v49  ;;  %v3167_v50 = vmul.f32 %v3165_v52, %v6283_v49  ;;  %v3280_v58 = vmul.f32 %v3278_v53, %v6283_v49  ;;  %v2506_v8 = vsel %vm204_vm1, %v2505_v62, 0.0 }
 0x969   :  { %2461 = vmatprep.subr.mxu0 %v6283_v49  ;;  %v2947_v61 = vmul.f32 %v2946_v60, %v6283_v49 }
 0x96a   :  { %2462 = vmatpush1.xpose.msra.mxu0 %v2426_v48 }
 0x96b   :  { %5291 = vmatprep.subr.mxu0 %v5719_v18  ;;  %v2948_v4 = vsel %vm204_vm1, %v2947_v61, 0.0 }
 0x96c   :  { %2840 = vrot.lane.b32.xlu1 %v2838_v37, %s5720_s15  ;;  %3055 = vrot.lane.b32.xlu0 %v3053_v38, %s5722_s24 }
 0x96d   :  { %2496 = vmatmul.mubr.f32.vlgmr.msra.gmra.mxu0 %v5058_v47 }
 0x96e   :  { %5293 = vmatprep.mubr.msk.f32.mxu0 %vm5723_vm5, %v5719_v18 }
 0x970   :  { %3169 = vrot.lane.b32.xlu1 %v3167_v50, %s5721_s23  ;;  %3282 = vrot.lane.b32.xlu0 %v3280_v58, %s5720_s15 }
 0x98f   :  { %2949 = vadd.xlane.f32.xlu0 %v2948_v4 }
 0x994   :  { %2507 = vadd.xlane.f32.xlu1 %v2506_v8 }
 0x9da   :  { %v2728_v25 = vpop.permute.xlu0 %2727  ;;  %v2614_v26 = vpop.permute.xlu1 %2613 }
 0x9db   :  { %v2616_v41 = vsel %vm204_vm1, %v2614_v26, 0.0  ;;  %v2730_v31 = vsel %vm204_vm1, %v2728_v25, 0.0 }
 0x9dc   :  { %2617 = vadd.xlane.f32.xlu0 %v2616_v41 }
 0x9de   :  { %v2841_v27 = vpop.permute.xlu1 %2840  ;;  %v3056_v28 = vpop.permute.xlu0 %3055 }
 0x9df   :  { %v2843_v9 = vsel %vm204_vm1, %v2841_v27, 0.0  ;;  %v3058_v54 = vsel %vm204_vm1, %v3056_v28, 0.0 }
 0x9e0   :  { %2844 = vadd.xlane.f32.xlu1 %v2843_v9  ;;  %2731 = vadd.xlane.f32.xlu0 %v2730_v31 }
 0x9e2   :  { %v3170_v32 = vpop.permute.xlu1 %3169  ;;  %v3283_v10 = vpop.permute.xlu0 %3282 }
 0x9e3   :  { %v3172_v0 = vsel %vm204_vm1, %v3170_v32, 0.0  ;;  %v3285_v12 = vsel %vm204_vm1, %v3283_v10, 0.0 }
 0x9e4   :  { %3059 = vadd.xlane.f32.xlu1 %v3058_v54  ;;  %3173 = vadd.xlane.f32.xlu0 %v3172_v0 }
 0x9e8   :  { %3286 = vadd.xlane.f32.xlu1 %v3285_v12 }
 0x9f9   :  { %2752 = vrot.lane.b32.xlu1 %v2426_v48, %s5721_s23 }
 0x9fa   :  { %2639 = vrot.lane.b32.xlu0 %v2426_v48, %s5722_s24 }
 0x9fd   :  { %2865 = vrot.lane.b32.xlu1 %v2426_v48, %s5720_s15 }
 0xa18   :  { %v2950_v51 = vpop.xlane.xlu0 %2949 }
 0xa1d   :  { %v2508_v35 = vpop.xlane.xlu1 %2507 }
 0xa2d   :  { %v6318_v5 = vpop.f32.mrf.mxu0 }
 0xa2e   :  { %v2512_v34 = vrot.slane %v6318_v5, %v5936_v33  ;;  %v2954_v22 = vrot.slane %v6318_v5, %v5991_v6  ;;  %v2622_v57 = vrot.slane %v6318_v5, %v5899_v21  ;;  %v2849_v3 = vrot.slane %v6318_v5, %v5909_v24 }
 0xa2f   :  { %v2499_v13 = vpop.f32.mrf.mxu0  ;;  %v2736_v40 = vrot.slane %v6318_v5, %v5896_v20  ;;  %v3064_v11 = vrot.slane %v6318_v5, %v5905_v23  ;;  %v3291_v2 = vrot.slane %v6318_v5, %v5925_v30  ;;  %v3178_v31 = vrot.slane %v6318_v5, %v5922_v29 }
 0xa30   :  { %v2513_v36 = vadd.f32 %v2512_v34, %v2508_v35  ;;  %v2955_v15 = vadd.f32 %v2954_v22, %v2950_v51 }
 0xa32   :  { %vm2514_vm8 = vcmp.gt.f32.partialorder %v2513_v36, 0.0  ;;  %v2515_v16 = vmul.f32 0.2, %v2513_v36  ;;  %v2957_v17 = vmul.f32 0.2, %v2955_v15  ;;  %vm2956_vm9 = vcmp.gt.f32.partialorder %v2955_v15, 0.0 }
 0xa34   :  { %v2516_v55 = vsel %vm2514_vm8, %v2513_v36, %v2515_v16  ;;  %v6325_v56 = vsel %vm2956_vm9, %v2955_v15, %v2957_v17 }
 0xa35   :  { %v2517_v39 = vsel %vm365_vm3, %v2516_v55, -inf  ;;  %v2959_v14 = vsel %vm365_vm3, %v6325_v56, -inf }
 0xa36   :  { %2518 = vmax.xlane.f32.xlu0 %v2517_v39 }
 0xa3a   :  { %2960 = vmax.xlane.f32.xlu0 %v2959_v14 }
 0xa65   :  { %v2618_v59 = vpop.xlane.xlu0 %2617 }
 0xa66   :  { %v2623_v63 = vadd.f32 %v2622_v57, %v2618_v59 }
 0xa68   :  { %v2625_v1 = vmul.f32 0.2, %v2623_v63  ;;  %vm2624_vm10 = vcmp.gt.f32.partialorder %v2623_v63, 0.0 }
 0xa69   :  { %v2845_v43 = vpop.xlane.xlu1 %2844  ;;  %v2732_v44 = vpop.xlane.xlu0 %2731 }
 0xa6a   :  { %v2850_v45 = vadd.f32 %v2849_v3, %v2845_v43  ;;  %v2737_v46 = vadd.f32 %v2736_v40, %v2732_v44  ;;  %v2626_v7 = vsel %vm2624_vm10, %v2623_v63, %v2625_v1 }
 0xa6b   :  { %v2627_v48 = vsel %vm365_vm3, %v2626_v7, -inf }
 0xa6c   :  { %v2852_v19 = vmul.f32 0.2, %v2850_v45  ;;  %v2739_v37 = vmul.f32 0.2, %v2737_v46  ;;  %2628 = vmax.xlane.f32.xlu1 %v2627_v48  ;;  %vm2851_vm11 = vcmp.gt.f32.partialorder %v2850_v45, 0.0  ;;  %vm2738_vm12 = vcmp.gt.f32.partialorder %v2737_v46, 0.0 }
 0xa6d   :  { %v3060_v38 = vpop.xlane.xlu1 %3059  ;;  %v3174_v47 = vpop.xlane.xlu0 %3173 }
 0xa6e   :  { %v3065_v52 = vadd.f32 %v3064_v11, %v3060_v38  ;;  %v2853_v53 = vsel %vm2851_vm11, %v2850_v45, %v2852_v19  ;;  %v2740_v50 = vsel %vm2738_vm12, %v2737_v46, %v2739_v37  ;;  %v3179_v9 = vadd.f32 %v3178_v31, %v3174_v47 }
 0xa6f   :  { %v2854_v58 = vsel %vm365_vm3, %v2853_v53, -inf  ;;  %v2741_v60 = vsel %vm365_vm3, %v2740_v50, -inf  ;;  %vm5011_vm11 = vcmask 0  }
 0xa70   :  { %v3067_v61 = vmul.f32 0.2, %v3065_v52  ;;  %2855 = vmax.xlane.f32.xlu1 %v2854_v58  ;;  %2742 = vmax.xlane.f32.xlu0 %v2741_v60  ;;  %vm3066_vm13 = vcmp.gt.f32.partialorder %v3065_v52, 0.0  ;;  %v3181_v32 = vmul.f32 0.2, %v3179_v9  ;;  %vm3180_vm15 = vcmp.gt.f32.partialorder %v3179_v9, 0.0 }
 0xa71   :  { %v3287_v4 = vpop.xlane.xlu1 %3286  ;;  %v2640_v62 = vpop.permute.xlu0 %2639 }
 0xa72   :  { %v3292_v8 = vadd.f32 %v3291_v2, %v3287_v4  ;;  %5292 = vmatpush3.msra.mxu0 %v2640_v62  ;;  %v3068_v25 = vsel %vm3066_vm13, %v3065_v52, %v3067_v61  ;;  %v6351_v54 = vsel %vm3180_vm15, %v3179_v9, %v3181_v32 }
 0xa73   :  { %v3069_v26 = vsel %vm365_vm3, %v3068_v25, -inf  ;;  %5301 = vmatprep.subr.mxu0 %v5719_v18  ;;  %v3183_v0 = vsel %vm365_vm3, %v6351_v54, -inf }
 0xa74   :  { %v3294_v41 = vmul.f32 0.2, %v3292_v8  ;;  %3070 = vmax.xlane.f32.xlu1 %v3069_v26  ;;  %vm3293_vm14 = vcmp.gt.f32.partialorder %v3292_v8, 0.0  ;;  %v3396_v26 = vld [vmem:[#allocation12 + $0x38] sm:$0xff] }
 0xa75   :  { %v2753_v22 = vpop.permute.xlu1 %2752 }
 0xa76   :  { %v3295_v27 = vsel %vm3293_vm14, %v3292_v8, %v3294_v41  ;;  %v3395_v41 = vld [vmem:[#allocation12 + $0x30] sm:$0xff] }
 0xa77   :  { %v3296_v28 = vsel %vm365_vm3, %v3295_v27, -inf }
 0xa78   :  { %3297 = vmax.xlane.f32.xlu1 %v3296_v28  ;;  %v3393_v28 = vld [vmem:[#allocation12 + $0x20] sm:$0xff] }
 0xa79   :  { %v2866_v35 = vpop.permute.xlu1 %2865 }
 0xa86   :  { %3081 = vrot.lane.b32.xlu0 %v6283_v49, %s5722_s24 }
 0xa89   :  { %3194 = vrot.lane.b32.xlu1 %v6283_v49, %s5721_s23 }
 0xaa5   :  { %3184 = vmax.xlane.f32.xlu0 %v3183_v0 }
 0xabb   :  { %3307 = vrot.lane.b32.xlu0 %v6283_v49, %s5720_s15 }
 0xabf   :  { %v2519_v10 = vpop.xlane.xlu0 %2518 }
 0xac0   :  { %v2520_v12 = vsub.f32 %v2516_v55, %v2519_v10 }
 0xac2   :  { %v2521_v51 = vmul.f32 1.442695, %v2520_v12 }
 0xac3   :  { %v2961_v13 = vpop.xlane.xlu0 %2960 }
 0xac4   :  { %5506 = vpow2.f32 %v2521_v51  ;;  %v2962_v17 = vsub.f32 %v6325_v56, %v2961_v13 }
 0xac6   :  { %v2963_v1 = vmul.f32 1.442695, %v2962_v17 }
 0xad1   :  { %v5507_v34 = vpop.eup %5506 }
 0xad2   :  { %5289 = vmatmul.mubr.msk.f32.vlgmr.msra.gmra.mxu1 %vm365_vm3, %v5507_v34  ;;  %v2523_v5 = vsel %vm365_vm3, %v5507_v34, 0.0 }
 0xad3   :  { %5297 = vmatpush3.msra.mxu1 %v2753_v22  ;;  %2524 = vadd.xlane.f32.xlu1 %v2523_v5 }
 0xad4   :  { %5298 = vmatprep.mubr.msk.f32.mxu1 %vm5723_vm5, %v5719_v18  ;;  %5306 = vmatprep.subr.mxu1 %v5719_v18 }
 0xaf5   :  { %v2629_v36 = vpop.xlane.xlu1 %2628 }
 0xaf6   :  { %v2630_v15 = vsub.f32 %v2626_v7, %v2629_v36 }
 0xaf8   :  { %v2631_v16 = vmul.f32 1.442695, %v2630_v15 }
 0xaf9   :  { %v2856_v55 = vpop.xlane.xlu1 %2855  ;;  %v2743_v39 = vpop.xlane.xlu0 %2742 }
 0xafa   :  { %5508 = vpow2.f32 %v2631_v16  ;;  %v2857_v14 = vsub.f32 %v2853_v53, %v2856_v55  ;;  %v2744_v57 = vsub.f32 %v2740_v50, %v2743_v39 }
 0xafc   :  { %v2858_v59 = vmul.f32 1.442695, %v2857_v14  ;;  %v2745_v63 = vmul.f32 1.442695, %v2744_v57 }
 0xafd   :  { %v3071_v3 = vpop.xlane.xlu1 %3070  ;;  %v3082_v19 = vpop.permute.xlu0 %3081 }
 0xafe   :  { %5510 = vpow2.f32 %v2858_v59  ;;  %v3072_v40 = vsub.f32 %v3068_v25, %v3071_v3 }
 0xaff   :  { %5512 = vpow2.f32 %v2745_v63 }
 0xb00   :  { %v3073_v43 = vmul.f32 1.442695, %v3072_v40  ;;  %5514 = vpow2.f32 %v2963_v1 }
 0xb01   :  { %v3298_v44 = vpop.xlane.xlu1 %3297 }
 0xb02   :  { %5516 = vpow2.f32 %v3073_v43  ;;  %v3299_v45 = vsub.f32 %v3295_v27, %v3298_v44  ;;  %v3394_v27 = vld [vmem:[#allocation12 + $0x28] sm:$0xff] }
 0xb04   :  { %v3300_v46 = vmul.f32 1.442695, %v3299_v45 }
 0xb05   :  { %v3195_v50 = vpop.permute.xlu1 %3194 }
 0xb06   :  { %5518 = vpow2.f32 %v3300_v46 }
 0xb07   :  { %v5509_v56 = vpop.eup %5508 }
 0xb08   :  { %5294 = vmatmul.mubr.msk.f32.vlgmr.msra.gmra.mxu0 %vm365_vm3, %v5509_v56  ;;  %v2633_v7 = vsel %vm365_vm3, %v5509_v56, 0.0 }
 0xb09   :  { %5302 = vmatpush3.msra.mxu0 %v2866_v35  ;;  %2634 = vadd.xlane.f32.xlu0 %v2633_v7 }
 0xb0a   :  { %5303 = vmatprep.mubr.msk.f32.mxu0 %vm5723_vm5, %v5719_v18  ;;  %5311 = vmatprep.subr.mxu0 %v5719_v18 }
 0xb0b   :  { %v5511_v48 = vpop.eup %5510 }
 0xb0c   :  { %v5513_v11 = vpop.eup %5512  ;;  %5304 = vmatmul.mubr.msk.f32.vlgmr.msra.gmra.mxu0 %vm365_vm3, %v5511_v48  ;;  %v2860_v37 = vsel %vm365_vm3, %v5511_v48, 0.0 }
 0xb0d   :  { %5299 = vmatmul.mubr.msk.f32.vlgmr.msra.gmra.mxu1 %vm365_vm3, %v5513_v11  ;;  %5312 = vmatpush3.msra.mxu0 %v3082_v19  ;;  %v2747_v38 = vsel %vm365_vm3, %v5513_v11, 0.0  ;;  %v5515_v47 = vpop.eup %5514 }
 0xb0e   :  { %5307 = vmatpush3.msra.mxu1 %v6283_v49  ;;  %2861 = vadd.xlane.f32.xlu1 %v2860_v37  ;;  %v2965_v49 = vsel %vm365_vm3, %v5515_v47, 0.0 }
 0xb0f   :  { %v5517_v52 = vpop.eup %5516  ;;  %2748 = vadd.xlane.f32.xlu0 %v2747_v38  ;;  %5308 = vmatprep.mubr.msk.f32.mxu1 %vm5723_vm5, %v5719_v18 }
 0xb10   :  { %5313 = vmatprep.mubr.msk.f32.mxu0 %vm5723_vm5, %v5719_v18  ;;  %5316 = vmatprep.subr.mxu1 %v5719_v18  ;;  %v3075_v53 = vsel %vm365_vm3, %v5517_v52, 0.0 }
 0xb11   :  { %5309 = vmatmul.mubr.msk.f32.vlgmr.msra.gmra.mxu1 %vm365_vm3, %v5515_v47  ;;  %5314 = vmatmul.mubr.msk.f32.vlgmr.msra.gmra.mxu0 %vm365_vm3, %v5517_v52 }
 0xb12   :  { %5317 = vmatpush3.msra.mxu1 %v3195_v50  ;;  %3076 = vadd.xlane.f32.xlu1 %v3075_v53 }
 0xb13   :  { %v5519_v58 = vpop.eup %5518  ;;  %2966 = vadd.xlane.f32.xlu0 %v2965_v49  ;;  %5321 = vmatprep.subr.mxu0 %v5719_v18 }
 0xb14   :  { %v3302_v60 = vsel %vm365_vm3, %v5519_v58, 0.0  ;;  %5323 = vmatprep.mubr.msk.f32.mxu0 %vm5723_vm5, %v5719_v18  ;;  %5318 = vmatprep.mubr.msk.f32.mxu1 %vm5723_vm5, %v5719_v18 }
 0xb15   :  { %5326 = vmatprep.subr.mxu1 %v5719_v18 }
 0xb16   :  { %3303 = vadd.xlane.f32.xlu1 %v3302_v60 }
 0xb2e   :  { %v3185_v61 = vpop.xlane.xlu0 %3184 }
 0xb2f   :  { %v3186_v2 = vsub.f32 %v6351_v54, %v3185_v61 }
 0xb31   :  { %v3187_v4 = vmul.f32 1.442695, %v3186_v2 }
 0xb32   :  { %v3308_v62 = vpop.permute.xlu0 %3307 }
 0xb33   :  { %5520 = vpow2.f32 %v3187_v4  ;;  %5322 = vmatpush3.msra.mxu0 %v3308_v62 }
 0xb34   :  { %5324 = vmatmul.mubr.msk.f32.vlgmr.msra.gmra.mxu0 %vm365_vm3, %v5519_v58 }
 0xb35   :  { %3603 = vmatprep.mubr.f32.mxu0 %v5719_v18 }
 0xb40   :  { %v5521_v8 = vpop.eup %5520 }
 0xb41   :  { %5319 = vmatmul.mubr.msk.f32.vlgmr.msra.gmra.mxu1 %vm365_vm3, %v5521_v8  ;;  %v3189_v25 = vsel %vm365_vm3, %v5521_v8, 0.0 }
 0xb42   :  { %3190 = vadd.xlane.f32.xlu0 %v3189_v25  ;;  %5334 = vmatprep.mubr.msk.f32.mxu1 %vm5723_vm5, %v5719_v18 }
 0xb43   :  { %5327 = vmatpush3.msra.mxu1 %v3396_v26 }
 0xb44   :  { %5328 = vmatprep.subr.mxu1 %v5719_v18 }
 0xb45   :  { %5329 = vmatpush3.msra.mxu1 %v3395_v41 }
 0xb46   :  { %5330 = vmatprep.subr.mxu1 %v5719_v18 }
 0xb47   :  { %5331 = vmatpush3.msra.mxu1 %v3394_v27 }
 0xb48   :  { %5332 = vmatprep.subr.mxu1 %v5719_v18 }
 0xb49   :  { %5333 = vmatpush3.msra.mxu1 %v3393_v28 }
 0xb5c   :  { %v2525_v36 = vpop.xlane.xlu1 %2524 }
 0xb92   :  { %v2597_v31 = vpop.f32.mrf.mxu1  ;;  %v2635_v13 = vpop.xlane.xlu0 %2634 }
 0xb93   :  { %5522 = vrcp.f32 %v2635_v13  ;;  %v6404_v13 = vld [vmem:[#allocation11 + $0x10] sm:$0xff] }
 0xb94   :  { %v5290_v9 = vpop.f32.mrf.mxu1  ;;  %5524 = vrcp.f32 %v2525_v36  ;;  %v3899_v36 = vrot.slane %v6404_v13, %v5896_v20 }
 0xb96   :  { %3901 = vrot.lane.b32.xlu1 %v3899_v36, %s5721_s23 }
 0xb97   :  { %v2862_v16 = vpop.xlane.xlu1 %2861 }
 0xb98   :  { %v2749_v15 = vpop.xlane.xlu0 %2748 }
 0xb99   :  { %5526 = vrcp.f32 %v2749_v15  ;;  %v3785_v15 = vrot.slane %v6404_v13, %v5899_v21 }
 0xb9a   :  { %5528 = vrcp.f32 %v2862_v16  ;;  %v4012_v16 = vrot.slane %v6404_v13, %v5909_v24 }
 0xb9b   :  { %v3077_v55 = vpop.xlane.xlu1 %3076  ;;  %3787 = vrot.lane.b32.xlu0 %v3785_v15, %s5720_s15  ;;  %v3683_v15 = vrot.slane %v6404_v13, %v5936_v33 }
 0xb9c   :  { %v2967_v17 = vpop.xlane.xlu0 %2966  ;;  %4014 = vrot.lane.b32.xlu1 %v4012_v16, %s5722_s24 }
 0xb9d   :  { %5530 = vrcp.f32 %v2967_v17  ;;  %v4227_v17 = vrot.slane %v6404_v13, %v5905_v23 }
 0xb9e   :  { %5532 = vrcp.f32 %v3077_v55  ;;  %v4341_v55 = vrot.slane %v6404_v13, %v5922_v29 }
 0xb9f   :  { %v3304_v1 = vpop.xlane.xlu1 %3303  ;;  %4229 = vrot.lane.b32.xlu0 %v4227_v17, %s5720_s15 }
 0xba0   :  { %v5523_v39 = vpop.eup %5522  ;;  %4343 = vrot.lane.b32.xlu1 %v4341_v55, %s5721_s23 }
 0xba1   :  { %v5525_v14 = vpop.eup %5524  ;;  %v2637_v63 = vmul.f32 0.125, %v5523_v39  ;;  %v4454_v39 = vrot.slane %v6404_v13, %v5925_v30 }
 0xba2   :  { %v2527_v3 = vmul.f32 0.125, %v5525_v14  ;;  %v5074_v14 = vld [vmem:[%s6638_s8 + $0x1] ss:$0 sm:$0xff] }
 0xba3   :  { %4456 = vrot.lane.b32.xlu0 %v4454_v39, %s5722_s24 }
 0xba4   :  { %v2601_v44 = vmul.f32 %v2597_v31, %v2527_v3  ;;  %v5070_v31 = vld [vmem:[%s6636_s6 + $0x1] ss:$0 sm:$0xff] }
 0xba6   :  { %v5527_v57 = vpop.eup %5526 }
 0xba7   :  { %v2751_v43 = vmul.f32 0.125, %v5527_v57  ;;  %v5529_v46 = vpop.eup %5528 }
 0xba8   :  { %v2864_v19 = vmul.f32 0.125, %v5529_v46 }
 0xbaa   :  { %v5531_v48 = vpop.eup %5530 }
 0xbab   :  { %v2969_v47 = vmul.f32 0.125, %v5531_v48  ;;  %v5533_v50 = vpop.eup %5532 }
 0xbac   :  { %v3079_v60 = vmul.f32 0.125, %v5533_v50 }
 0xbc8   :  { %v2711_v32 = vpop.f32.mrf.mxu0 }
 0xbc9   :  { %v2715_v40 = vmul.f32 %v2711_v32, %v2637_v63 }
 0xbca   :  { %v5295_v54 = vpop.f32.mrf.mxu0 }
 0xbcb   :  { %v3191_v59 = vpop.xlane.xlu0 %3190  ;;  %v2716_v56 = vadd.f32 %v2715_v40, %v2601_v44 }
 0xbcc   :  { %v2937_v0 = vpop.f32.mrf.mxu0  ;;  %5534 = vrcp.f32 %v3191_v59 }
 0xbcd   :  { %v2824_v10 = vpop.f32.mrf.mxu1  ;;  %5536 = vrcp.f32 %v3304_v1  ;;  %v2941_v38 = vmul.f32 %v2937_v0, %v2864_v19  ;;  %v3528_v0 = vld [vmem:[#allocation9 + $0xb8] sm:$0xff] }
 0xbce   :  { %v5305_v12 = vpop.f32.mrf.mxu0  ;;  %v2828_v45 = vmul.f32 %v2824_v10, %v2751_v43  ;;  %3563 = vmatprep.subr.mxu0 %v3528_v0  ;;  %v3527_v10 = vld [vmem:[#allocation9 + $0xb0] sm:$0xff] }
 0xbcf   :  { %v5300_v51 = vpop.f32.mrf.mxu1  ;;  %3564 = vmatpush1.msra.mxu0 %v3527_v10  ;;  %v3526_v12 = vld [vmem:[#allocation9 + $0xa8] sm:$0xff] }
 0xbd0   :  { %v2829_v11 = vadd.f32 %v2828_v45, %v2716_v56  ;;  %3565 = vmatprep.subr.mxu0 %v3526_v12  ;;  %v3525_v51 = vld [vmem:[#allocation9 + $0xa0] sm:$0xff] }
 0xbd1   :  { %v3039_v34 = vpop.f32.mrf.mxu1  ;;  %v3153_v22 = vpop.f32.mrf.mxu0  ;;  %3566 = vmatpush1.msra.mxu0 %v3525_v51  ;;  %v5078_v12 = vld [vmem:[%s6661_s13 + $0x20] sm:$0xff] }
 0xbd2   :  { %v2942_v52 = vadd.f32 %v2941_v38, %v2829_v11  ;;  %v3043_v53 = vmul.f32 %v3039_v34, %v2969_v47  ;;  %v3157_v2 = vmul.f32 %v3153_v22, %v3079_v60  ;;  %v3524_v34 = vld [vmem:[#allocation9 + $0x98] sm:$0xff]  ;;  %v3523_v22 = vld [vmem:[#allocation9 + $0x90] sm:$0xff] }
 0xbd3   :  { %v5310_v5 = vpop.f32.mrf.mxu1  ;;  %v5315_v35 = vpop.f32.mrf.mxu0  ;;  %3567 = vmatprep.subr.mxu0 %v3524_v34  ;;  %v5076_v60 = vld [vmem:[%s6639_s9 + $0x1] ss:$0 sm:$0xff] }
 0xbd4   :  { %v3044_v58 = vadd.f32 %v3043_v53, %v2942_v52  ;;  %v3522_v5 = vld [vmem:[#allocation9 + $0x88] sm:$0xff]  ;;  %v3521_v35 = vld [vmem:[#allocation9 + $0x80] sm:$0xff]  ;;  %3568 = vmatpush1.msra.mxu0 %v3523_v22 }
 0xbd5   :  { %3569 = vmatprep.subr.mxu0 %v3522_v5 }
 0xbd6   :  { %v3158_v8 = vadd.f32 %v3157_v2, %v3044_v58  ;;  %3570 = vmatpush1.msra.mxu0 %v3521_v35  ;;  %v4125_v35 = vrot.slane %v6404_v13, %v5991_v6 }
 0xbd7   :  { %5337 = vmatprep.subr.mxu0 %v5719_v18 }
 0xbd9   :  { %v5535_v49 = vpop.eup %5534 }
 0xbda   :  { %v5537_v61 = vpop.eup %5536  ;;  %v3193_v4 = vmul.f32 0.125, %v5535_v49 }
 0xbdb   :  { %v3306_v25 = vmul.f32 0.125, %v5537_v61 }
 0xbf4   :  { %v3379_v7 = vpop.f32.mrf.mxu0 }
 0xbf5   :  { %v3383_v27 = vmul.f32 %v3379_v7, %v3306_v25  ;;  %v5079_v25 = vld [vmem:[%s6661_s13 + $0x28] sm:$0xff] }
 0xbf6   :  { %v5325_v37 = vpop.f32.mrf.mxu0 }
 0xc01   :  { %v3266_v62 = vpop.f32.mrf.mxu1 }
 0xc02   :  { %v3270_v26 = vmul.f32 %v3266_v62, %v3193_v4  ;;  %v5077_v4 = vld [vmem:[%s6640_s10 + $0x1] ss:$0 sm:$0xff] }
 0xc03   :  { %v5320_v41 = vpop.f32.mrf.mxu1 }
 0xc04   :  { %v3271_v28 = vadd.f32 %v3270_v26, %v3158_v8 }
 0xc06   :  { %v3384_v9 = vadd.f32 %v3383_v27, %v3271_v28 }
 0xc08   :  { %v3391_v32 = vadd.f32 %v5070_v31, %v3384_v9  ;;  %v3902_v26 = vpop.permute.xlu1 %3901 }
 0xc0a   :  { %v3403_v54 = vadd.f32 %v3391_v32, %v6274_v42 }
 0xc0c   :  { %5335 = vmatmul.mubr.msk.f32.vlgmr.msra.gmra.mxu1 %vm204_vm1, %v3403_v54 }
 0xc0d   :  { %3674 = vmatprep.mubr.f32.mxu1 %v5079_v25  ;;  %v3788_v41 = vpop.permute.xlu0 %3787 }
 0xc0e   :  { %v4015_v27 = vpop.permute.xlu1 %4014 }
 0xc11   :  { %v4230_v28 = vpop.permute.xlu0 %4229 }
 0xc12   :  { %v4344_v51 = vpop.permute.xlu1 %4343 }
 0xc15   :  { %v4457_v34 = vpop.permute.xlu0 %4456 }
 0xccc   :  { %v3479_v57 = vpop.f32.mrf.mxu1 }
 0xccd   :  { %v3480_v59 = vadd.f32 %v5074_v14, %v3479_v57 }
 0xcce   :  { %v5336_v63 = vpop.f32.mrf.mxu1 }
 0xccf   :  { %v3483_v1 = vmax.f32 %v3480_v59, 0.0 }
 0xcd1   :  { %v3484_v3 = vadd.f32 %v3483_v1, %v6274_v42 }
 0xcd3   :  { %v3485_v40 = vsel %vm204_vm1, %v3484_v3, 0.0 }
 0xcd4   :  { %v3486_v43 = vrot.slane %v3485_v40, 4 }
 0xcd6   :  { %v3487_v44 = vadd.f32 %v3486_v43, %v3485_v40 }
 0xcd8   :  { %v3488_v45 = vrot.slane %v3487_v44, 2 }
 0xcda   :  { %v3489_v46 = vadd.f32 %v3488_v45, %v3487_v44 }
 0xcdc   :  { %v3490_v56 = vrot.slane %v3489_v46, 1 }
 0xcde   :  { %v3491_v7 = vadd.f32 %v3490_v56, %v3489_v46 }
 0xce0   :  { %v3492_v48 = vmul.f32 0.125, %v3491_v7 }
 0xce2   :  { %v3493_v11 = vsub.f32 %v3484_v3, %v3492_v48 }
 0xce4   :  { %v3494_v19 = vmul.f32 %v3493_v11, %v3493_v11  ;;  %v3509_v61 = vmul.f32 %v5076_v60, %v3493_v11 }
 0xce6   :  { %v3495_v37 = vsel %vm204_vm1, %v3494_v19, 0.0 }
 0xce7   :  { %v3496_v38 = vrot.slane %v3495_v37, 4 }
 0xce9   :  { %v3497_v47 = vadd.f32 %v3496_v38, %v3495_v37 }
 0xceb   :  { %v3498_v52 = vrot.slane %v3497_v47, 2 }
 0xced   :  { %v3499_v53 = vadd.f32 %v3498_v52, %v3497_v47 }
 0xcef   :  { %v3500_v50 = vrot.slane %v3499_v53, 1 }
 0xcf1   :  { %v3501_v49 = vadd.f32 %v3500_v50, %v3499_v53 }
 0xcf3   :  { %v3502_v42 = vmul.f32 0.125, %v3501_v49 }
 0xcf5   :  { %v3510_v58 = vadd.f32 1e-05, %v3502_v42 }
 0xcf7   :  { %5538 = vrsqrt.f32 %v3510_v58 }
 0xd04   :  { %v5539_v2 = vpop.eup %5538 }
 0xd05   :  { %v3512_v62 = vmul.f32 %v5539_v2, %v3509_v61 }
 0xd07   :  { %v6437_v8 = vadd.f32 %v5077_v4, %v3512_v62 }
 0xd09   :  { %5081 = vmatmul.mubr.msk.f32.vlgmr.msra.gmra.mxu0 %vm204_vm1, %v6437_v8 }
 0xd0a   :  { %5339 = vmatprep.mubr.msk.f32.mxu0 %vm5723_vm5, %v5719_v18 }
 0xdc9   :  { %v3605_v31 = vpop.f32.mrf.mxu0 }
 0xdca   :  { %5338 = vmatpush3.msra.mxu0 %v3605_v31  ;;  %v3904_v9 = vmul.f32 %v3902_v26, %v3605_v31  ;;  %v3790_v32 = vmul.f32 %v3788_v41, %v3605_v31  ;;  %v4017_v0 = vmul.f32 %v4015_v27, %v3605_v31  ;;  %v3684_v17 = vmul.f32 %v3683_v15, %v3605_v31 }
 0xdcb   :  { %v6446_v54 = vpop.f32.mrf.mxu0  ;;  %5347 = vmatprep.subr.mxu0 %v5719_v18 }
 0xdcc   :  { %3906 = vrot.lane.b32.xlu0 %v3904_v9, %s5721_s23  ;;  %3792 = vrot.lane.b32.xlu1 %v3790_v32, %s5722_s24  ;;  %v4232_v10 = vmul.f32 %v4230_v28, %v6446_v54  ;;  %v4346_v22 = vmul.f32 %v4344_v51, %v6446_v54  ;;  %v4459_v5 = vmul.f32 %v4457_v34, %v6446_v54  ;;  %v3685_v55 = vsel %vm204_vm1, %v3684_v17, 0.0 }
 0xdcd   :  { %3640 = vmatprep.subr.mxu1 %v6446_v54  ;;  %v4126_v36 = vmul.f32 %v4125_v35, %v6446_v54 }
 0xdce   :  { %3641 = vmatpush1.xpose.msra.mxu1 %v3605_v31 }
 0xdcf   :  { %5342 = vmatprep.subr.mxu1 %v5719_v18  ;;  %v4127_v16 = vsel %vm204_vm1, %v4126_v36, 0.0 }
 0xdd0   :  { %4019 = vrot.lane.b32.xlu1 %v4017_v0, %s5720_s15  ;;  %4234 = vrot.lane.b32.xlu0 %v4232_v10, %s5722_s24 }
 0xdd1   :  { %3675 = vmatmul.mubr.f32.vlgmr.msra.gmra.mxu1 %v5078_v12 }
 0xdd2   :  { %5344 = vmatprep.mubr.msk.f32.mxu1 %vm5723_vm5, %v5719_v18 }
 0xdd4   :  { %4348 = vrot.lane.b32.xlu1 %v4346_v22, %s5721_s23  ;;  %4461 = vrot.lane.b32.xlu0 %v4459_v5, %s5720_s15 }
 0xdf3   :  { %4128 = vadd.xlane.f32.xlu0 %v4127_v16 }
 0xdf8   :  { %3686 = vadd.xlane.f32.xlu1 %v3685_v55 }
 0xe3e   :  { %v3907_v39 = vpop.permute.xlu0 %3906  ;;  %v3793_v14 = vpop.permute.xlu1 %3792 }
 0xe3f   :  { %v3795_v57 = vsel %vm204_vm1, %v3793_v14, 0.0  ;;  %v3909_v1 = vsel %vm204_vm1, %v3907_v39, 0.0 }
 0xe40   :  { %3796 = vadd.xlane.f32.xlu0 %v3795_v57 }
 0xe42   :  { %v4020_v59 = vpop.permute.xlu1 %4019  ;;  %v4235_v63 = vpop.permute.xlu0 %4234 }
 0xe43   :  { %v4022_v3 = vsel %vm204_vm1, %v4020_v59, 0.0  ;;  %v4237_v40 = vsel %vm204_vm1, %v4235_v63, 0.0 }
 0xe44   :  { %4023 = vadd.xlane.f32.xlu1 %v4022_v3  ;;  %3910 = vadd.xlane.f32.xlu0 %v3909_v1 }
 0xe46   :  { %v4349_v13 = vpop.permute.xlu1 %4348  ;;  %v4462_v44 = vpop.permute.xlu0 %4461 }
 0xe47   :  { %v4351_v43 = vsel %vm204_vm1, %v4349_v13, 0.0  ;;  %v4464_v45 = vsel %vm204_vm1, %v4462_v44, 0.0 }
 0xe48   :  { %4238 = vadd.xlane.f32.xlu1 %v4237_v40  ;;  %4352 = vadd.xlane.f32.xlu0 %v4351_v43 }
 0xe4c   :  { %4465 = vadd.xlane.f32.xlu1 %v4464_v45 }
 0xe5d   :  { %3931 = vrot.lane.b32.xlu1 %v3605_v31, %s5721_s23 }
 0xe5e   :  { %3818 = vrot.lane.b32.xlu0 %v3605_v31, %s5722_s24 }
 0xe61   :  { %4044 = vrot.lane.b32.xlu1 %v3605_v31, %s5720_s15 }
 0xe7c   :  { %v4129_v56 = vpop.xlane.xlu0 %4128 }
 0xe81   :  { %v3687_v11 = vpop.xlane.xlu1 %3686 }
 0xe91   :  { %v6481_v46 = vpop.f32.mrf.mxu1 }
 0xe92   :  { %v3691_v7 = vrot.slane %v6481_v46, %v5936_v33  ;;  %v4133_v48 = vrot.slane %v6481_v46, %v5991_v6  ;;  %v3801_v6 = vrot.slane %v6481_v46, %v5899_v21  ;;  %v4028_v2 = vrot.slane %v6481_v46, %v5909_v24 }
 0xe93   :  { %v3678_v19 = vpop.f32.mrf.mxu1  ;;  %v3915_v4 = vrot.slane %v6481_v46, %v5896_v20  ;;  %v4243_v21 = vrot.slane %v6481_v46, %v5905_v23  ;;  %v4470_v23 = vrot.slane %v6481_v46, %v5925_v30  ;;  %v4357_v30 = vrot.slane %v6481_v46, %v5922_v29 }
 0xe94   :  { %v3692_v37 = vadd.f32 %v3691_v7, %v3687_v11  ;;  %v4134_v38 = vadd.f32 %v4133_v48, %v4129_v56 }
 0xe96   :  { %vm3693_vm0 = vcmp.gt.f32.partialorder %v3692_v37, 0.0  ;;  %v3694_v47 = vmul.f32 0.2, %v3692_v37  ;;  %v4136_v52 = vmul.f32 0.2, %v4134_v38  ;;  %vm4135_vm2 = vcmp.gt.f32.partialorder %v4134_v38, 0.0 }
 0xe98   :  { %v3695_v53 = vsel %vm3693_vm0, %v3692_v37, %v3694_v47  ;;  %v6488_v49 = vsel %vm4135_vm2, %v4134_v38, %v4136_v52 }
 0xe99   :  { %v3696_v50 = vsel %vm365_vm3, %v3695_v53, -inf  ;;  %v4138_v42 = vsel %vm365_vm3, %v6488_v49, -inf }
 0xe9a   :  { %3697 = vmax.xlane.f32.xlu0 %v3696_v50 }
 0xe9e   :  { %4139 = vmax.xlane.f32.xlu0 %v4138_v42 }
 0xec9   :  { %v3797_v58 = vpop.xlane.xlu0 %3796 }
 0xeca   :  { %v3802_v60 = vadd.f32 %v3801_v6, %v3797_v58 }
 0xecc   :  { %v3804_v61 = vmul.f32 0.2, %v3802_v60  ;;  %vm3803_vm4 = vcmp.gt.f32.partialorder %v3802_v60, 0.0 }
 0xecd   :  { %v4024_v62 = vpop.xlane.xlu1 %4023  ;;  %v3911_v25 = vpop.xlane.xlu0 %3910 }
 0xece   :  { %v4029_v26 = vadd.f32 %v4028_v2, %v4024_v62  ;;  %v3916_v41 = vadd.f32 %v3915_v4, %v3911_v25  ;;  %v3805_v27 = vsel %vm3803_vm4, %v3802_v60, %v3804_v61 }
 0xecf   :  { %v3806_v28 = vsel %vm365_vm3, %v3805_v27, -inf }
 0xed0   :  { %v4031_v31 = vmul.f32 0.2, %v4029_v26  ;;  %v3918_v9 = vmul.f32 0.2, %v3916_v41  ;;  %3807 = vmax.xlane.f32.xlu1 %v3806_v28  ;;  %vm4030_vm6 = vcmp.gt.f32.partialorder %v4029_v26, 0.0  ;;  %vm3917_vm7 = vcmp.gt.f32.partialorder %v3916_v41, 0.0 }
 0xed1   :  { %v4239_v24 = vpop.xlane.xlu1 %4238  ;;  %v4353_v32 = vpop.xlane.xlu0 %4352 }
 0xed2   :  { %v4244_v0 = vadd.f32 %v4243_v21, %v4239_v24  ;;  %v4032_v20 = vsel %vm4030_vm6, %v4029_v26, %v4031_v31  ;;  %v3919_v10 = vsel %vm3917_vm7, %v3916_v41, %v3918_v9  ;;  %v4358_v39 = vadd.f32 %v4357_v30, %v4353_v32 }
 0xed3   :  { %v4033_v12 = vsel %vm365_vm3, %v4032_v20, -inf  ;;  %v3920_v51 = vsel %vm365_vm3, %v3919_v10, -inf }
 0xed4   :  { %v4246_v34 = vmul.f32 0.2, %v4244_v0  ;;  %4034 = vmax.xlane.f32.xlu1 %v4033_v12  ;;  %3921 = vmax.xlane.f32.xlu0 %v3920_v51  ;;  %vm4245_vm8 = vcmp.gt.f32.partialorder %v4244_v0, 0.0  ;;  %v4360_v14 = vmul.f32 0.2, %v4358_v39  ;;  %vm4359_vm10 = vcmp.gt.f32.partialorder %v4358_v39, 0.0 }
 0xed5   :  { %v4466_v22 = vpop.xlane.xlu1 %4465  ;;  %v3819_v5 = vpop.permute.xlu0 %3818  ;;  %v4575_v51 = vld [vmem:[#allocation12 + $0x58] sm:$0xff] }
 0xed6   :  { %v4471_v35 = vadd.f32 %v4470_v23, %v4466_v22  ;;  %5343 = vmatpush3.msra.mxu1 %v3819_v5  ;;  %v4247_v36 = vsel %vm4245_vm8, %v4244_v0, %v4246_v34  ;;  %v6514_v57 = vsel %vm4359_vm10, %v4358_v39, %v4360_v14  ;;  %v4574_v34 = vld [vmem:[#allocation12 + $0x50] sm:$0xff]  ;;  %v4573_v23 = vld [vmem:[#allocation12 + $0x48] sm:$0xff]  ;;  %v4572_v22 = vld [vmem:[#allocation12 + $0x40] sm:$0xff] }
 0xed7   :  { %v4248_v15 = vsel %vm365_vm3, %v4247_v36, -inf  ;;  %5352 = vmatprep.subr.mxu1 %v5719_v18  ;;  %v4362_v59 = vsel %vm365_vm3, %v6514_v57, -inf }
 0xed8   :  { %v4473_v16 = vmul.f32 0.2, %v4471_v35  ;;  %4249 = vmax.xlane.f32.xlu1 %v4248_v15  ;;  %vm4472_vm9 = vcmp.gt.f32.partialorder %v4471_v35, 0.0 }
 0xed9   :  { %v3932_v40 = vpop.permute.xlu1 %3931 }
 0xeda   :  { %v4474_v17 = vsel %vm4472_vm9, %v4471_v35, %v4473_v16 }
 0xedb   :  { %v4475_v55 = vsel %vm365_vm3, %v4474_v17, -inf }
 0xedc   :  { %4476 = vmax.xlane.f32.xlu1 %v4475_v55 }
 0xedd   :  { %v4045_v43 = vpop.permute.xlu1 %4044 }
 0xeea   :  { %4260 = vrot.lane.b32.xlu0 %v6446_v54, %s5722_s24 }
 0xeed   :  { %4373 = vrot.lane.b32.xlu1 %v6446_v54, %s5721_s23 }
 0xf09   :  { %4363 = vmax.xlane.f32.xlu0 %v4362_v59 }
 0xf1f   :  { %4486 = vrot.lane.b32.xlu0 %v6446_v54, %s5720_s15 }
 0xf23   :  { %v3698_v63 = vpop.xlane.xlu0 %3697 }
 0xf24   :  { %v3699_v1 = vsub.f32 %v3695_v53, %v3698_v63 }
 0xf26   :  { %v3700_v3 = vmul.f32 1.442695, %v3699_v1 }
 0xf27   :  { %v4140_v44 = vpop.xlane.xlu0 %4139 }
 0xf28   :  { %5540 = vpow2.f32 %v3700_v3  ;;  %v4141_v7 = vsub.f32 %v6488_v49, %v4140_v44 }
 0xf2a   :  { %v4142_v52 = vmul.f32 1.442695, %v4141_v7 }
 0xf35   :  { %v5541_v13 = vpop.eup %5540 }
 0xf36   :  { %5340 = vmatmul.mubr.msk.f32.vlgmr.msra.gmra.mxu0 %vm365_vm3, %v5541_v13  ;;  %v3702_v29 = vsel %vm365_vm3, %v5541_v13, 0.0 }
 0xf37   :  { %5348 = vmatpush3.msra.mxu0 %v3932_v40  ;;  %3703 = vadd.xlane.f32.xlu1 %v3702_v29 }
 0xf38   :  { %5349 = vmatprep.mubr.msk.f32.mxu0 %vm5723_vm5, %v5719_v18  ;;  %5357 = vmatprep.subr.mxu0 %v5719_v18 }
 0xf59   :  { %v3808_v45 = vpop.xlane.xlu1 %3807 }
 0xf5a   :  { %v3809_v46 = vsub.f32 %v3805_v27, %v3808_v45 }
 0xf5c   :  { %v3810_v56 = vmul.f32 1.442695, %v3809_v46 }
 0xf5d   :  { %v4035_v48 = vpop.xlane.xlu1 %4034  ;;  %v3922_v11 = vpop.xlane.xlu0 %3921 }
 0xf5e   :  { %5542 = vpow2.f32 %v3810_v56  ;;  %v4036_v19 = vsub.f32 %v4032_v20, %v4035_v48  ;;  %v3923_v37 = vsub.f32 %v3919_v10, %v3922_v11 }
 0xf60   :  { %v4037_v38 = vmul.f32 1.442695, %v4036_v19  ;;  %v3924_v47 = vmul.f32 1.442695, %v3923_v37 }
 0xf61   :  { %v4250_v53 = vpop.xlane.xlu1 %4249  ;;  %v4261_v62 = vpop.permute.xlu0 %4260 }
 0xf62   :  { %5544 = vpow2.f32 %v4037_v38  ;;  %v4251_v50 = vsub.f32 %v4247_v36, %v4250_v53 }
 0xf63   :  { %5546 = vpow2.f32 %v3924_v47 }
 0xf64   :  { %v4252_v42 = vmul.f32 1.442695, %v4251_v50  ;;  %5548 = vpow2.f32 %v4142_v52 }
 0xf65   :  { %v4477_v6 = vpop.xlane.xlu1 %4476 }
 0xf66   :  { %5550 = vpow2.f32 %v4252_v42  ;;  %v4478_v58 = vsub.f32 %v4474_v17, %v4477_v6 }
 0xf68   :  { %v4479_v60 = vmul.f32 1.442695, %v4478_v58 }
 0xf69   :  { %v4374_v21 = vpop.permute.xlu1 %4373 }
 0xf6a   :  { %5552 = vpow2.f32 %v4479_v60 }
 0xf6b   :  { %v5543_v49 = vpop.eup %5542 }
 0xf6c   :  { %5345 = vmatmul.mubr.msk.f32.vlgmr.msra.gmra.mxu1 %vm365_vm3, %v5543_v49  ;;  %v3812_v61 = vsel %vm365_vm3, %v5543_v49, 0.0 }
 0xf6d   :  { %5353 = vmatpush3.msra.mxu1 %v4045_v43  ;;  %3813 = vadd.xlane.f32.xlu0 %v3812_v61 }
 0xf6e   :  { %5354 = vmatprep.mubr.msk.f32.mxu1 %vm5723_vm5, %v5719_v18  ;;  %5362 = vmatprep.subr.mxu1 %v5719_v18 }
 0xf6f   :  { %v5545_v2 = vpop.eup %5544 }
 0xf70   :  { %v5547_v4 = vpop.eup %5546  ;;  %5355 = vmatmul.mubr.msk.f32.vlgmr.msra.gmra.mxu1 %vm365_vm3, %v5545_v2  ;;  %v4039_v25 = vsel %vm365_vm3, %v5545_v2, 0.0 }
 0xf71   :  { %5350 = vmatmul.mubr.msk.f32.vlgmr.msra.gmra.mxu0 %vm365_vm3, %v5547_v4  ;;  %5363 = vmatpush3.msra.mxu1 %v4261_v62  ;;  %v3926_v26 = vsel %vm365_vm3, %v5547_v4, 0.0  ;;  %v5549_v41 = vpop.eup %5548 }
 0xf72   :  { %5358 = vmatpush3.msra.mxu0 %v6446_v54  ;;  %4040 = vadd.xlane.f32.xlu1 %v4039_v25  ;;  %v4144_v54 = vsel %vm365_vm3, %v5549_v41, 0.0 }
 0xf73   :  { %v5551_v27 = vpop.eup %5550  ;;  %3927 = vadd.xlane.f32.xlu0 %v3926_v26  ;;  %5359 = vmatprep.mubr.msk.f32.mxu0 %vm5723_vm5, %v5719_v18 }
 0xf74   :  { %5364 = vmatprep.mubr.msk.f32.mxu1 %vm5723_vm5, %v5719_v18  ;;  %5367 = vmatprep.subr.mxu0 %v5719_v18  ;;  %v4254_v28 = vsel %vm365_vm3, %v5551_v27, 0.0 }
 0xf75   :  { %5360 = vmatmul.mubr.msk.f32.vlgmr.msra.gmra.mxu0 %vm365_vm3, %v5549_v41  ;;  %5365 = vmatmul.mubr.msk.f32.vlgmr.msra.gmra.mxu1 %vm365_vm3, %v5551_v27 }
 0xf76   :  { %5368 = vmatpush3.msra.mxu0 %v4374_v21  ;;  %4255 = vadd.xlane.f32.xlu1 %v4254_v28 }
 0xf77   :  { %v5553_v31 = vpop.eup %5552  ;;  %4145 = vadd.xlane.f32.xlu0 %v4144_v54  ;;  %5372 = vmatprep.subr.mxu1 %v5719_v18 }
 0xf78   :  { %v4481_v9 = vsel %vm365_vm3, %v5553_v31, 0.0  ;;  %5374 = vmatprep.mubr.msk.f32.mxu1 %vm5723_vm5, %v5719_v18  ;;  %5369 = vmatprep.mubr.msk.f32.mxu0 %vm5723_vm5, %v5719_v18 }
 0xf79   :  { %5377 = vmatprep.subr.mxu0 %v5719_v18 }
 0xf7a   :  { %4482 = vadd.xlane.f32.xlu1 %v4481_v9 }
 0xf92   :  { %v4364_v24 = vpop.xlane.xlu0 %4363 }
 0xf93   :  { %v4365_v32 = vsub.f32 %v6514_v57, %v4364_v24 }
 0xf95   :  { %v4366_v0 = vmul.f32 1.442695, %v4365_v32 }
 0xf96   :  { %v4487_v20 = vpop.permute.xlu0 %4486 }
 0xf97   :  { %5554 = vpow2.f32 %v4366_v0  ;;  %5373 = vmatpush3.msra.mxu1 %v4487_v20  ;;  %v5090_v20 = vld [vmem:[%s6636_s6 + $0x2] ss:$0 sm:$0xff] }
 0xf98   :  { %5375 = vmatmul.mubr.msk.f32.vlgmr.msra.gmra.mxu1 %vm365_vm3, %v5553_v31  ;;  %5388 = vmatprep.subr.mxu1 %v5719_v18 }
 0xf99   :  { %5390 = vmatprep.mubr.msk.f32.mxu1 %vm5723_vm5, %v5719_v18 }
 0xfa4   :  { %v5555_v10 = vpop.eup %5554 }
 0xfa5   :  { %5370 = vmatmul.mubr.msk.f32.vlgmr.msra.gmra.mxu0 %vm365_vm3, %v5555_v10  ;;  %v4368_v12 = vsel %vm365_vm3, %v5555_v10, 0.0 }
 0xfa6   :  { %4369 = vadd.xlane.f32.xlu0 %v4368_v12  ;;  %5385 = vmatprep.mubr.msk.f32.mxu0 %vm5723_vm5, %v5719_v18 }
 0xfa7   :  { %5378 = vmatpush3.msra.mxu0 %v4575_v51 }
 0xfa8   :  { %5379 = vmatprep.subr.mxu0 %v5719_v18 }
 0xfa9   :  { %5380 = vmatpush3.msra.mxu0 %v4574_v34  ;;  %v4793_v34 = vld [vmem:[#allocation2] sm:$0x1] }
 0xfaa   :  { %5381 = vmatprep.subr.mxu0 %v5719_v18  ;;  %4796 = vperm.xlu1 %5438, %v4793_v34  }
 0xfab   :  { %5382 = vmatpush3.msra.mxu0 %v4573_v23  ;;  %v5094_v23 = vld [vmem:[%s6638_s8 + $0x2] ss:$0 sm:$0xff] }
 0xfac   :  { %5383 = vmatprep.subr.mxu0 %v5719_v18 }
 0xfad   :  { %5384 = vmatpush3.msra.mxu0 %v4572_v22 }
 0xfae   :  { %5404 = vmatprep.subr.mxu0 %v5719_v18 }
 0xfc0   :  { %v3704_v1 = vpop.xlane.xlu1 %3703 }
 0xff6   :  { %v3776_v5 = vpop.f32.mrf.mxu0  ;;  %v3814_v63 = vpop.xlane.xlu0 %3813 }
 0xff7   :  { %5556 = vrcp.f32 %v3814_v63 }
 0xff8   :  { %v5341_v35 = vpop.f32.mrf.mxu0  ;;  %5558 = vrcp.f32 %v3704_v1 }
 0xffb   :  { %v4041_v13 = vpop.xlane.xlu1 %4040 }
 0xffc   :  { %v3928_v3 = vpop.xlane.xlu0 %3927 }
 0xffd   :  { %5560 = vrcp.f32 %v3928_v3 }
 0xffe   :  { %5562 = vrcp.f32 %v4041_v13 }
 0xfff   :  { %v4256_v29 = vpop.xlane.xlu1 %4255 }
0x1000   :  { %v4146_v40 = vpop.xlane.xlu0 %4145 }
0x1001   :  { %5564 = vrcp.f32 %v4146_v40 }
0x1002   :  { %5566 = vrcp.f32 %v4256_v29 }
0x1003   :  { %v4483_v7 = vpop.xlane.xlu1 %4482 }
0x1004   :  { %v5557_v43 = vpop.eup %5556 }
0x1005   :  { %v5559_v44 = vpop.eup %5558  ;;  %v3816_v56 = vmul.f32 0.125, %v5557_v43 }
0x1006   :  { %v3706_v48 = vmul.f32 0.125, %v5559_v44 }
0x1008   :  { %v3780_v37 = vmul.f32 %v3776_v5, %v3706_v48 }
0x100a   :  { %v5561_v45 = vpop.eup %5560 }
0x100b   :  { %v3930_v19 = vmul.f32 0.125, %v5561_v45  ;;  %v5563_v47 = vpop.eup %5562 }
0x100c   :  { %v4043_v6 = vmul.f32 0.125, %v5563_v47 }
0x100e   :  { %v5565_v50 = vpop.eup %5564 }
0x100f   :  { %v4148_v49 = vmul.f32 0.125, %v5565_v50  ;;  %v5567_v4 = vpop.eup %5566 }
0x1010   :  { %v4258_v26 = vmul.f32 0.125, %v5567_v4 }
0x1025   :  { %v4797_v34 = vpop.permute.xlu1 %4796 }
0x102c   :  { %v3890_v36 = vpop.f32.mrf.mxu1 }
0x102d   :  { %v3894_v11 = vmul.f32 %v3890_v36, %v3816_v56  ;;  %v5096_v56 = vld [vmem:[%s6639_s9 + $0x2] ss:$0 sm:$0xff] }
0x102e   :  { %v5346_v15 = vpop.f32.mrf.mxu1 }
0x102f   :  { %v4370_v46 = vpop.xlane.xlu0 %4369  ;;  %v3895_v52 = vadd.f32 %v3894_v11, %v3780_v37 }
0x1030   :  { %v4116_v16 = vpop.f32.mrf.mxu1  ;;  %5568 = vrcp.f32 %v4370_v46 }
0x1031   :  { %v4003_v17 = vpop.f32.mrf.mxu0  ;;  %5570 = vrcp.f32 %v4483_v7  ;;  %v4120_v60 = vmul.f32 %v4116_v16, %v4043_v6  ;;  %v4699_v7 = vld [vmem:[%s6641_s11] sm:$0x1] }
0x1032   :  { %v5356_v55 = vpop.f32.mrf.mxu1  ;;  %v4007_v38 = vmul.f32 %v4003_v17, %v3930_v19  ;;  %v5097_v19 = vld [vmem:[%s6640_s10 + $0x2] ss:$0 sm:$0xff] }
0x1033   :  { %v5351_v30 = vpop.f32.mrf.mxu0 }
0x1034   :  { %v4008_v42 = vadd.f32 %v4007_v38, %v3895_v52  ;;  %v4704_v38 = vrot.slane %v4699_v7, %v5936_v33 }
0x1035   :  { %v4218_v39 = vpop.f32.mrf.mxu0  ;;  %v4332_v14 = vpop.f32.mrf.mxu1 }
0x1036   :  { %v4121_v61 = vadd.f32 %v4120_v60, %v4008_v42  ;;  %v4222_v2 = vmul.f32 %v4218_v39, %v4148_v49  ;;  %v4336_v27 = vmul.f32 %v4332_v14, %v4258_v26  ;;  %v4857_v42 = vld [vmem:[#allocation14 + $0x18] sm:$0xff]  ;;  %v4855_v49 = vld [vmem:[#allocation14 + $0x8] sm:$0xff] }
0x1037   :  { %v5361_v57 = vpop.f32.mrf.mxu0  ;;  %v5366_v59 = vpop.f32.mrf.mxu1 }
0x1038   :  { %v4223_v25 = vadd.f32 %v4222_v2, %v4121_v61  ;;  %v4854_v2 = vld [vmem:[#allocation14] sm:$0xff] }
0x103a   :  { %v4337_v54 = vadd.f32 %v4336_v27, %v4223_v25  ;;  %v4935_v27 = vld [vmem:[%s6645_s17 + $0x10] sm:$0xff] }
0x103d   :  { %v5569_v62 = vpop.eup %5568 }
0x103e   :  { %v5571_v41 = vpop.eup %5570  ;;  %v4372_v28 = vmul.f32 0.125, %v5569_v62 }
0x103f   :  { %v4485_v31 = vmul.f32 0.125, %v5571_v41  ;;  %v4936_v41 = vld [vmem:[%s6645_s17 + $0x18] sm:$0xff] }
0x1058   :  { %v4558_v53 = vpop.f32.mrf.mxu1 }
0x1059   :  { %v4562_v32 = vmul.f32 %v4558_v53, %v4485_v31 }
0x105a   :  { %v5376_v58 = vpop.f32.mrf.mxu1 }
0x105b   :  { %v4856_v58 = vld [vmem:[#allocation14 + $0x10] sm:$0xff] }
0x1065   :  { %v4445_v21 = vpop.f32.mrf.mxu0 }
0x1066   :  { %v4449_v9 = vmul.f32 %v4445_v21, %v4372_v28  ;;  %v4934_v28 = vld [vmem:[%s6645_s17 + $0x8] sm:$0xff]  ;;  %v4933_v21 = vld [vmem:[%s6645_s17] sm:$0xff] }
0x1067   :  { %v5371_v24 = vpop.f32.mrf.mxu0 }
0x1068   :  { %v4450_v0 = vadd.f32 %v4449_v9, %v4337_v54  ;;  %v5100_v54 = vld [vmem:[#allocation3] ss:$0 sm:$0xff] }
0x106a   :  { %v4563_v10 = vadd.f32 %v4562_v32, %v4450_v0  ;;  %v4858_v0 = vld [vmem:[%s6644_s16] sm:$0x1]  ;;  %s5724_s16 = smov [#allocation15]  }
0x106b   :  { %s5021_s17 = sshll.u32 %s5724_s16, 4  ;;  %s5022_s17 = int_to_ptr.vmem [resolvable:$true] %s5021_s17 }
0x106c   :  { %v4570_v12 = vadd.f32 %v5090_v20, %v4563_v10  ;;  %s5678_s18 = scalar_lea.vmem %s5022_s17, 16  ;;  %s5682_s28 = scalar_lea.vmem %s5022_s17, 32 }
0x106d   :  { %p5679_p11 = scmp.ne.s32.totalorder %s5022_s17, %s5678_s18  ;;  %p5683_p12 = scmp.lt.s32.totalorder %s5022_s17, %s5022_s17 }
0x106e   :  { %v4582_v51 = vadd.f32 %v4570_v12, %v6437_v8  ;;  %p5684_p13 = scmp.lt.s32.totalorder %s5682_s28, %s5678_s18 }
0x1070   :  { %5386 = vmatmul.mubr.msk.f32.vlgmr.msra.gmra.mxu0 %vm204_vm1, %v4582_v51  ;;  %p5685_p0 = por %p5684_p13, %p5683_p12 }
0x1071   :  { %5412 = vmatprep.mubr.msk.f32.mxu0 %vm5723_vm5, %v5719_v18  ;;  %5405 = vmatpush3.msra.mxu0 %v4936_v41 }
0x1072   :  { %5406 = vmatprep.subr.mxu0 %v5719_v18  ;;  %p5686_p1 = pnand %p5685_p0, %p5679_p11 }
0x1073   :  { %5407 = vmatpush3.msra.mxu0 %v4935_v27 }
0x1074   :  { %5408 = vmatprep.subr.mxu0 %v5719_v18 }
0x1075   :  { %5409 = vmatpush3.msra.mxu0 %v4934_v28 }
0x1076   :  { %5410 = vmatprep.subr.mxu0 %v5719_v18 }
0x1077   :  { %5411 = vmatpush3.msra.mxu0 %v4933_v21 }
0x1130   :  { %v4658_v22 = vpop.f32.mrf.mxu0 }
0x1131   :  { %v4659_v5 = vadd.f32 %v5094_v23, %v4658_v22 }
0x1132   :  { %v5387_v35 = vpop.f32.mrf.mxu0 }
0x1133   :  { %v4662_v36 = vmax.f32 %v4659_v5, 0.0 }
0x1135   :  { %v4663_v15 = vadd.f32 %v4662_v36, %v6437_v8 }
0x1137   :  { %v4664_v16 = vsel %vm204_vm1, %v4663_v15, 0.0 }
0x1138   :  { %v4665_v17 = vrot.slane %v4664_v16, 4 }
0x113a   :  { %v4666_v55 = vadd.f32 %v4665_v17, %v4664_v16  ;;  %v4937_v17 = vld [vmem:[#allocation5] sm:$0x1] }
0x113c   :  { %v4667_v30 = vrot.slane %v4666_v55, 2 }
0x113e   :  { %v4668_v39 = vadd.f32 %v4667_v30, %v4666_v55 }
0x1140   :  { %v4669_v14 = vrot.slane %v4668_v39, 1 }
0x1142   :  { %v4670_v57 = vadd.f32 %v4669_v14, %v4668_v39 }
0x1144   :  { %v4671_v59 = vmul.f32 0.125, %v4670_v57 }
0x1146   :  { %v4672_v63 = vsub.f32 %v4663_v15, %v4671_v59 }
0x1148   :  { %v4673_v1 = vmul.f32 %v4672_v63, %v4672_v63  ;;  %v4688_v48 = vmul.f32 %v5096_v56, %v4672_v63 }
0x114a   :  { %v4674_v3 = vsel %vm204_vm1, %v4673_v1, 0.0 }
0x114b   :  { %v4675_v13 = vrot.slane %v4674_v3, 4 }
0x114d   :  { %v4676_v40 = vadd.f32 %v4675_v13, %v4674_v3 }
0x114f   :  { %v4677_v29 = vrot.slane %v4676_v40, 2 }
0x1151   :  { %v4678_v43 = vadd.f32 %v4677_v29, %v4676_v40 }
0x1153   :  { %v4679_v44 = vrot.slane %v4678_v43, 1 }
0x1155   :  { %v4680_v45 = vadd.f32 %v4679_v44, %v4678_v43 }
0x1157   :  { %v4681_v8 = vmul.f32 0.125, %v4680_v45 }
0x1159   :  { %v4689_v46 = vadd.f32 1e-05, %v4681_v8 }
0x115b   :  { %5572 = vrsqrt.f32 %v4689_v46 }
0x1168   :  { %v5573_v11 = vpop.eup %5572 }
0x1169   :  { %v4691_v37 = vmul.f32 %v5573_v11, %v4688_v48 }
0x116b   :  { %v4698_v47 = vadd.f32 %v5097_v19, %v4691_v37 }
0x116d   :  { %v4846_v52 = vsel %vm204_vm1, %v4698_v47, 0.0  ;;  %5389 = vmatpush3.xpose.msk.msra.mxu1 %vm204_vm1, %v4698_v47  ;;  %v4706_v53 = vmul.f32 %v4704_v38, %v4698_v47 }
0x116e   :  { %v4847_v50 = vrot.slane %v4846_v52, 4  ;;  %5393 = vmatprep.subr.mxu1 %v5719_v18 }
0x116f   :  { %v4707_v6 = vsel %vm204_vm1, %v4706_v53, 0.0 }
0x1170   :  { %4708 = vadd.xlane.f32.xlu0 %v4707_v6  ;;  %5391 = vmatmul.mubr.msk.f32.vlgmr.msra.gmra.mxu1 %vm204_vm1, %v4699_v7  ;;  %v4848_v60 = vadd.f32 %v4847_v50, %v4846_v52 }
0x1171   :  { %5394 = vmatpush3.msra.mxu1 %v4857_v42  ;;  %5401 = vmatprep.mubr.msk.f32.mxu1 %vm5723_vm5, %v5719_v18 }
0x1172   :  { %5395 = vmatprep.subr.mxu1 %v5719_v18  ;;  %v4849_v61 = vrot.slane %v4848_v60, 2 }
0x1173   :  { %5396 = vmatpush3.msra.mxu1 %v4856_v58 }
0x1174   :  { %5397 = vmatprep.subr.mxu1 %v5719_v18  ;;  %v4850_v4 = vadd.f32 %v4849_v61, %v4848_v60 }
0x1175   :  { %5398 = vmatpush3.msra.mxu1 %v4855_v49 }
0x1176   :  { %5399 = vmatprep.subr.mxu1 %v5719_v18  ;;  %v4851_v62 = vrot.slane %v4850_v4, 1  ;;  %v4802_v18 = vrot.slane %v4797_v34, %v5936_v33 }
0x1177   :  { %5400 = vmatpush3.msra.mxu1 %v4854_v2 }
0x1178   :  { %v4852_v25 = vadd.f32 %v4851_v62, %v4850_v4 }
0x117a   :  { %v4853_v26 = vmul.f32 0.125, %v4852_v25 }
0x117c   :  { %5402 = vmatmul.mubr.msk.f32.vlgmr.msra.gmra.mxu1 %vm204_vm1, %v4853_v26 }
0x11f9   :  { %v4709_v31 = vpop.xlane.xlu0 %4708 }
0x11fa   :  { %v4792_v9 = vmul.f32 %v5100_v54, %v4709_v31 }
0x11fc   :  { %4806 = vperm.xlu0 %5439, %v4792_v9  }
0x1230   :  { %v4781_v24 = vpop.f32.mrf.mxu1 }
0x1231   :  { %v4803_v23 = vmul.f32 %v4802_v18, %v4781_v24  ;;  %v4830_v63 = vrot.slane %v4781_v24, %v5936_v33 }
0x1232   :  { %v5392_v32 = vpop.f32.mrf.mxu1 }
0x1233   :  { %v4812_v22 = vrot.slane %v4803_v23, %v5936_v33 }
0x123c   :  { %v4928_v20 = vpop.f32.mrf.mxu1 }
0x123d   :  { %v4929_v10 = vadd.f32 %v4928_v20, %v4858_v0 }
0x123e   :  { %v5403_v12 = vpop.f32.mrf.mxu1 }
0x123f   :  { %v4932_v51 = vmax.f32 %v4929_v10, 0.0 }
0x1241   :  { %5413 = vmatmul.mubr.msk.f32.vlgmr.msra.gmra.mxu0 %vm204_vm1, %v4932_v51 }
0x1277   :  { %v4807_v5 = vpop.permute.xlu0 %4806 }
0x1278   :  { %v4813_v35 = vadd.f32 %v4812_v22, %v4807_v5 }
0x127a   :  { %v4815_v36 = vmul.f32 0.2, %v4813_v35  ;;  %vm4814_vm5 = vcmp.gt.f32.partialorder %v4813_v35, 0.0 }
0x127c   :  { %v4816_v15 = vsel %vm4814_vm5, %v4813_v35, %v4815_v36 }
0x127d   :  { %v4817_v16 = vsel %vm365_vm3, %v4816_v15, -inf }
0x127e   :  { %4818 = vmax.xlane.f32.xlu1 %v4817_v16 }
0x1301   :  { %v5007_v55 = vpop.f32.mrf.mxu0 }
0x1302   :  { %v5008_v30 = vadd.f32 %v5007_v55, %v4937_v17 }
0x1303   :  { %v5414_v39 = vpop.f32.mrf.mxu0 }
0x1304   :  { %5012 = vst.msk [vmem:[#allocation15] sm:$0x1] %vm5011_vm11, %v5008_v30 }
0x1307   :  { %v4819_v14 = vpop.xlane.xlu1 %4818 }
0x1308   :  { %v4820_v57 = vsub.f32 %v4816_v15, %v4819_v14 }
0x130a   :  { %v4821_v59 = vmul.f32 1.442695, %v4820_v57 }
0x130c   :  { %5574 = vpow2.f32 %v4821_v59 }
0x1319   :  { %v5575_v1 = vpop.eup %5574 }
0x131a   :  { %v4823_v3 = vsel %vm365_vm3, %v5575_v1, 0.0  ;;  %v4831_v13 = vmul.f32 %v5575_v1, %v4830_v63 }
0x131b   :  { %4824 = vadd.xlane.f32.xlu0 %v4823_v3 }
0x131c   :  { %v4832_v40 = vsel %vm365_vm3, %v4831_v13, 0.0 }
0x131d   :  { %4833 = vadd.xlane.f32.xlu1 %v4832_v40 }
0x131e   :  { %5689 = shalt.err (!%p5686_p1)
}
0x131f   :  { %5024 = dma.vmem_to_hbm [thread:$0]  %s5022_s17, 16, %s6647_s20, [#allocation8]   ;;  %v5101_v43 = vld [vmem:[#allocation4] ss:$0 sm:$0xff]  ;;  %vm4844_vm1 = vcmask 7168  }
0x13a4   :  { %v4825_v33 = vpop.xlane.xlu0 %4824 }
0x13a5   :  { %5576 = vrcp.f32 %v4825_v33 }
0x13a6   :  { %v4834_v44 = vpop.xlane.xlu1 %4833 }
0x13b2   :  { %v5577_v29 = vpop.eup %5576 }
0x13b3   :  { %v4835_v45 = vmul.f32 %v5577_v29, %v4834_v44 }
0x13b5   :  { %v4843_v8 = vadd.f32 %v5101_v43, %v4835_v45 }
0x13b7   :  { %4845 = vst.msk [vmem:[%s6646_s19] sm:$0xff] %vm4844_vm1, %v4843_v8 }
0x13b8   :  { %5704 = dma.done.wait [#allocation8], 16  }
0x13b9   :  { %5705 = vsyncadd [#allocation8], 4294967280 }
0x13ba   :  { %5030 = vsyncpa [#allocation7], 1 }
0x13bb   :  { %5031 = vsyncpa [#allocation10], 1 }
0x13bc   :  { %5032 = vsyncpa [#allocation13], 1 }
0x13bd   :  { %5033 = vsyncpa [#allocation8], 1 }

</bundles_post_ra>
